<compile_context>
chip_gen: v5e
topology: v5e:2x2
jax: 0.10.0
libtpu: 0.0.40
codegen_flags: <defaults>
</compile_context>

<pallas_src>
import math
from functools import partial

import jax
import jax.numpy as jnp
from jax.experimental import pallas as pl
from jax.experimental.pallas import tpu as pltpu

BN_EPS = 1e-5
C_PAD = 128                      # lane-dense channel padding
HW_PAD = 256                     # per-batch padded row count for 14x14=196
VMEM_LIMIT = 32 * 1024 * 1024    # safe scoped-VMEM budget on v5e/v6e/v7x


# ------------------------------ tiling helpers ------------------------------ #

def _pick_tm(M, cap=512):
    """M tile: multiple of 16 (bf16 sublane-dense), <= cap, dividing M,
    preferring >= 2 programs so both v7x TensorCores get work.  Falls back to a
    single full-M block (always legal) rather than a degenerate small tile."""
    if M <= 256:
        return M
    half = M // 2
    if M % 2 == 0 and half % 16 == 0 and half <= cap:
        return half
    t = (min(cap, M) // 16) * 16
    while t >= 16:
        if M % t == 0:
            return t
        t -= 16
    return M


# ------------------------------ Pallas kernels ------------------------------ #

def _mm_epilogue_kernel(*refs, relu, has_res):
    """One-shot matmul (full K in a single block) + BN scale/shift epilogue
    (+ residual) (+ ReLU), f32 accumulation, bf16 lane-dense store."""
    if has_res:
        x_ref, w_ref, s_ref, b_ref, res_ref, o_ref = refs
    else:
        x_ref, w_ref, s_ref, b_ref, o_ref = refs
        res_ref = None
    y = jnp.dot(x_ref[...], w_ref[...], preferred_element_type=jnp.float32)
    y = y * s_ref[...] + b_ref[...]
    if res_ref is not None:
        y = y + res_ref[...].astype(jnp.float32)
    if relu:
        y = jnp.maximum(y, 0.0)
    o_ref[...] = y.astype(o_ref.dtype)


def _post_stem_kernel(x_ref, w1_ref, s1_ref, b1_ref, w2_ref, s2_ref, b2_ref,
                      pw1_ref, ps1_ref, pb1_ref, pw2_ref, pb2_ref,
                      feats_ref, logits_ref, *, n_blocks, hw_real, inv_hw):
    """Entire post-stem network for ONE batch element (one grid step):
    n_blocks x FFN (fc1+BN+ReLU, fc2+BN, +shortcut) with per-block feature-map
    writeback, then GAP over the real rows, 1x1 conv + BN + ReLU, 1x1 conv."""
    x = x_ref[...]                                           # (HW_PAD, C) bf16
    for blk in range(n_blocks):
        h = jnp.dot(x, w1_ref[blk], preferred_element_type=jnp.float32)
        h = jnp.maximum(h * s1_ref[blk] + b1_ref[blk], 0.0)
        y = jnp.dot(h.astype(jnp.bfloat16), w2_ref[blk],
                    preferred_element_type=jnp.float32)
        y = y * s2_ref[blk] + b2_ref[blk] + x.astype(jnp.float32)
        x = y.astype(jnp.bfloat16)
        feats_ref[blk, :, :] = x

    # Global average pool over the real (non padded) rows only.
    x32 = x.astype(jnp.float32)
    row = jax.lax.broadcasted_iota(jnp.int32, x32.shape, 0)
    pooled = jnp.sum(jnp.where(row < hw_real, x32, 0.0), axis=0,
                     keepdims=True) * inv_hw                 # (1, C)

    z = jnp.dot(pooled.astype(jnp.bfloat16), pw1_ref[...],
                preferred_element_type=jnp.float32)
    z = jnp.maximum(z * ps1_ref[...] + pb1_ref[...], 0.0)
    logits = jnp.dot(z.astype(jnp.bfloat16), pw2_ref[...],
                     preferred_element_type=jnp.float32) + pb2_ref[...]
    # Output block is (8, Ncls) to keep the store sublane-aligned; row 0 is
    # the real logits row (sliced in the wrapper).
    logits_ref[...] = jnp.broadcast_to(logits, logits_ref.shape)


# ------------------------------ Pallas wrappers ----------------------------- #

def fused_matmul(x, w, scale, shift, *, relu=False, residual=None,
                 residual_broadcast=False):
    """out = [relu]((x @ w) * scale + shift [+ residual]); single K block,
    1-D "parallel" M grid."""
    M, K = x.shape
    Kw, N = w.shape
    assert K == Kw
    if residual is not None and residual_broadcast:
        tm = residual.shape[0]            # residual repeats every tm rows
    else:
        tm = _pick_tm(M)
    assert M % tm == 0
    grid = (M // tm,)

    x = x.astype(jnp.bfloat16)
    w = w.astype(jnp.bfloat16)
    scale = scale.reshape(1, N).astype(jnp.float32)
    shift = shift.reshape(1, N).astype(jnp.float32)

    in_specs = [
        pl.BlockSpec((tm, K), lambda i: (i, 0)),
        pl.BlockSpec((K, N), lambda i: (0, 0)),
        pl.BlockSpec((1, N), lambda i: (0, 0)),
        pl.BlockSpec((1, N), lambda i: (0, 0)),
    ]
    args = [x, w, scale, shift]
    bytes_accessed = 2 * M * K + 2 * K * N + 2 * M * N + 8 * N
    if residual is not None:
        if residual_broadcast:
            in_specs.append(pl.BlockSpec((tm, N), lambda i: (0, 0)))
            bytes_accessed += residual.dtype.itemsize * tm * N
        else:
            in_specs.append(pl.BlockSpec((tm, N), lambda i: (i, 0)))
            bytes_accessed += residual.dtype.itemsize * M * N
        args.append(residual)

    kernel = partial(_mm_epilogue_kernel, relu=relu,
                     has_res=residual is not None)
    return pl.pallas_call(
        kernel,
        out_shape=jax.ShapeDtypeStruct((M, N), jnp.bfloat16),
        grid=grid,
        in_specs=in_specs,
        out_specs=pl.BlockSpec((tm, N), lambda i: (i, 0)),
        compiler_params=pltpu.CompilerParams(
            dimension_semantics=("parallel",),
            vmem_limit_bytes=VMEM_LIMIT),
        cost_estimate=pl.CostEstimate(flops=2 * M * N * K, transcendentals=0,
                                      bytes_accessed=bytes_accessed),
    )(*args)


def post_stem_network(x_flat, blocks, pred, *, hw_real, hw_pad, B):
    """Both FFN blocks + per-block feature maps + GAP + prediction head as a
    single pallas_call, grid=(B,) (one 256-row block per batch element)."""
    M, C = x_flat.shape                         # (B*hw_pad, C_PAD)
    n_blocks = blocks["w1"].shape[0]
    H = blocks["w1"].shape[2]
    Nh = pred["w1"].shape[1]
    Nc = pred["w2"].shape[1]
    kernel = partial(_post_stem_kernel, n_blocks=n_blocks, hw_real=hw_real,
                     inv_hw=1.0 / hw_real)
    flops = n_blocks * 4 * M * C * H + B * (2 * C * Nh + 2 * Nh * Nc) + M * C
    bytes_accessed = (2 * M * C + 2 * n_blocks * M * C
                      + 2 * n_blocks * 2 * C * H + 8 * n_blocks * (H + C)
                      + 2 * (C * Nh + Nh * Nc) + 4 * (2 * Nh + Nc)
                      + 4 * B * 8 * Nc)
    feats, logits8 = pl.pallas_call(
        kernel,
        out_shape=(jax.ShapeDtypeStruct((n_blocks, M, C), jnp.bfloat16),
                   jax.ShapeDtypeStruct((B * 8, Nc), jnp.float32)),
        grid=(B,),
        in_specs=[
            pl.BlockSpec((hw_pad, C), lambda i: (i, 0)),            # x
            pl.BlockSpec((n_blocks, C, H), lambda i: (0, 0, 0)),    # w1
            pl.BlockSpec((n_blocks, 1, H), lambda i: (0, 0, 0)),    # s1
            pl.BlockSpec((n_blocks, 1, H), lambda i: (0, 0, 0)),    # b1
            pl.BlockSpec((n_blocks, H, C), lambda i: (0, 0, 0)),    # w2
            pl.BlockSpec((n_blocks, 1, C), lambda i: (0, 0, 0)),    # s2
            pl.BlockSpec((n_blocks, 1, C), lambda i: (0, 0, 0)),    # b2
            pl.BlockSpec((C, Nh), lambda i: (0, 0)),                # pred w1
            pl.BlockSpec((1, Nh), lambda i: (0, 0)),                # pred s1
            pl.BlockSpec((1, Nh), lambda i: (0, 0)),                # pred b1
            pl.BlockSpec((Nh, Nc), lambda i: (0, 0)),               # pred w2
            pl.BlockSpec((1, Nc), lambda i: (0, 0)),                # pred b2
        ],
        out_specs=(pl.BlockSpec((n_blocks, hw_pad, C), lambda i: (0, i, 0)),
                   pl.BlockSpec((8, Nc), lambda i: (i, 0))),
        compiler_params=pltpu.CompilerParams(
            dimension_semantics=("parallel",),
            vmem_limit_bytes=VMEM_LIMIT),
        cost_estimate=pl.CostEstimate(flops=flops, transcendentals=0,
                                      bytes_accessed=bytes_accessed),
    )(x_flat, blocks["w1"], blocks["s1"], blocks["b1"],
      blocks["w2"], blocks["s2"], blocks["b2"],
      pred["w1"], pred["s1"], pred["b1"], pred["w2"], pred["b2"])
    return feats, logits8


# --------------------------------- glue ------------------------------------ #

def _im2col(x, k, stride, padding):
    """NHWC (real channels only) -> (B, Ho*Wo, k*k*C) bf16 patch tensor."""
    if padding:
        x = jnp.pad(x, ((0, 0), (padding, padding), (padding, padding), (0, 0)))
    B, Hp, Wp, C = x.shape
    Ho = (Hp - k) // stride + 1
    Wo = (Wp - k) // stride + 1
    cols = []
    for dy in range(k):
        for dx in range(k):
            cols.append(x[:, dy:dy + (Ho - 1) * stride + 1:stride,
                             dx:dx + (Wo - 1) * stride + 1:stride, :])
    cols = jnp.concatenate(cols, axis=-1)               # (B, Ho, Wo, k*k*C)
    return cols.reshape(B, Ho * Wo, k * k * C).astype(jnp.bfloat16), (B, Ho, Wo)


def conv_bn(x, layer, *, residual=None, residual_broadcast=False, pad_rows=0):
    """3x3 Conv + eval-mode BN (+ReLU) (+residual) on NHWC; the patch matrix is
    built from the real input channels only, the output is lane-dense (128)."""
    cin = layer["cin"]
    cols, (B, Ho, Wo) = _im2col(x[..., :cin], 3, layer["stride"], layer["pad"])
    rows = Ho * Wo
    if pad_rows:
        assert pad_rows >= rows
        cols = jnp.pad(cols, ((0, 0), (0, pad_rows - rows), (0, 0)))
        rows = pad_rows
    y = fused_matmul(cols.reshape(B * rows, cols.shape[-1]),
                     layer["w"], layer["scale"], layer["shift"],
                     relu=layer["relu"], residual=residual,
                     residual_broadcast=residual_broadcast)
    return y, (B, Ho, Wo)


# ----------------------------- parameters ----------------------------------- #

def init_params(key, channels=32, n_blocks=2, n_classes=10):
    keys = iter(jax.random.split(key, 64))

    def kaiming(shape, fan_in):   # kaiming_normal_: std = sqrt(2 / fan_in)
        std = math.sqrt(2.0 / fan_in)
        return jax.random.normal(next(keys), shape, jnp.float32) * std

    def bn(n):   # init running stats: mean 0, var 1, gamma 1, beta 0
        scale = jnp.full((1, n), 1.0 / math.sqrt(1.0 + BN_EPS), jnp.float32)
        shift = jnp.zeros((1, n), jnp.float32)
        return scale, shift

    def conv_w(cin, cout, k=3):   # (k*k*cin, C_PAD): real rows, padded out lanes
        w = kaiming((k, k, cin, cout), fan_in=k * k * cin).reshape(k * k * cin, cout)
        wp = jnp.zeros((k * k * cin, C_PAD), jnp.float32).at[:, :cout].set(w)
        return wp.astype(jnp.bfloat16)

    c8, c4, c2 = channels // 8, channels // 4, channels // 2
    stem_cfg = [
        # (cin_real, cout_real, stride, pad, relu)
        (3,        c8,       2, 1, True),
        (c8,       c4,       2, 1, True),
        (c4,       c2,       1, 1, True),
        (c2,       channels, 1, 1, True),
        (channels, channels, 1, 0, False),
    ]
    stem = []
    for cin, cout, s, p, r in stem_cfg:
        scale, shift = bn(C_PAD)
        stem.append(dict(cin=cin, w=conv_w(cin, cout), scale=scale, shift=shift,
                         stride=s, pad=p, relu=r))

    hidden = 4 * channels
    w1s, s1s, b1s, w2s, s2s, b2s = [], [], [], [], [], []
    for _ in range(n_blocks):
        w1 = jnp.zeros((C_PAD, hidden), jnp.float32).at[:channels, :].set(
            kaiming((channels, hidden), fan_in=channels))
        w2 = jnp.zeros((hidden, C_PAD), jnp.float32).at[:, :channels].set(
            kaiming((hidden, channels), fan_in=hidden))
        s1, b1 = bn(hidden)
        s2, b2 = bn(C_PAD)
        w1s.append(w1); w2s.append(w2)
        s1s.append(s1); b1s.append(b1); s2s.append(s2); b2s.append(b2)
    blocks = dict(w1=jnp.stack(w1s).astype(jnp.bfloat16),
                  s1=jnp.stack(s1s), b1=jnp.stack(b1s),
                  w2=jnp.stack(w2s).astype(jnp.bfloat16),
                  s2=jnp.stack(s2s), b2=jnp.stack(b2s))

    n_cls_pad = max(128, -(-n_classes // 128) * 128)
    pw1 = jnp.zeros((C_PAD, 1024), jnp.float32).at[:channels, :].set(
        kaiming((channels, 1024), fan_in=channels))
    ps1, pb1 = bn(1024)
    pw2 = jnp.zeros((1024, n_cls_pad), jnp.float32).at[:, :n_classes].set(
        kaiming((1024, n_classes), fan_in=1024))
    pb2 = jnp.zeros((1, n_cls_pad), jnp.float32)      # final conv bias zero-init
    pred = dict(w1=pw1.astype(jnp.bfloat16), s1=ps1, b1=pb1,
                w2=pw2.astype(jnp.bfloat16), b2=pb2)

    # pos_embed: zero parameter, stored (HW_PAD, C_PAD) -- rows [0,196) x
    # lanes [0,channels) are the real (1, channels, 14, 14) values.
    pos_embed = jnp.zeros((HW_PAD, C_PAD), jnp.float32)
    return dict(stem=stem, pos_embed=pos_embed, blocks=blocks, pred=pred)


# ------------------------------- forward ------------------------------------ #

def deep_gcn_forward(params, inputs_nchw, *, channels, n_classes):
    x = jnp.transpose(inputs_nchw, (0, 2, 3, 1))        # NHWC

    stem = params["stem"]
    for layer in stem[:-1]:
        y, (B, Ho, Wo) = conv_bn(x, layer)
        x = y.reshape(B, Ho, Wo, C_PAD)

    # Last stem conv (BN, no act); "+ pos_embed" fused as a broadcast residual;
    # rows padded per-batch to HW_PAD so the post-stem kernel gets clean tiles.
    x_flat, (B, Ho, Wo) = conv_bn(x, stem[-1], residual=params["pos_embed"],
                                  residual_broadcast=True, pad_rows=HW_PAD)
    hw = Ho * Wo

    # TODO(synk): the Grapher half of each backbone block has no provided
    # definition; it is treated as identity (only the FFN half is lowered).
    feats, logits8 = post_stem_network(x_flat, params["blocks"], params["pred"],
                                       hw_real=hw, hw_pad=HW_PAD, B=B)

    feat1, feat2 = [], []
    for blk in range(feats.shape[0]):
        f = feats[blk].reshape(B, HW_PAD, C_PAD)[:, :hw, :channels]
        feat2.append(f.reshape(B, Ho, Wo, channels).astype(jnp.float32))

    n_cls_pad = logits8.shape[-1]
    logits = logits8.reshape(B, 8, n_cls_pad)[:, 0, :n_classes]
    return logits, None, [feat1, feat2]


# --------------------------------- main -------------------------------------- #

if __name__ == "__main__":
    channels, n_blocks, n_classes = 32, 2, 10
    key = jax.random.PRNGKey(0)
    pkey, xkey = jax.random.split(key)
    params = init_params(pkey, channels=channels, n_blocks=n_blocks,
                         n_classes=n_classes)

    # PyTorch-convention NCHW input; 64x64 so the stem emits 14x14 (matches pos_embed)
    inputs = jax.random.normal(xkey, (2, 3, 64, 64), jnp.float32)

    fwd = jax.jit(partial(deep_gcn_forward, params,
                          channels=channels, n_classes=n_classes))
    logits, _, feats = fwd(inputs)
    jax.block_until_ready(logits)

    assert logits.shape == (2, n_classes)
    assert feats[1][-1].shape == (2, 14, 14, channels)
    print("KERNEL_OK")
</pallas_src>

<mosaic_0001>
module attributes {stable_mosaic.version = 11 : i64} {
  func.func @_mm_epilogue_kernel(%arg0: i32, %arg1: memref<512x27xbf16, #tpu.memory_space<vmem>>, %arg2: memref<27x128xbf16, #tpu.memory_space<vmem>>, %arg3: memref<1x128xf32, #tpu.memory_space<vmem>>, %arg4: memref<1x128xf32, #tpu.memory_space<vmem>>, %arg5: memref<512x128xbf16, #tpu.memory_space<vmem>>) attributes {dimension_semantics = [#tpu.dimension_semantics<parallel>], iteration_bounds = array<i64: 4>, scalar_prefetch = 0 : i64, scratch_operands = 0 : i64, tpu.core_type = #tpu.core_type<tc>, window_params = [{transform_indices = @transform_0, window_bounds = array<i64: 512, 27>}, {pipeline_mode = #tpu.pipeline_mode<synchronous>, transform_indices = @transform_1, window_bounds = array<i64: 27, 128>}, {pipeline_mode = #tpu.pipeline_mode<synchronous>, transform_indices = @transform_2, window_bounds = array<i64: 1, 128>}, {pipeline_mode = #tpu.pipeline_mode<synchronous>, transform_indices = @transform_3, window_bounds = array<i64: 1, 128>}, {transform_indices = @transform_4, window_bounds = array<i64: 512, 128>}]} {
    %c0 = arith.constant 0 : index
    %c0_0 = arith.constant 0 : index
    %0 = vector.load %arg1[%c0, %c0_0] : memref<512x27xbf16, #tpu.memory_space<vmem>>, vector<512x27xbf16>
    %c0_1 = arith.constant 0 : index
    %c0_2 = arith.constant 0 : index
    %1 = vector.load %arg2[%c0_1, %c0_2] : memref<27x128xbf16, #tpu.memory_space<vmem>>, vector<27x128xbf16>
    %cst = arith.constant dense<0.000000e+00> : vector<512x128xf32>
    %2 = tpu.matmul %0, %1, %cst {dimension_numbers = #tpu.dot_dimension_numbers<[1], [0], [0], [1], [0, 0, 1, 1], [], []>} : vector<512x27xbf16>, vector<27x128xbf16>, vector<512x128xf32> -> vector<512x128xf32>
    %c0_3 = arith.constant 0 : index
    %c0_4 = arith.constant 0 : index
    %3 = vector.load %arg3[%c0_3, %c0_4] : memref<1x128xf32, #tpu.memory_space<vmem>>, vector<1x128xf32>
    %4 = vector.broadcast %3 : vector<1x128xf32> to vector<512x128xf32>
    %5 = arith.mulf %2, %4 : vector<512x128xf32>
    %c0_5 = arith.constant 0 : index
    %c0_6 = arith.constant 0 : index
    %6 = vector.load %arg4[%c0_5, %c0_6] : memref<1x128xf32, #tpu.memory_space<vmem>>, vector<1x128xf32>
    %7 = vector.broadcast %6 : vector<1x128xf32> to vector<512x128xf32>
    %8 = arith.addf %5, %7 : vector<512x128xf32>
    %cst_7 = arith.constant 0.000000e+00 : f32
    %9 = vector.broadcast %cst_7 : f32 to vector<512x128xf32>
    %10 = arith.maximumf %8, %9 : vector<512x128xf32>
    %11 = arith.truncf %10 : vector<512x128xf32> to vector<512x128xbf16>
    %c0_8 = arith.constant 0 : index
    %c0_9 = arith.constant 0 : index
    %12 = vector.load %arg5[%c0_8, %c0_9] : memref<512x128xbf16, #tpu.memory_space<vmem>>, vector<512x128xbf16>
    tpu.vector_store %arg5[%c0_8, %c0_9], %11 {strides = array<i32>} : memref<512x128xbf16, #tpu.memory_space<vmem>>, vector<512x128xbf16>,
    return
  }
  func.func @transform_0(%arg0: i32) -> (i32, i32) {
    %c0_i32 = arith.constant 0 : i32
    %c0_i32_0 = arith.constant 0 : i32
    return %arg0, %c0_i32 : i32, i32
  }
  func.func @transform_1(%arg0: i32) -> (i32, i32) {
    %c0_i32 = arith.constant 0 : i32
    %c0_i32_0 = arith.constant 0 : i32
    %c0_i32_1 = arith.constant 0 : i32
    return %c0_i32, %c0_i32_0 : i32, i32
  }
  func.func @transform_2(%arg0: i32) -> (i32, i32) {
    %c0_i32 = arith.constant 0 : i32
    %c0_i32_0 = arith.constant 0 : i32
    %c0_i32_1 = arith.constant 0 : i32
    return %c0_i32, %c0_i32_0 : i32, i32
  }
  func.func @transform_3(%arg0: i32) -> (i32, i32) {
    %c0_i32 = arith.constant 0 : i32
    %c0_i32_0 = arith.constant 0 : i32
    %c0_i32_1 = arith.constant 0 : i32
    return %c0_i32, %c0_i32_0 : i32, i32
  }
  func.func @transform_4(%arg0: i32) -> (i32, i32) {
    %c0_i32 = arith.constant 0 : i32
    %c0_i32_0 = arith.constant 0 : i32
    return %arg0, %c0_i32 : i32, i32
  }
}

module attributes {stable_mosaic.version = 11 : i64} {
  func.func @_mm_epilogue_kernel(%arg0: i32, %arg1: memref<256x36xbf16, #tpu.memory_space<vmem>>, %arg2: memref<36x128xbf16, #tpu.memory_space<vmem>>, %arg3: memref<1x128xf32, #tpu.memory_space<vmem>>, %arg4: memref<1x128xf32, #tpu.memory_space<vmem>>, %arg5: memref<256x128xbf16, #tpu.memory_space<vmem>>) attributes {dimension_semantics = [#tpu.dimension_semantics<parallel>], iteration_bounds = array<i64: 2>, scalar_prefetch = 0 : i64, scratch_operands = 0 : i64, tpu.core_type = #tpu.core_type<tc>, window_params = [{transform_indices = @transform_0, window_bounds = array<i64: 256, 36>}, {pipeline_mode = #tpu.pipeline_mode<synchronous>, transform_indices = @transform_1, window_bounds = array<i64: 36, 128>}, {pipeline_mode = #tpu.pipeline_mode<synchronous>, transform_indices = @transform_2, window_bounds = array<i64: 1, 128>}, {pipeline_mode = #tpu.pipeline_mode<synchronous>, transform_indices = @transform_3, window_bounds = array<i64: 1, 128>}, {transform_indices = @transform_4, window_bounds = array<i64: 256, 128>}]} {
    %c0 = arith.constant 0 : index
    %c0_0 = arith.constant 0 : index
    %0 = vector.load %arg1[%c0, %c0_0] : memref<256x36xbf16, #tpu.memory_space<vmem>>, vector<256x36xbf16>
    %c0_1 = arith.constant 0 : index
    %c0_2 = arith.constant 0 : index
    %1 = vector.load %arg2[%c0_1, %c0_2] : memref<36x128xbf16, #tpu.memory_space<vmem>>, vector<36x128xbf16>
    %cst = arith.constant dense<0.000000e+00> : vector<256x128xf32>
    %2 = tpu.matmul %0, %1, %cst {dimension_numbers = #tpu.dot_dimension_numbers<[1], [0], [0], [1], [0, 0, 1, 1], [], []>} : vector<256x36xbf16>, vector<36x128xbf16>, vector<256x128xf32> -> vector<256x128xf32>
    %c0_3 = arith.constant 0 : index
    %c0_4 = arith.constant 0 : index
    %3 = vector.load %arg3[%c0_3, %c0_4] : memref<1x128xf32, #tpu.memory_space<vmem>>, vector<1x128xf32>
    %4 = vector.broadcast %3 : vector<1x128xf32> to vector<256x128xf32>
    %5 = arith.mulf %2, %4 : vector<256x128xf32>
    %c0_5 = arith.constant 0 : index
    %c0_6 = arith.constant 0 : index
    %6 = vector.load %arg4[%c0_5, %c0_6] : memref<1x128xf32, #tpu.memory_space<vmem>>, vector<1x128xf32>
    %7 = vector.broadcast %6 : vector<1x128xf32> to vector<256x128xf32>
    %8 = arith.addf %5, %7 : vector<256x128xf32>
    %cst_7 = arith.constant 0.000000e+00 : f32
    %9 = vector.broadcast %cst_7 : f32 to vector<256x128xf32>
    %10 = arith.maximumf %8, %9 : vector<256x128xf32>
    %11 = arith.truncf %10 : vector<256x128xf32> to vector<256x128xbf16>
    %c0_8 = arith.constant 0 : index
    %c0_9 = arith.constant 0 : index
    %12 = vector.load %arg5[%c0_8, %c0_9] : memref<256x128xbf16, #tpu.memory_space<vmem>>, vector<256x128xbf16>
    tpu.vector_store %arg5[%c0_8, %c0_9], %11 {strides = array<i32>} : memref<256x128xbf16, #tpu.memory_space<vmem>>, vector<256x128xbf16>,
    return
  }
  func.func @transform_0(%arg0: i32) -> (i32, i32) {
    %c0_i32 = arith.constant 0 : i32
    %c0_i32_0 = arith.constant 0 : i32
    return %arg0, %c0_i32 : i32, i32
  }
  func.func @transform_1(%arg0: i32) -> (i32, i32) {
    %c0_i32 = arith.constant 0 : i32
    %c0_i32_0 = arith.constant 0 : i32
    %c0_i32_1 = arith.constant 0 : i32
    return %c0_i32, %c0_i32_0 : i32, i32
  }
  func.func @transform_2(%arg0: i32) -> (i32, i32) {
    %c0_i32 = arith.constant 0 : i32
    %c0_i32_0 = arith.constant 0 : i32
    %c0_i32_1 = arith.constant 0 : i32
    return %c0_i32, %c0_i32_0 : i32, i32
  }
  func.func @transform_3(%arg0: i32) -> (i32, i32) {
    %c0_i32 = arith.constant 0 : i32
    %c0_i32_0 = arith.constant 0 : i32
    %c0_i32_1 = arith.constant 0 : i32
    return %c0_i32, %c0_i32_0 : i32, i32
  }
  func.func @transform_4(%arg0: i32) -> (i32, i32) {
    %c0_i32 = arith.constant 0 : i32
    %c0_i32_0 = arith.constant 0 : i32
    return %arg0, %c0_i32 : i32, i32
  }
}

module attributes {stable_mosaic.version = 11 : i64} {
  func.func @_mm_epilogue_kernel(%arg0: i32, %arg1: memref<256x72xbf16, #tpu.memory_space<vmem>>, %arg2: memref<72x128xbf16, #tpu.memory_space<vmem>>, %arg3: memref<1x128xf32, #tpu.memory_space<vmem>>, %arg4: memref<1x128xf32, #tpu.memory_space<vmem>>, %arg5: memref<256x128xbf16, #tpu.memory_space<vmem>>) attributes {dimension_semantics = [#tpu.dimension_semantics<parallel>], iteration_bounds = array<i64: 2>, scalar_prefetch = 0 : i64, scratch_operands = 0 : i64, tpu.core_type = #tpu.core_type<tc>, window_params = [{transform_indices = @transform_0, window_bounds = array<i64: 256, 72>}, {pipeline_mode = #tpu.pipeline_mode<synchronous>, transform_indices = @transform_1, window_bounds = array<i64: 72, 128>}, {pipeline_mode = #tpu.pipeline_mode<synchronous>, transform_indices = @transform_2, window_bounds = array<i64: 1, 128>}, {pipeline_mode = #tpu.pipeline_mode<synchronous>, transform_indices = @transform_3, window_bounds = array<i64: 1, 128>}, {transform_indices = @transform_4, window_bounds = array<i64: 256, 128>}]} {
    %c0 = arith.constant 0 : index
    %c0_0 = arith.constant 0 : index
    %0 = vector.load %arg1[%c0, %c0_0] : memref<256x72xbf16, #tpu.memory_space<vmem>>, vector<256x72xbf16>
    %c0_1 = arith.constant 0 : index
    %c0_2 = arith.constant 0 : index
    %1 = vector.load %arg2[%c0_1, %c0_2] : memref<72x128xbf16, #tpu.memory_space<vmem>>, vector<72x128xbf16>
    %cst = arith.constant dense<0.000000e+00> : vector<256x128xf32>
    %2 = tpu.matmul %0, %1, %cst {dimension_numbers = #tpu.dot_dimension_numbers<[1], [0], [0], [1], [0, 0, 1, 1], [], []>} : vector<256x72xbf16>, vector<72x128xbf16>, vector<256x128xf32> -> vector<256x128xf32>
    %c0_3 = arith.constant 0 : index
    %c0_4 = arith.constant 0 : index
    %3 = vector.load %arg3[%c0_3, %c0_4] : memref<1x128xf32, #tpu.memory_space<vmem>>, vector<1x128xf32>
    %4 = vector.broadcast %3 : vector<1x128xf32> to vector<256x128xf32>
    %5 = arith.mulf %2, %4 : vector<256x128xf32>
    %c0_5 = arith.constant 0 : index
    %c0_6 = arith.constant 0 : index
    %6 = vector.load %arg4[%c0_5, %c0_6] : memref<1x128xf32, #tpu.memory_space<vmem>>, vector<1x128xf32>
    %7 = vector.broadcast %6 : vector<1x128xf32> to vector<256x128xf32>
    %8 = arith.addf %5, %7 : vector<256x128xf32>
    %cst_7 = arith.constant 0.000000e+00 : f32
    %9 = vector.broadcast %cst_7 : f32 to vector<256x128xf32>
    %10 = arith.maximumf %8, %9 : vector<256x128xf32>
    %11 = arith.truncf %10 : vector<256x128xf32> to vector<256x128xbf16>
    %c0_8 = arith.constant 0 : index
    %c0_9 = arith.constant 0 : index
    %12 = vector.load %arg5[%c0_8, %c0_9] : memref<256x128xbf16, #tpu.memory_space<vmem>>, vector<256x128xbf16>
    tpu.vector_store %arg5[%c0_8, %c0_9], %11 {strides = array<i32>} : memref<256x128xbf16, #tpu.memory_space<vmem>>, vector<256x128xbf16>,
    return
  }
  func.func @transform_0(%arg0: i32) -> (i32, i32) {
    %c0_i32 = arith.constant 0 : i32
    %c0_i32_0 = arith.constant 0 : i32
    return %arg0, %c0_i32 : i32, i32
  }
  func.func @transform_1(%arg0: i32) -> (i32, i32) {
    %c0_i32 = arith.constant 0 : i32
    %c0_i32_0 = arith.constant 0 : i32
    %c0_i32_1 = arith.constant 0 : i32
    return %c0_i32, %c0_i32_0 : i32, i32
  }
  func.func @transform_2(%arg0: i32) -> (i32, i32) {
    %c0_i32 = arith.constant 0 : i32
    %c0_i32_0 = arith.constant 0 : i32
    %c0_i32_1 = arith.constant 0 : i32
    return %c0_i32, %c0_i32_0 : i32, i32
  }
  func.func @transform_3(%arg0: i32) -> (i32, i32) {
    %c0_i32 = arith.constant 0 : i32
    %c0_i32_0 = arith.constant 0 : i32
    %c0_i32_1 = arith.constant 0 : i32
    return %c0_i32, %c0_i32_0 : i32, i32
  }
  func.func @transform_4(%arg0: i32) -> (i32, i32) {
    %c0_i32 = arith.constant 0 : i32
    %c0_i32_0 = arith.constant 0 : i32
    return %arg0, %c0_i32 : i32, i32
  }
}

module attributes {stable_mosaic.version = 11 : i64} {
  func.func @_mm_epilogue_kernel(%arg0: i32, %arg1: memref<256x144xbf16, #tpu.memory_space<vmem>>, %arg2: memref<144x128xbf16, #tpu.memory_space<vmem>>, %arg3: memref<1x128xf32, #tpu.memory_space<vmem>>, %arg4: memref<1x128xf32, #tpu.memory_space<vmem>>, %arg5: memref<256x128xbf16, #tpu.memory_space<vmem>>) attributes {dimension_semantics = [#tpu.dimension_semantics<parallel>], iteration_bounds = array<i64: 2>, scalar_prefetch = 0 : i64, scratch_operands = 0 : i64, tpu.core_type = #tpu.core_type<tc>, window_params = [{transform_indices = @transform_0, window_bounds = array<i64: 256, 144>}, {pipeline_mode = #tpu.pipeline_mode<synchronous>, transform_indices = @transform_1, window_bounds = array<i64: 144, 128>}, {pipeline_mode = #tpu.pipeline_mode<synchronous>, transform_indices = @transform_2, window_bounds = array<i64: 1, 128>}, {pipeline_mode = #tpu.pipeline_mode<synchronous>, transform_indices = @transform_3, window_bounds = array<i64: 1, 128>}, {transform_indices = @transform_4, window_bounds = array<i64: 256, 128>}]} {
    %c0 = arith.constant 0 : index
    %c0_0 = arith.constant 0 : index
    %0 = vector.load %arg1[%c0, %c0_0] : memref<256x144xbf16, #tpu.memory_space<vmem>>, vector<256x144xbf16>
    %c0_1 = arith.constant 0 : index
    %c0_2 = arith.constant 0 : index
    %1 = vector.load %arg2[%c0_1, %c0_2] : memref<144x128xbf16, #tpu.memory_space<vmem>>, vector<144x128xbf16>
    %cst = arith.constant dense<0.000000e+00> : vector<256x128xf32>
    %2 = tpu.matmul %0, %1, %cst {dimension_numbers = #tpu.dot_dimension_numbers<[1], [0], [0], [1], [0, 0, 1, 1], [], []>} : vector<256x144xbf16>, vector<144x128xbf16>, vector<256x128xf32> -> vector<256x128xf32>
    %c0_3 = arith.constant 0 : index
    %c0_4 = arith.constant 0 : index
    %3 = vector.load %arg3[%c0_3, %c0_4] : memref<1x128xf32, #tpu.memory_space<vmem>>, vector<1x128xf32>
    %4 = vector.broadcast %3 : vector<1x128xf32> to vector<256x128xf32>
    %5 = arith.mulf %2, %4 : vector<256x128xf32>
    %c0_5 = arith.constant 0 : index
    %c0_6 = arith.constant 0 : index
    %6 = vector.load %arg4[%c0_5, %c0_6] : memref<1x128xf32, #tpu.memory_space<vmem>>, vector<1x128xf32>
    %7 = vector.broadcast %6 : vector<1x128xf32> to vector<256x128xf32>
    %8 = arith.addf %5, %7 : vector<256x128xf32>
    %cst_7 = arith.constant 0.000000e+00 : f32
    %9 = vector.broadcast %cst_7 : f32 to vector<256x128xf32>
    %10 = arith.maximumf %8, %9 : vector<256x128xf32>
    %11 = arith.truncf %10 : vector<256x128xf32> to vector<256x128xbf16>
    %c0_8 = arith.constant 0 : index
    %c0_9 = arith.constant 0 : index
    %12 = vector.load %arg5[%c0_8, %c0_9] : memref<256x128xbf16, #tpu.memory_space<vmem>>, vector<256x128xbf16>
    tpu.vector_store %arg5[%c0_8, %c0_9], %11 {strides = array<i32>} : memref<256x128xbf16, #tpu.memory_space<vmem>>, vector<256x128xbf16>,
    return
  }
  func.func @transform_0(%arg0: i32) -> (i32, i32) {
    %c0_i32 = arith.constant 0 : i32
    %c0_i32_0 = arith.constant 0 : i32
    return %arg0, %c0_i32 : i32, i32
  }
  func.func @transform_1(%arg0: i32) -> (i32, i32) {
    %c0_i32 = arith.constant 0 : i32
    %c0_i32_0 = arith.constant 0 : i32
    %c0_i32_1 = arith.constant 0 : i32
    return %c0_i32, %c0_i32_0 : i32, i32
  }
  func.func @transform_2(%arg0: i32) -> (i32, i32) {
    %c0_i32 = arith.constant 0 : i32
    %c0_i32_0 = arith.constant 0 : i32
    %c0_i32_1 = arith.constant 0 : i32
    return %c0_i32, %c0_i32_0 : i32, i32
  }
  func.func @transform_3(%arg0: i32) -> (i32, i32) {
    %c0_i32 = arith.constant 0 : i32
    %c0_i32_0 = arith.constant 0 : i32
    %c0_i32_1 = arith.constant 0 : i32
    return %c0_i32, %c0_i32_0 : i32, i32
  }
  func.func @transform_4(%arg0: i32) -> (i32, i32) {
    %c0_i32 = arith.constant 0 : i32
    %c0_i32_0 = arith.constant 0 : i32
    return %arg0, %c0_i32 : i32, i32
  }
}

module attributes {stable_mosaic.version = 11 : i64} {
  func.func @_mm_epilogue_kernel(%arg0: i32, %arg1: memref<256x288xbf16, #tpu.memory_space<vmem>>, %arg2: memref<288x128xbf16, #tpu.memory_space<vmem>>, %arg3: memref<1x128xf32, #tpu.memory_space<vmem>>, %arg4: memref<1x128xf32, #tpu.memory_space<vmem>>, %arg5: memref<256x128xf32, #tpu.memory_space<vmem>>, %arg6: memref<256x128xbf16, #tpu.memory_space<vmem>>) attributes {dimension_semantics = [#tpu.dimension_semantics<parallel>], iteration_bounds = array<i64: 2>, scalar_prefetch = 0 : i64, scratch_operands = 0 : i64, tpu.core_type = #tpu.core_type<tc>, window_params = [{transform_indices = @transform_0, window_bounds = array<i64: 256, 288>}, {pipeline_mode = #tpu.pipeline_mode<synchronous>, transform_indices = @transform_1, window_bounds = array<i64: 288, 128>}, {pipeline_mode = #tpu.pipeline_mode<synchronous>, transform_indices = @transform_2, window_bounds = array<i64: 1, 128>}, {pipeline_mode = #tpu.pipeline_mode<synchronous>, transform_indices = @transform_3, window_bounds = array<i64: 1, 128>}, {pipeline_mode = #tpu.pipeline_mode<synchronous>, transform_indices = @transform_4, window_bounds = array<i64: 256, 128>}, {transform_indices = @transform_5, window_bounds = array<i64: 256, 128>}]} {
    %c0 = arith.constant 0 : index
    %c0_0 = arith.constant 0 : index
    %0 = vector.load %arg1[%c0, %c0_0] : memref<256x288xbf16, #tpu.memory_space<vmem>>, vector<256x288xbf16>
    %c0_1 = arith.constant 0 : index
    %c0_2 = arith.constant 0 : index
    %1 = vector.load %arg2[%c0_1, %c0_2] : memref<288x128xbf16, #tpu.memory_space<vmem>>, vector<288x128xbf16>
    %cst = arith.constant dense<0.000000e+00> : vector<256x128xf32>
    %2 = tpu.matmul %0, %1, %cst {dimension_numbers = #tpu.dot_dimension_numbers<[1], [0], [0], [1], [0, 0, 1, 1], [], []>} : vector<256x288xbf16>, vector<288x128xbf16>, vector<256x128xf32> -> vector<256x128xf32>
    %c0_3 = arith.constant 0 : index
    %c0_4 = arith.constant 0 : index
    %3 = vector.load %arg3[%c0_3, %c0_4] : memref<1x128xf32, #tpu.memory_space<vmem>>, vector<1x128xf32>
    %4 = vector.broadcast %3 : vector<1x128xf32> to vector<256x128xf32>
    %5 = arith.mulf %2, %4 : vector<256x128xf32>
    %c0_5 = arith.constant 0 : index
    %c0_6 = arith.constant 0 : index
    %6 = vector.load %arg4[%c0_5, %c0_6] : memref<1x128xf32, #tpu.memory_space<vmem>>, vector<1x128xf32>
    %7 = vector.broadcast %6 : vector<1x128xf32> to vector<256x128xf32>
    %8 = arith.addf %5, %7 : vector<256x128xf32>
    %c0_7 = arith.constant 0 : index
    %c0_8 = arith.constant 0 : index
    %9 = vector.load %arg5[%c0_7, %c0_8] : memref<256x128xf32, #tpu.memory_space<vmem>>, vector<256x128xf32>
    %10 = arith.addf %8, %9 : vector<256x128xf32>
    %11 = arith.truncf %10 : vector<256x128xf32> to vector<256x128xbf16>
    %c0_9 = arith.constant 0 : index
    %c0_10 = arith.constant 0 : index
    %12 = vector.load %arg6[%c0_9, %c0_10] : memref<256x128xbf16, #tpu.memory_space<vmem>>, vector<256x128xbf16>
    tpu.vector_store %arg6[%c0_9, %c0_10], %11 {strides = array<i32>} : memref<256x128xbf16, #tpu.memory_space<vmem>>, vector<256x128xbf16>,
    return
  }
  func.func @transform_0(%arg0: i32) -> (i32, i32) {
    %c0_i32 = arith.constant 0 : i32
    %c0_i32_0 = arith.constant 0 : i32
    return %arg0, %c0_i32 : i32, i32
  }
  func.func @transform_1(%arg0: i32) -> (i32, i32) {
    %c0_i32 = arith.constant 0 : i32
    %c0_i32_0 = arith.constant 0 : i32
    %c0_i32_1 = arith.constant 0 : i32
    return %c0_i32, %c0_i32_0 : i32, i32
  }
  func.func @transform_2(%arg0: i32) -> (i32, i32) {
    %c0_i32 = arith.constant 0 : i32
    %c0_i32_0 = arith.constant 0 : i32
    %c0_i32_1 = arith.constant 0 : i32
    return %c0_i32, %c0_i32_0 : i32, i32
  }
  func.func @transform_3(%arg0: i32) -> (i32, i32) {
    %c0_i32 = arith.constant 0 : i32
    %c0_i32_0 = arith.constant 0 : i32
    %c0_i32_1 = arith.constant 0 : i32
    return %c0_i32, %c0_i32_0 : i32, i32
  }
  func.func @transform_4(%arg0: i32) -> (i32, i32) {
    %c0_i32 = arith.constant 0 : i32
    %c0_i32_0 = arith.constant 0 : i32
    %c0_i32_1 = arith.constant 0 : i32
    return %c0_i32, %c0_i32_0 : i32, i32
  }
  func.func @transform_5(%arg0: i32) -> (i32, i32) {
    %c0_i32 = arith.constant 0 : i32
    %c0_i32_0 = arith.constant 0 : i32
    return %arg0, %c0_i32 : i32, i32
  }
}

module attributes {stable_mosaic.version = 11 : i64} {
  func.func @_post_stem_kernel(%arg0: i32, %arg1: memref<256x128xbf16, #tpu.memory_space<vmem>>, %arg2: memref<2x128x128xbf16, #tpu.memory_space<vmem>>, %arg3: memref<2x1x128xf32, #tpu.memory_space<vmem>>, %arg4: memref<2x1x128xf32, #tpu.memory_space<vmem>>, %arg5: memref<2x128x128xbf16, #tpu.memory_space<vmem>>, %arg6: memref<2x1x128xf32, #tpu.memory_space<vmem>>, %arg7: memref<2x1x128xf32, #tpu.memory_space<vmem>>, %arg8: memref<128x1024xbf16, #tpu.memory_space<vmem>>, %arg9: memref<1x1024xf32, #tpu.memory_space<vmem>>, %arg10: memref<1x1024xf32, #tpu.memory_space<vmem>>, %arg11: memref<1024x128xbf16, #tpu.memory_space<vmem>>, %arg12: memref<1x128xf32, #tpu.memory_space<vmem>>, %arg13: memref<2x256x128xbf16, #tpu.memory_space<vmem>>, %arg14: memref<8x128xf32, #tpu.memory_space<vmem>>) attributes {dimension_semantics = [#tpu.dimension_semantics<parallel>], iteration_bounds = array<i64: 2>, scalar_prefetch = 0 : i64, scratch_operands = 0 : i64, tpu.core_type = #tpu.core_type<tc>, window_params = [{transform_indices = @transform_0, window_bounds = array<i64: 256, 128>}, {pipeline_mode = #tpu.pipeline_mode<synchronous>, transform_indices = @transform_1, window_bounds = array<i64: 2, 128, 128>}, {pipeline_mode = #tpu.pipeline_mode<synchronous>, transform_indices = @transform_2, window_bounds = array<i64: 2, 1, 128>}, {pipeline_mode = #tpu.pipeline_mode<synchronous>, transform_indices = @transform_3, window_bounds = array<i64: 2, 1, 128>}, {pipeline_mode = #tpu.pipeline_mode<synchronous>, transform_indices = @transform_4, window_bounds = array<i64: 2, 128, 128>}, {pipeline_mode = #tpu.pipeline_mode<synchronous>, transform_indices = @transform_5, window_bounds = array<i64: 2, 1, 128>}, {pipeline_mode = #tpu.pipeline_mode<synchronous>, transform_indices = @transform_6, window_bounds = array<i64: 2, 1, 128>}, {pipeline_mode = #tpu.pipeline_mode<synchronous>, transform_indices = @transform_7, window_bounds = array<i64: 128, 1024>}, {pipeline_mode = #tpu.pipeline_mode<synchronous>, transform_indices = @transform_8, window_bounds = array<i64: 1, 1024>}, {pipeline_mode = #tpu.pipeline_mode<synchronous>, transform_indices = @transform_9, window_bounds = array<i64: 1, 1024>}, {pipeline_mode = #tpu.pipeline_mode<synchronous>, transform_indices = @transform_10, window_bounds = array<i64: 1024, 128>}, {pipeline_mode = #tpu.pipeline_mode<synchronous>, transform_indices = @transform_11, window_bounds = array<i64: 1, 128>}, {transform_indices = @transform_12, window_bounds = array<i64: 2, 256, 128>}, {transform_indices = @transform_13, window_bounds = array<i64: 8, 128>}]} {
    %c0 = arith.constant 0 : index
    %c0_0 = arith.constant 0 : index
    %0 = vector.load %arg1[%c0, %c0_0] : memref<256x128xbf16, #tpu.memory_space<vmem>>, vector<256x128xbf16>
    %c0_1 = arith.constant 0 : index
    %c0_2 = arith.constant 0 : index
    %c0_3 = arith.constant 0 : index
    %1 = vector.load %arg2[%c0_1, %c0_2, %c0_3] : memref<2x128x128xbf16, #tpu.memory_space<vmem>>, vector<1x128x128xbf16>
    %2 = vector.shape_cast %1 : vector<1x128x128xbf16> to vector<128x128xbf16>
    %cst = arith.constant dense<0.000000e+00> : vector<256x128xf32>
    %3 = tpu.matmul %0, %2, %cst {dimension_numbers = #tpu.dot_dimension_numbers<[1], [0], [0], [1], [0, 0, 1, 1], [], []>} : vector<256x128xbf16>, vector<128x128xbf16>, vector<256x128xf32> -> vector<256x128xf32>
    %c0_4 = arith.constant 0 : index
    %c0_5 = arith.constant 0 : index
    %c0_6 = arith.constant 0 : index
    %4 = vector.load %arg3[%c0_4, %c0_5, %c0_6] : memref<2x1x128xf32, #tpu.memory_space<vmem>>, vector<1x1x128xf32>
    %5 = vector.shape_cast %4 : vector<1x1x128xf32> to vector<1x128xf32>
    %6 = vector.broadcast %5 : vector<1x128xf32> to vector<256x128xf32>
    %7 = arith.mulf %3, %6 : vector<256x128xf32>
    %c0_7 = arith.constant 0 : index
    %c0_8 = arith.constant 0 : index
    %c0_9 = arith.constant 0 : index
    %8 = vector.load %arg4[%c0_7, %c0_8, %c0_9] : memref<2x1x128xf32, #tpu.memory_space<vmem>>, vector<1x1x128xf32>
    %9 = vector.shape_cast %8 : vector<1x1x128xf32> to vector<1x128xf32>
    %10 = vector.broadcast %9 : vector<1x128xf32> to vector<256x128xf32>
    %11 = arith.addf %7, %10 : vector<256x128xf32>
    %cst_10 = arith.constant 0.000000e+00 : f32
    %12 = vector.broadcast %cst_10 : f32 to vector<256x128xf32>
    %13 = arith.maximumf %11, %12 : vector<256x128xf32>
    %14 = arith.truncf %13 : vector<256x128xf32> to vector<256x128xbf16>
    %c0_11 = arith.constant 0 : index
    %c0_12 = arith.constant 0 : index
    %c0_13 = arith.constant 0 : index
    %15 = vector.load %arg5[%c0_11, %c0_12, %c0_13] : memref<2x128x128xbf16, #tpu.memory_space<vmem>>, vector<1x128x128xbf16>
    %16 = vector.shape_cast %15 : vector<1x128x128xbf16> to vector<128x128xbf16>
    %cst_14 = arith.constant dense<0.000000e+00> : vector<256x128xf32>
    %17 = tpu.matmul %14, %16, %cst_14 {dimension_numbers = #tpu.dot_dimension_numbers<[1], [0], [0], [1], [0, 0, 1, 1], [], []>} : vector<256x128xbf16>, vector<128x128xbf16>, vector<256x128xf32> -> vector<256x128xf32>
    %c0_15 = arith.constant 0 : index
    %c0_16 = arith.constant 0 : index
    %c0_17 = arith.constant 0 : index
    %18 = vector.load %arg6[%c0_15, %c0_16, %c0_17] : memref<2x1x128xf32, #tpu.memory_space<vmem>>, vector<1x1x128xf32>
    %19 = vector.shape_cast %18 : vector<1x1x128xf32> to vector<1x128xf32>
    %20 = vector.broadcast %19 : vector<1x128xf32> to vector<256x128xf32>
    %21 = arith.mulf %17, %20 : vector<256x128xf32>
    %c0_18 = arith.constant 0 : index
    %c0_19 = arith.constant 0 : index
    %c0_20 = arith.constant 0 : index
    %22 = vector.load %arg7[%c0_18, %c0_19, %c0_20] : memref<2x1x128xf32, #tpu.memory_space<vmem>>, vector<1x1x128xf32>
    %23 = vector.shape_cast %22 : vector<1x1x128xf32> to vector<1x128xf32>
    %24 = vector.broadcast %23 : vector<1x128xf32> to vector<256x128xf32>
    %25 = arith.addf %21, %24 : vector<256x128xf32>
    %26 = arith.extf %0 : vector<256x128xbf16> to vector<256x128xf32>
    %27 = arith.addf %25, %26 : vector<256x128xf32>
    %28 = arith.truncf %27 : vector<256x128xf32> to vector<256x128xbf16>
    %c0_21 = arith.constant 0 : index
    %c0_22 = arith.constant 0 : index
    %c0_23 = arith.constant 0 : index
    %29 = vector.load %arg13[%c0_21, %c0_22, %c0_23] : memref<2x256x128xbf16, #tpu.memory_space<vmem>>, vector<1x256x128xbf16>
    %30 = vector.shape_cast %29 : vector<1x256x128xbf16> to vector<256x128xbf16>
    %31 = vector.shape_cast %28 : vector<256x128xbf16> to vector<1x256x128xbf16>
    tpu.vector_store %arg13[%c0_21, %c0_22, %c0_23], %31 {strides = array<i32>} : memref<2x256x128xbf16, #tpu.memory_space<vmem>>, vector<1x256x128xbf16>,
    %c1 = arith.constant 1 : index
    %c0_24 = arith.constant 0 : index
    %c0_25 = arith.constant 0 : index
    %32 = vector.load %arg2[%c1, %c0_24, %c0_25] : memref<2x128x128xbf16, #tpu.memory_space<vmem>>, vector<1x128x128xbf16>
    %33 = vector.shape_cast %32 : vector<1x128x128xbf16> to vector<128x128xbf16>
    %cst_26 = arith.constant dense<0.000000e+00> : vector<256x128xf32>
    %34 = tpu.matmul %28, %33, %cst_26 {dimension_numbers = #tpu.dot_dimension_numbers<[1], [0], [0], [1], [0, 0, 1, 1], [], []>} : vector<256x128xbf16>, vector<128x128xbf16>, vector<256x128xf32> -> vector<256x128xf32>
    %c1_27 = arith.constant 1 : index
    %c0_28 = arith.constant 0 : index
    %c0_29 = arith.constant 0 : index
    %35 = vector.load %arg3[%c1_27, %c0_28, %c0_29] : memref<2x1x128xf32, #tpu.memory_space<vmem>>, vector<1x1x128xf32>
    %36 = vector.shape_cast %35 : vector<1x1x128xf32> to vector<1x128xf32>
    %37 = vector.broadcast %36 : vector<1x128xf32> to vector<256x128xf32>
    %38 = arith.mulf %34, %37 : vector<256x128xf32>
    %c1_30 = arith.constant 1 : index
    %c0_31 = arith.constant 0 : index
    %c0_32 = arith.constant 0 : index
    %39 = vector.load %arg4[%c1_30, %c0_31, %c0_32] : memref<2x1x128xf32, #tpu.memory_space<vmem>>, vector<1x1x128xf32>
    %40 = vector.shape_cast %39 : vector<1x1x128xf32> to vector<1x128xf32>
    %41 = vector.broadcast %40 : vector<1x128xf32> to vector<256x128xf32>
    %42 = arith.addf %38, %41 : vector<256x128xf32>
    %cst_33 = arith.constant 0.000000e+00 : f32
    %43 = vector.broadcast %cst_33 : f32 to vector<256x128xf32>
    %44 = arith.maximumf %42, %43 : vector<256x128xf32>
    %45 = arith.truncf %44 : vector<256x128xf32> to vector<256x128xbf16>
    %c1_34 = arith.constant 1 : index
    %c0_35 = arith.constant 0 : index
    %c0_36 = arith.constant 0 : index
    %46 = vector.load %arg5[%c1_34, %c0_35, %c0_36] : memref<2x128x128xbf16, #tpu.memory_space<vmem>>, vector<1x128x128xbf16>
    %47 = vector.shape_cast %46 : vector<1x128x128xbf16> to vector<128x128xbf16>
    %cst_37 = arith.constant dense<0.000000e+00> : vector<256x128xf32>
    %48 = tpu.matmul %45, %47, %cst_37 {dimension_numbers = #tpu.dot_dimension_numbers<[1], [0], [0], [1], [0, 0, 1, 1], [], []>} : vector<256x128xbf16>, vector<128x128xbf16>, vector<256x128xf32> -> vector<256x128xf32>
    %c1_38 = arith.constant 1 : index
    %c0_39 = arith.constant 0 : index
    %c0_40 = arith.constant 0 : index
    %49 = vector.load %arg6[%c1_38, %c0_39, %c0_40] : memref<2x1x128xf32, #tpu.memory_space<vmem>>, vector<1x1x128xf32>
    %50 = vector.shape_cast %49 : vector<1x1x128xf32> to vector<1x128xf32>
    %51 = vector.broadcast %50 : vector<1x128xf32> to vector<256x128xf32>
    %52 = arith.mulf %48, %51 : vector<256x128xf32>
    %c1_41 = arith.constant 1 : index
    %c0_42 = arith.constant 0 : index
    %c0_43 = arith.constant 0 : index
    %53 = vector.load %arg7[%c1_41, %c0_42, %c0_43] : memref<2x1x128xf32, #tpu.memory_space<vmem>>, vector<1x1x128xf32>
    %54 = vector.shape_cast %53 : vector<1x1x128xf32> to vector<1x128xf32>
    %55 = vector.broadcast %54 : vector<1x128xf32> to vector<256x128xf32>
    %56 = arith.addf %52, %55 : vector<256x128xf32>
    %57 = arith.extf %28 : vector<256x128xbf16> to vector<256x128xf32>
    %58 = arith.addf %56, %57 : vector<256x128xf32>
    %59 = arith.truncf %58 : vector<256x128xf32> to vector<256x128xbf16>
    %c1_44 = arith.constant 1 : index
    %c0_45 = arith.constant 0 : index
    %c0_46 = arith.constant 0 : index
    %60 = vector.load %arg13[%c1_44, %c0_45, %c0_46] : memref<2x256x128xbf16, #tpu.memory_space<vmem>>, vector<1x256x128xbf16>
    %61 = vector.shape_cast %60 : vector<1x256x128xbf16> to vector<256x128xbf16>
    %62 = vector.shape_cast %59 : vector<256x128xbf16> to vector<1x256x128xbf16>
    tpu.vector_store %arg13[%c1_44, %c0_45, %c0_46], %62 {strides = array<i32>} : memref<2x256x128xbf16, #tpu.memory_space<vmem>>, vector<1x256x128xbf16>,
    %63 = arith.extf %59 : vector<256x128xbf16> to vector<256x128xf32>
    %64 = tpu.iota {dimensions = array<i32: 0>} : vector<256x128xi32>
    %c196_i32 = arith.constant 196 : i32
    %65 = vector.broadcast %c196_i32 : i32 to vector<256x128xi32>
    %66 = arith.cmpi slt, %64, %65 : vector<256x128xi32>
    %cst_47 = arith.constant 0.000000e+00 : f32
    %67 = vector.broadcast %cst_47 : f32 to vector<256x128xf32>
    %68 = arith.select %66, %63, %67 : vector<256x128xi1>, vector<256x128xf32>
    %cst_48 = arith.constant dense<0.000000e+00> : vector<128xf32>
    %69 = vector.multi_reduction <add>, %68, %cst_48 [0] : vector<256x128xf32> to vector<128xf32>
    %70 = vector.shape_cast %69 : vector<128xf32> to vector<1x128xf32>
    %cst_49 = arith.constant 0.00510204071 : f32
    %71 = vector.broadcast %cst_49 : f32 to vector<1x128xf32>
    %72 = arith.mulf %70, %71 : vector<1x128xf32>
    %73 = arith.truncf %72 : vector<1x128xf32> to vector<1x128xbf16>
    %c0_50 = arith.constant 0 : index
    %c0_51 = arith.constant 0 : index
    %74 = vector.load %arg8[%c0_50, %c0_51] : memref<128x1024xbf16, #tpu.memory_space<vmem>>, vector<128x1024xbf16>
    %cst_52 = arith.constant dense<0.000000e+00> : vector<1x1024xf32>
    %75 = tpu.matmul %73, %74, %cst_52 {dimension_numbers = #tpu.dot_dimension_numbers<[1], [0], [0], [1], [0, 0, 1, 1], [], []>} : vector<1x128xbf16>, vector<128x1024xbf16>, vector<1x1024xf32> -> vector<1x1024xf32>
    %c0_53 = arith.constant 0 : index
    %c0_54 = arith.constant 0 : index
    %76 = vector.load %arg9[%c0_53, %c0_54] : memref<1x1024xf32, #tpu.memory_space<vmem>>, vector<1x1024xf32>
    %77 = arith.mulf %75, %76 : vector<1x1024xf32>
    %c0_55 = arith.constant 0 : index
    %c0_56 = arith.constant 0 : index
    %78 = vector.load %arg10[%c0_55, %c0_56] : memref<1x1024xf32, #tpu.memory_space<vmem>>, vector<1x1024xf32>
    %79 = arith.addf %77, %78 : vector<1x1024xf32>
    %cst_57 = arith.constant 0.000000e+00 : f32
    %80 = vector.broadcast %cst_57 : f32 to vector<1x1024xf32>
    %81 = arith.maximumf %79, %80 : vector<1x1024xf32>
    %82 = arith.truncf %81 : vector<1x1024xf32> to vector<1x1024xbf16>
    %c0_58 = arith.constant 0 : index
    %c0_59 = arith.constant 0 : index
    %83 = vector.load %arg11[%c0_58, %c0_59] : memref<1024x128xbf16, #tpu.memory_space<vmem>>, vector<1024x128xbf16>
    %cst_60 = arith.constant dense<0.000000e+00> : vector<1x128xf32>
    %84 = tpu.matmul %82, %83, %cst_60 {dimension_numbers = #tpu.dot_dimension_numbers<[1], [0], [0], [1], [0, 0, 1, 1], [], []>} : vector<1x1024xbf16>, vector<1024x128xbf16>, vector<1x128xf32> -> vector<1x128xf32>
    %c0_61 = arith.constant 0 : index
    %c0_62 = arith.constant 0 : index
    %85 = vector.load %arg12[%c0_61, %c0_62] : memref<1x128xf32, #tpu.memory_space<vmem>>, vector<1x128xf32>
    %86 = arith.addf %84, %85 : vector<1x128xf32>
    %87 = vector.shape_cast %86 : vector<1x128xf32> to vector<1x128xf32>
    %88 = vector.broadcast %87 : vector<1x128xf32> to vector<8x128xf32>
    %c0_63 = arith.constant 0 : index
    %c0_64 = arith.constant 0 : index
    %89 = vector.load %arg14[%c0_63, %c0_64] : memref<8x128xf32, #tpu.memory_space<vmem>>, vector<8x128xf32>
    tpu.vector_store %arg14[%c0_63, %c0_64], %88 {strides = array<i32>} : memref<8x128xf32, #tpu.memory_space<vmem>>, vector<8x128xf32>,
    return
  }
  func.func @transform_0(%arg0: i32) -> (i32, i32) {
    %c0_i32 = arith.constant 0 : i32
    %c0_i32_0 = arith.constant 0 : i32
    return %arg0, %c0_i32 : i32, i32
  }
  func.func @transform_1(%arg0: i32) -> (i32, i32, i32) {
    %c0_i32 = arith.constant 0 : i32
    %c0_i32_0 = arith.constant 0 : i32
    %c0_i32_1 = arith.constant 0 : i32
    %c0_i32_2 = arith.constant 0 : i32
    return %c0_i32, %c0_i32_0, %c0_i32_1 : i32, i32, i32
  }
  func.func @transform_2(%arg0: i32) -> (i32, i32, i32) {
    %c0_i32 = arith.constant 0 : i32
    %c0_i32_0 = arith.constant 0 : i32
    %c0_i32_1 = arith.constant 0 : i32
    %c0_i32_2 = arith.constant 0 : i32
    return %c0_i32, %c0_i32_0, %c0_i32_1 : i32, i32, i32
  }
  func.func @transform_3(%arg0: i32) -> (i32, i32, i32) {
    %c0_i32 = arith.constant 0 : i32
    %c0_i32_0 = arith.constant 0 : i32
    %c0_i32_1 = arith.constant 0 : i32
    %c0_i32_2 = arith.constant 0 : i32
    return %c0_i32, %c0_i32_0, %c0_i32_1 : i32, i32, i32
  }
  func.func @transform_4(%arg0: i32) -> (i32, i32, i32) {
    %c0_i32 = arith.constant 0 : i32
    %c0_i32_0 = arith.constant 0 : i32
    %c0_i32_1 = arith.constant 0 : i32
    %c0_i32_2 = arith.constant 0 : i32
    return %c0_i32, %c0_i32_0, %c0_i32_1 : i32, i32, i32
  }
  func.func @transform_5(%arg0: i32) -> (i32, i32, i32) {
    %c0_i32 = arith.constant 0 : i32
    %c0_i32_0 = arith.constant 0 : i32
    %c0_i32_1 = arith.constant 0 : i32
    %c0_i32_2 = arith.constant 0 : i32
    return %c0_i32, %c0_i32_0, %c0_i32_1 : i32, i32, i32
  }
  func.func @transform_6(%arg0: i32) -> (i32, i32, i32) {
    %c0_i32 = arith.constant 0 : i32
    %c0_i32_0 = arith.constant 0 : i32
    %c0_i32_1 = arith.constant 0 : i32
    %c0_i32_2 = arith.constant 0 : i32
    return %c0_i32, %c0_i32_0, %c0_i32_1 : i32, i32, i32
  }
  func.func @transform_7(%arg0: i32) -> (i32, i32) {
    %c0_i32 = arith.constant 0 : i32
    %c0_i32_0 = arith.constant 0 : i32
    %c0_i32_1 = arith.constant 0 : i32
    return %c0_i32, %c0_i32_0 : i32, i32
  }
  func.func @transform_8(%arg0: i32) -> (i32, i32) {
    %c0_i32 = arith.constant 0 : i32
    %c0_i32_0 = arith.constant 0 : i32
    %c0_i32_1 = arith.constant 0 : i32
    return %c0_i32, %c0_i32_0 : i32, i32
  }
  func.func @transform_9(%arg0: i32) -> (i32, i32) {
    %c0_i32 = arith.constant 0 : i32
    %c0_i32_0 = arith.constant 0 : i32
    %c0_i32_1 = arith.constant 0 : i32
    return %c0_i32, %c0_i32_0 : i32, i32
  }
  func.func @transform_10(%arg0: i32) -> (i32, i32) {
    %c0_i32 = arith.constant 0 : i32
    %c0_i32_0 = arith.constant 0 : i32
    %c0_i32_1 = arith.constant 0 : i32
    return %c0_i32, %c0_i32_0 : i32, i32
  }
  func.func @transform_11(%arg0: i32) -> (i32, i32) {
    %c0_i32 = arith.constant 0 : i32
    %c0_i32_0 = arith.constant 0 : i32
    %c0_i32_1 = arith.constant 0 : i32
    return %c0_i32, %c0_i32_0 : i32, i32
  }
  func.func @transform_12(%arg0: i32) -> (i32, i32, i32) {
    %c0_i32 = arith.constant 0 : i32
    %c0_i32_0 = arith.constant 0 : i32
    %c0_i32_1 = arith.constant 0 : i32
    return %c0_i32, %arg0, %c0_i32_0 : i32, i32, i32
  }
  func.func @transform_13(%arg0: i32) -> (i32, i32) {
    %c0_i32 = arith.constant 0 : i32
    %c0_i32_0 = arith.constant 0 : i32
    return %arg0, %c0_i32 : i32, i32
  }
}

</mosaic_0001>

<bundles_post_ra>
// kernel: deep_gcn_forward.6
= control target key start
LH: loop header
LB: loop body
LE: loop exit
PB: predicated region body
PF: predicated region fallthrough
CT: control target
= control target key end

     0   :  { %s1553_s15 = smov 0   ;;  %s1824_s0 = inlined_call_operand.vmem [shape: bf16[2048,27], index: 0, kind: input, shape index: {}]   ;;  %s1825_s1 = inlined_call_operand.vmem [shape: bf16[27,128], index: 1, kind: input, shape index: {}]   ;;  %s1826_s2 = inlined_call_operand.vmem [shape: f32[1,128], index: 2, kind: input, shape index: {}]   ;;  %s1827_s3 = inlined_call_operand.vmem [shape: f32[1,128], index: 3, kind: input, shape index: {}]   ;;  %s1828_s4 = inlined_call_operand.vmem [shape: bf16[2048,128], index: 4, kind: output, shape index: {}]  }
   0x1 LB: > { %s1098_s16 = sadd.s32 4294967295, %s1525_s15   ;;  %p1102_p0 = scmp.ge.s32.totalorder %s1525_s15, 1  ;;  %s1525_s15 = sphi %s1553_s15, %s14_s15  }
   0x2   : > { %p163_p1 = scmp.lt.s32.totalorder %s1525_s15, 5 }
   0x4   : > { %p164_p2 = pnand %p1102_p0, %p163_p1 }
   0x5   : > { %s1103_s21 = sshll.u32 (!%p164_p2), %s1098_s16, 6 }
   0x6   : > { %167 = sbr.rel (%p164_p2) target bundleno = 287 (0x11f), region = 36  ;;  %p190_p3 = scmp.lt.s32.totalorder (!%p164_p2), %s1103_s21, 255 }
   0xb   : > { %v1241_v0 = vld [vmem:[%s1825_s1 + $0x8] sm:$0xf]  ;;  %v1310_v1 = vld [vmem:[%s1825_s1 + $0x8] sm:$0x30]  ;;  %vm538_vm0 = vcmask 1044480   ;;  %vm539_vm1 = vcmask 1045504  }
   0xc   : > { %v1242_v2 = vor.u32 %v1310_v1, %v1241_v0  ;;  %v1527_v3 = vmov 65535   ;;  %s1830_s21 = smov (!%p190_p3, %s1103_s21), 255  ;;  %v1309_v7 = vld [vmem:[%s1825_s1] sm:$0xff]  ;;  %vm441_vm2 = vcmask 220160  }
   0xd   : > { %v540_v4 = vsel %vm538_vm0, 4294967295, %v1527_v3  ;;  %s1104_s24 = sshll.u32 %s1830_s21, 2  ;;  %v1647_v42 = vld [vmem:[%s1826_s2] ss:$0 sm:$0xff] }
   0xe   : > { %v541_v5 = vsel %vm539_vm1, %v540_v4, 0  ;;  %s1578_s27 = scalar_lea.vmem %s1824_s0, %s1104_s24  ;;  %v1653_v44 = vld [vmem:[%s1827_s3] ss:$0 sm:$0xff]  ;;  %s1669_s8 = scalar_lea.vmem %s1828_s4, %s1104_s24 }
   0xf   : > { %v543_v6 = vand.u32 %v1242_v2, %v541_v5  ;;  %v1277_v8 = vld [vmem:[%s1578_s27] sm:$0xff]  ;;  %v1278_v12 = vld [vmem:[%s1578_s27 + $0x8] sm:$0xff]  ;;  %v1279_v16 = vld [vmem:[%s1578_s27 + $0x10] sm:$0xff] }
  0x10   : > { %v1285_v9 = vld [vmem:[%s1578_s27 + $0x40] sm:$0xff]  ;;  %v1286_v13 = vld [vmem:[%s1578_s27 + $0x48] sm:$0xff]  ;;  %v1287_v17 = vld [vmem:[%s1578_s27 + $0x50] sm:$0xff] }
  0x11   : > { %551 = vmatpush.bf16.msra.mxu0 %v543_v6  ;;  %1502 = vmatpush.bf16.msra.mxu1 %v543_v6  ;;  %v1293_v10 = vld [vmem:[%s1578_s27 + $0x80] sm:$0xff]  ;;  %v1294_v14 = vld [vmem:[%s1578_s27 + $0x88] sm:$0xff]  ;;  %v1295_v18 = vld [vmem:[%s1578_s27 + $0x90] sm:$0xff] }
  0x12   : > { %1503 = vmatpush.bf16.msra.mxu2 %v543_v6  ;;  %1504 = vmatpush.bf16.msra.mxu3 %v543_v6  ;;  %v1301_v11 = vld [vmem:[%s1578_s27 + $0xc0] sm:$0xff]  ;;  %v1302_v15 = vld [vmem:[%s1578_s27 + $0xc8] sm:$0xff]  ;;  %v1303_v19 = vld [vmem:[%s1578_s27 + $0xd0] sm:$0xff] }
  0x13   : > { %v1280_v20 = vld [vmem:[%s1578_s27 + $0x18] sm:$0xff]  ;;  %v1281_v24 = vld [vmem:[%s1578_s27 + $0x20] sm:$0xff]  ;;  %v1282_v28 = vld [vmem:[%s1578_s27 + $0x28] sm:$0xff] }
  0x14   : > { %v1288_v21 = vld [vmem:[%s1578_s27 + $0x58] sm:$0xff]  ;;  %v1289_v25 = vld [vmem:[%s1578_s27 + $0x60] sm:$0xff]  ;;  %v1290_v29 = vld [vmem:[%s1578_s27 + $0x68] sm:$0xff] }
  0x15   : > { %552 = vmatpush.bf16.msra.mxu0 %v1309_v7  ;;  %1505 = vmatpush.bf16.msra.mxu1 %v1309_v7  ;;  %v1296_v22 = vld [vmem:[%s1578_s27 + $0x98] sm:$0xff]  ;;  %v1297_v26 = vld [vmem:[%s1578_s27 + $0xa0] sm:$0xff]  ;;  %v1298_v30 = vld [vmem:[%s1578_s27 + $0xa8] sm:$0xff] }
  0x16   : > { %1506 = vmatpush.bf16.msra.mxu2 %v1309_v7  ;;  %1507 = vmatpush.bf16.msra.mxu3 %v1309_v7  ;;  %v1304_v23 = vld [vmem:[%s1578_s27 + $0xd8] sm:$0xff]  ;;  %v1305_v27 = vld [vmem:[%s1578_s27 + $0xe0] sm:$0xff]  ;;  %v1306_v31 = vld [vmem:[%s1578_s27 + $0xe8] sm:$0xff] }
  0x17   : > { %v1283_v32 = vld [vmem:[%s1578_s27 + $0x30] sm:$0xff]  ;;  %v1284_v36 = vld [vmem:[%s1578_s27 + $0x38] sm:$0xff] }
  0x18   : > { %1243 = vmatmul.msk.bf16.vlgmr.msra.gmra.mxu0 %vm441_vm2, %v1277_v8  ;;  %1251 = vmatmul.msk.bf16.vlgmr.msra.gmra.mxu1 %vm441_vm2, %v1285_v9  ;;  %v1291_v33 = vld [vmem:[%s1578_s27 + $0x70] sm:$0xff]  ;;  %v1292_v37 = vld [vmem:[%s1578_s27 + $0x78] sm:$0xff] }
  0x19   : > { %1259 = vmatmul.msk.bf16.vlgmr.msra.gmra.mxu2 %vm441_vm2, %v1293_v10  ;;  %1267 = vmatmul.msk.bf16.vlgmr.msra.gmra.mxu3 %vm441_vm2, %v1301_v11  ;;  %v1299_v34 = vld [vmem:[%s1578_s27 + $0xb0] sm:$0xff]  ;;  %v1300_v38 = vld [vmem:[%s1578_s27 + $0xb8] sm:$0xff] }
  0x1a   : > { %v1307_v35 = vld [vmem:[%s1578_s27 + $0xf0] sm:$0xff]  ;;  %v1308_v39 = vld [vmem:[%s1578_s27 + $0xf8] sm:$0xff] }
  0x28   : > { %1244 = vmatmul.msk.bf16.gmra.mxu0 %vm441_vm2, %v1278_v12  ;;  %1252 = vmatmul.msk.bf16.gmra.mxu1 %vm441_vm2, %v1286_v13 }
  0x29   : > { %1260 = vmatmul.msk.bf16.gmra.mxu2 %vm441_vm2, %v1294_v14  ;;  %1268 = vmatmul.msk.bf16.gmra.mxu3 %vm441_vm2, %v1302_v15 }
  0x38   : > { %1245 = vmatmul.msk.bf16.gmra.mxu0 %vm441_vm2, %v1279_v16  ;;  %1253 = vmatmul.msk.bf16.gmra.mxu1 %vm441_vm2, %v1287_v17 }
  0x39   : > { %1261 = vmatmul.msk.bf16.gmra.mxu2 %vm441_vm2, %v1295_v18  ;;  %1269 = vmatmul.msk.bf16.gmra.mxu3 %vm441_vm2, %v1303_v19 }
  0x48   : > { %1246 = vmatmul.msk.bf16.gmra.mxu0 %vm441_vm2, %v1280_v20  ;;  %1254 = vmatmul.msk.bf16.gmra.mxu1 %vm441_vm2, %v1288_v21 }
  0x49   : > { %1262 = vmatmul.msk.bf16.gmra.mxu2 %vm441_vm2, %v1296_v22  ;;  %1270 = vmatmul.msk.bf16.gmra.mxu3 %vm441_vm2, %v1304_v23 }
  0x58   : > { %1247 = vmatmul.msk.bf16.gmra.mxu0 %vm441_vm2, %v1281_v24  ;;  %1255 = vmatmul.msk.bf16.gmra.mxu1 %vm441_vm2, %v1289_v25 }
  0x59   : > { %1263 = vmatmul.msk.bf16.gmra.mxu2 %vm441_vm2, %v1297_v26  ;;  %1271 = vmatmul.msk.bf16.gmra.mxu3 %vm441_vm2, %v1305_v27 }
  0x68   : > { %1248 = vmatmul.msk.bf16.gmra.mxu0 %vm441_vm2, %v1282_v28  ;;  %1256 = vmatmul.msk.bf16.gmra.mxu1 %vm441_vm2, %v1290_v29 }
  0x69   : > { %1264 = vmatmul.msk.bf16.gmra.mxu2 %vm441_vm2, %v1298_v30  ;;  %1272 = vmatmul.msk.bf16.gmra.mxu3 %vm441_vm2, %v1306_v31 }
  0x78   : > { %1249 = vmatmul.msk.bf16.gmra.mxu0 %vm441_vm2, %v1283_v32  ;;  %1257 = vmatmul.msk.bf16.gmra.mxu1 %vm441_vm2, %v1291_v33 }
  0x79   : > { %1265 = vmatmul.msk.bf16.gmra.mxu2 %vm441_vm2, %v1299_v34  ;;  %1273 = vmatmul.msk.bf16.gmra.mxu3 %vm441_vm2, %v1307_v35 }
  0x88   : > { %1250 = vmatmul.msk.bf16.gmra.mxu0 %vm441_vm2, %v1284_v36  ;;  %1258 = vmatmul.msk.bf16.gmra.mxu1 %vm441_vm2, %v1292_v37 }
  0x89   : > { %1266 = vmatmul.msk.bf16.gmra.mxu2 %vm441_vm2, %v1300_v38  ;;  %1274 = vmatmul.msk.bf16.gmra.mxu3 %vm441_vm2, %v1308_v39 }
  0x95   : > { %v554_v40 = vpop.f32.mrf.mxu0  ;;  %v594_v41 = vpop.f32.mrf.mxu1 }
  0x96   : > { %v718_v43 = vmul.f32 %v1647_v42, %v554_v40  ;;  %v734_v45 = vmul.f32 %v1647_v42, %v594_v41 }
  0x98   : > { %v786_v50 = vadd.f32 %v1653_v44, %v718_v43  ;;  %v802_v51 = vadd.f32 %v1653_v44, %v734_v45 }
  0x9a   : > { %v850_v58 = vmax.f32 %v786_v50, 0.0  ;;  %v866_v59 = vmax.f32 %v802_v51, 0.0 }
  0x9c   : > { %v634_v46 = vpop.f32.mrf.mxu2  ;;  %v674_v47 = vpop.f32.mrf.mxu3 }
  0x9d   : > { %v556_v48 = vpop.f32.mrf.mxu0  ;;  %v596_v49 = vpop.f32.mrf.mxu1  ;;  %v750_v56 = vmul.f32 %v1647_v42, %v634_v46  ;;  %v766_v57 = vmul.f32 %v1647_v42, %v674_v47 }
  0x9e   : > { %v719_v52 = vmul.f32 %v1647_v42, %v556_v48  ;;  %v735_v53 = vmul.f32 %v1647_v42, %v596_v49 }
  0x9f   : > { %v818_v2 = vadd.f32 %v1653_v44, %v750_v56  ;;  %v834_v3 = vadd.f32 %v1653_v44, %v766_v57 }
  0xa0   : > { %v787_v54 = vadd.f32 %v1653_v44, %v719_v52  ;;  %v803_v55 = vadd.f32 %v1653_v44, %v735_v53 }
  0xa1   : > { %v882_v10 = vmax.f32 %v818_v2, 0.0  ;;  %v898_v11 = vmax.f32 %v834_v3, 0.0 }
  0xa2   : > { %v851_v60 = vmax.f32 %v787_v54, 0.0  ;;  %v867_v61 = vmax.f32 %v803_v55, 0.0 }
  0xa4   : > { %v1314_v62 = vpack.c.bf16 %v851_v60, %v850_v58  ;;  %v1354_v63 = vpack.c.bf16 %v867_v61, %v866_v59  ;;  %v636_v0 = vpop.f32.mrf.mxu2  ;;  %v676_v1 = vpop.f32.mrf.mxu3 }
  0xa5   : > { %v751_v4 = vmul.f32 %v1647_v42, %v636_v0  ;;  %v767_v5 = vmul.f32 %v1647_v42, %v676_v1  ;;  %v559_v6 = vpop.f32.mrf.mxu0  ;;  %v599_v7 = vpop.f32.mrf.mxu1 }
  0xa6   : > { %1315 = vst [vmem:[%s1669_s8] sm:$0xff] %v1314_v62   ;;  %v720_v14 = vmul.f32 %v1647_v42, %v559_v6  ;;  %v736_v15 = vmul.f32 %v1647_v42, %v599_v7 }
  0xa7   : > { %1478 = vst [vmem:[%s1669_s8 + $0x40] sm:$0xff] %v1354_v63   ;;  %v819_v8 = vadd.f32 %v1653_v44, %v751_v4  ;;  %v835_v9 = vadd.f32 %v1653_v44, %v767_v5 }
  0xa8   : > { %v788_v22 = vadd.f32 %v1653_v44, %v720_v14  ;;  %v804_v23 = vadd.f32 %v1653_v44, %v736_v15 }
  0xa9   : > { %v883_v12 = vmax.f32 %v819_v8, 0.0  ;;  %v899_v13 = vmax.f32 %v835_v9, 0.0 }
  0xaa   : > { %v852_v30 = vmax.f32 %v788_v22, 0.0  ;;  %v868_v31 = vmax.f32 %v804_v23, 0.0 }
  0xab   : > { %v1394_v16 = vpack.c.bf16 %v883_v12, %v882_v10  ;;  %v1434_v17 = vpack.c.bf16 %v899_v13, %v898_v11 }
  0xac   : > { %v639_v18 = vpop.f32.mrf.mxu2  ;;  %v679_v19 = vpop.f32.mrf.mxu3 }
  0xad   : > { %1486 = vst [vmem:[%s1669_s8 + $0x80] sm:$0xff] %v1394_v16   ;;  %v561_v20 = vpop.f32.mrf.mxu0  ;;  %v601_v21 = vpop.f32.mrf.mxu1  ;;  %v752_v28 = vmul.f32 %v1647_v42, %v639_v18  ;;  %v768_v29 = vmul.f32 %v1647_v42, %v679_v19 }
  0xae   : > { %1494 = vst [vmem:[%s1669_s8 + $0xc0] sm:$0xff] %v1434_v17   ;;  %v721_v24 = vmul.f32 %v1647_v42, %v561_v20  ;;  %v737_v25 = vmul.f32 %v1647_v42, %v601_v21 }
  0xaf   : > { %v820_v38 = vadd.f32 %v1653_v44, %v752_v28  ;;  %v836_v39 = vadd.f32 %v1653_v44, %v768_v29 }
  0xb0   : > { %v789_v26 = vadd.f32 %v1653_v44, %v721_v24  ;;  %v805_v27 = vadd.f32 %v1653_v44, %v737_v25 }
  0xb1   : > { %v884_v48 = vmax.f32 %v820_v38, 0.0  ;;  %v900_v49 = vmax.f32 %v836_v39, 0.0 }
  0xb2   : > { %v853_v32 = vmax.f32 %v789_v26, 0.0  ;;  %v869_v33 = vmax.f32 %v805_v27, 0.0 }
  0xb4   : > { %v1319_v34 = vpack.c.bf16 %v853_v32, %v852_v30  ;;  %v1359_v35 = vpack.c.bf16 %v869_v33, %v868_v31  ;;  %v641_v36 = vpop.f32.mrf.mxu2  ;;  %v681_v37 = vpop.f32.mrf.mxu3 }
  0xb5   : > { %v753_v40 = vmul.f32 %v1647_v42, %v641_v36  ;;  %v769_v41 = vmul.f32 %v1647_v42, %v681_v37  ;;  %v564_v43 = vpop.f32.mrf.mxu0  ;;  %v604_v45 = vpop.f32.mrf.mxu1 }
  0xb6   : > { %1471 = vst [vmem:[%s1669_s8 + $0x8] sm:$0xff] %v1319_v34   ;;  %v722_v52 = vmul.f32 %v1647_v42, %v564_v43  ;;  %v738_v53 = vmul.f32 %v1647_v42, %v604_v45 }
  0xb7   : > { %1479 = vst [vmem:[%s1669_s8 + $0x48] sm:$0xff] %v1359_v35   ;;  %v821_v46 = vadd.f32 %v1653_v44, %v753_v40  ;;  %v837_v47 = vadd.f32 %v1653_v44, %v769_v41 }
  0xb8   : > { %v790_v60 = vadd.f32 %v1653_v44, %v722_v52  ;;  %v806_v61 = vadd.f32 %v1653_v44, %v738_v53 }
  0xb9   : > { %v885_v50 = vmax.f32 %v821_v46, 0.0  ;;  %v901_v51 = vmax.f32 %v837_v47, 0.0 }
  0xba   : > { %v854_v4 = vmax.f32 %v790_v60, 0.0  ;;  %v870_v5 = vmax.f32 %v806_v61, 0.0 }
  0xbb   : > { %v1399_v54 = vpack.c.bf16 %v885_v50, %v884_v48  ;;  %v1439_v55 = vpack.c.bf16 %v901_v51, %v900_v49 }
  0xbc   : > { %v644_v56 = vpop.f32.mrf.mxu2  ;;  %v684_v57 = vpop.f32.mrf.mxu3 }
  0xbd   : > { %1487 = vst [vmem:[%s1669_s8 + $0x88] sm:$0xff] %v1399_v54   ;;  %v566_v58 = vpop.f32.mrf.mxu0  ;;  %v606_v59 = vpop.f32.mrf.mxu1  ;;  %v754_v2 = vmul.f32 %v1647_v42, %v644_v56  ;;  %v770_v3 = vmul.f32 %v1647_v42, %v684_v57 }
  0xbe   : > { %1495 = vst [vmem:[%s1669_s8 + $0xc8] sm:$0xff] %v1439_v55   ;;  %v723_v62 = vmul.f32 %v1647_v42, %v566_v58  ;;  %v739_v63 = vmul.f32 %v1647_v42, %v606_v59 }
  0xbf   : > { %v822_v12 = vadd.f32 %v1653_v44, %v754_v2  ;;  %v838_v13 = vadd.f32 %v1653_v44, %v770_v3 }
  0xc0   : > { %v791_v0 = vadd.f32 %v1653_v44, %v723_v62  ;;  %v807_v1 = vadd.f32 %v1653_v44, %v739_v63 }
  0xc1   : > { %v886_v20 = vmax.f32 %v822_v12, 0.0  ;;  %v902_v21 = vmax.f32 %v838_v13, 0.0 }
  0xc2   : > { %v855_v6 = vmax.f32 %v791_v0, 0.0  ;;  %v871_v7 = vmax.f32 %v807_v1, 0.0 }
  0xc4   : > { %v1324_v8 = vpack.c.bf16 %v855_v6, %v854_v4  ;;  %v1364_v9 = vpack.c.bf16 %v871_v7, %v870_v5  ;;  %v646_v10 = vpop.f32.mrf.mxu2  ;;  %v686_v11 = vpop.f32.mrf.mxu3 }
  0xc5   : > { %v755_v14 = vmul.f32 %v1647_v42, %v646_v10  ;;  %v771_v15 = vmul.f32 %v1647_v42, %v686_v11  ;;  %v569_v16 = vpop.f32.mrf.mxu0  ;;  %v609_v17 = vpop.f32.mrf.mxu1 }
  0xc6   : > { %1472 = vst [vmem:[%s1669_s8 + $0x10] sm:$0xff] %v1324_v8   ;;  %v724_v24 = vmul.f32 %v1647_v42, %v569_v16  ;;  %v740_v25 = vmul.f32 %v1647_v42, %v609_v17 }
  0xc7   : > { %1480 = vst [vmem:[%s1669_s8 + $0x50] sm:$0xff] %v1364_v9   ;;  %v823_v18 = vadd.f32 %v1653_v44, %v755_v14  ;;  %v839_v19 = vadd.f32 %v1653_v44, %v771_v15 }
  0xc8   : > { %v792_v32 = vadd.f32 %v1653_v44, %v724_v24  ;;  %v808_v33 = vadd.f32 %v1653_v44, %v740_v25 }
  0xc9   : > { %v887_v22 = vmax.f32 %v823_v18, 0.0  ;;  %v903_v23 = vmax.f32 %v839_v19, 0.0 }
  0xca   : > { %v856_v40 = vmax.f32 %v792_v32, 0.0  ;;  %v872_v41 = vmax.f32 %v808_v33, 0.0 }
  0xcb   : > { %v1404_v26 = vpack.c.bf16 %v887_v22, %v886_v20  ;;  %v1444_v27 = vpack.c.bf16 %v903_v23, %v902_v21 }
  0xcc   : > { %v649_v28 = vpop.f32.mrf.mxu2  ;;  %v689_v29 = vpop.f32.mrf.mxu3 }
  0xcd   : > { %1488 = vst [vmem:[%s1669_s8 + $0x90] sm:$0xff] %v1404_v26   ;;  %v571_v30 = vpop.f32.mrf.mxu0  ;;  %v611_v31 = vpop.f32.mrf.mxu1  ;;  %v756_v38 = vmul.f32 %v1647_v42, %v649_v28  ;;  %v772_v39 = vmul.f32 %v1647_v42, %v689_v29 }
  0xce   : > { %1496 = vst [vmem:[%s1669_s8 + $0xd0] sm:$0xff] %v1444_v27   ;;  %v725_v34 = vmul.f32 %v1647_v42, %v571_v30  ;;  %v741_v35 = vmul.f32 %v1647_v42, %v611_v31 }
  0xcf   : > { %v824_v50 = vadd.f32 %v1653_v44, %v756_v38  ;;  %v840_v51 = vadd.f32 %v1653_v44, %v772_v39 }
  0xd0   : > { %v793_v36 = vadd.f32 %v1653_v44, %v725_v34  ;;  %v809_v37 = vadd.f32 %v1653_v44, %v741_v35 }
  0xd1   : > { %v888_v58 = vmax.f32 %v824_v50, 0.0  ;;  %v904_v59 = vmax.f32 %v840_v51, 0.0 }
  0xd2   : > { %v857_v43 = vmax.f32 %v793_v36, 0.0  ;;  %v873_v45 = vmax.f32 %v809_v37, 0.0 }
  0xd4   : > { %v1329_v46 = vpack.c.bf16 %v857_v43, %v856_v40  ;;  %v1369_v47 = vpack.c.bf16 %v873_v45, %v872_v41  ;;  %v651_v48 = vpop.f32.mrf.mxu2  ;;  %v691_v49 = vpop.f32.mrf.mxu3 }
  0xd5   : > { %v757_v52 = vmul.f32 %v1647_v42, %v651_v48  ;;  %v773_v53 = vmul.f32 %v1647_v42, %v691_v49  ;;  %v574_v54 = vpop.f32.mrf.mxu0  ;;  %v614_v55 = vpop.f32.mrf.mxu1 }
  0xd6   : > { %1473 = vst [vmem:[%s1669_s8 + $0x18] sm:$0xff] %v1329_v46   ;;  %v726_v62 = vmul.f32 %v1647_v42, %v574_v54  ;;  %v742_v63 = vmul.f32 %v1647_v42, %v614_v55 }
  0xd7   : > { %1481 = vst [vmem:[%s1669_s8 + $0x58] sm:$0xff] %v1369_v47   ;;  %v825_v56 = vadd.f32 %v1653_v44, %v757_v52  ;;  %v841_v57 = vadd.f32 %v1653_v44, %v773_v53 }
  0xd8   : > { %v794_v6 = vadd.f32 %v1653_v44, %v726_v62  ;;  %v810_v7 = vadd.f32 %v1653_v44, %v742_v63 }
  0xd9   : > { %v889_v60 = vmax.f32 %v825_v56, 0.0  ;;  %v905_v61 = vmax.f32 %v841_v57, 0.0 }
  0xda   : > { %v858_v14 = vmax.f32 %v794_v6, 0.0  ;;  %v874_v15 = vmax.f32 %v810_v7, 0.0 }
  0xdb   : > { %v1409_v0 = vpack.c.bf16 %v889_v60, %v888_v58  ;;  %v1449_v1 = vpack.c.bf16 %v905_v61, %v904_v59 }
  0xdc   : > { %v654_v2 = vpop.f32.mrf.mxu2  ;;  %v694_v3 = vpop.f32.mrf.mxu3 }
  0xdd   : > { %1489 = vst [vmem:[%s1669_s8 + $0x98] sm:$0xff] %v1409_v0   ;;  %v576_v4 = vpop.f32.mrf.mxu0  ;;  %v616_v5 = vpop.f32.mrf.mxu1  ;;  %v758_v12 = vmul.f32 %v1647_v42, %v654_v2  ;;  %v774_v13 = vmul.f32 %v1647_v42, %v694_v3 }
  0xde   : > { %1497 = vst [vmem:[%s1669_s8 + $0xd8] sm:$0xff] %v1449_v1   ;;  %v727_v8 = vmul.f32 %v1647_v42, %v576_v4  ;;  %v743_v9 = vmul.f32 %v1647_v42, %v616_v5 }
  0xdf   : > { %v826_v22 = vadd.f32 %v1653_v44, %v758_v12  ;;  %v842_v23 = vadd.f32 %v1653_v44, %v774_v13 }
  0xe0   : > { %v795_v10 = vadd.f32 %v1653_v44, %v727_v8  ;;  %v811_v11 = vadd.f32 %v1653_v44, %v743_v9 }
  0xe1   : > { %v890_v30 = vmax.f32 %v826_v22, 0.0  ;;  %v906_v31 = vmax.f32 %v842_v23, 0.0 }
  0xe2   : > { %v859_v16 = vmax.f32 %v795_v10, 0.0  ;;  %v875_v17 = vmax.f32 %v811_v11, 0.0 }
  0xe4   : > { %v1334_v18 = vpack.c.bf16 %v859_v16, %v858_v14  ;;  %v1374_v19 = vpack.c.bf16 %v875_v17, %v874_v15  ;;  %v656_v20 = vpop.f32.mrf.mxu2  ;;  %v696_v21 = vpop.f32.mrf.mxu3 }
  0xe5   : > { %v759_v24 = vmul.f32 %v1647_v42, %v656_v20  ;;  %v775_v25 = vmul.f32 %v1647_v42, %v696_v21  ;;  %v579_v26 = vpop.f32.mrf.mxu0  ;;  %v619_v27 = vpop.f32.mrf.mxu1 }
  0xe6   : > { %1474 = vst [vmem:[%s1669_s8 + $0x20] sm:$0xff] %v1334_v18   ;;  %v728_v34 = vmul.f32 %v1647_v42, %v579_v26  ;;  %v744_v35 = vmul.f32 %v1647_v42, %v619_v27 }
  0xe7   : > { %1482 = vst [vmem:[%s1669_s8 + $0x60] sm:$0xff] %v1374_v19   ;;  %v827_v28 = vadd.f32 %v1653_v44, %v759_v24  ;;  %v843_v29 = vadd.f32 %v1653_v44, %v775_v25 }
  0xe8   : > { %v796_v43 = vadd.f32 %v1653_v44, %v728_v34  ;;  %v812_v45 = vadd.f32 %v1653_v44, %v744_v35 }
  0xe9   : > { %v891_v32 = vmax.f32 %v827_v28, 0.0  ;;  %v907_v33 = vmax.f32 %v843_v29, 0.0 }
  0xea   : > { %v860_v52 = vmax.f32 %v796_v43, 0.0  ;;  %v876_v53 = vmax.f32 %v812_v45, 0.0 }
  0xeb   : > { %v1414_v36 = vpack.c.bf16 %v891_v32, %v890_v30  ;;  %v1454_v37 = vpack.c.bf16 %v907_v33, %v906_v31 }
  0xec   : > { %v659_v38 = vpop.f32.mrf.mxu2  ;;  %v699_v39 = vpop.f32.mrf.mxu3 }
  0xed   : > { %1490 = vst [vmem:[%s1669_s8 + $0xa0] sm:$0xff] %v1414_v36   ;;  %v581_v40 = vpop.f32.mrf.mxu0  ;;  %v621_v41 = vpop.f32.mrf.mxu1  ;;  %v760_v50 = vmul.f32 %v1647_v42, %v659_v38  ;;  %v776_v51 = vmul.f32 %v1647_v42, %v699_v39 }
  0xee   : > { %1498 = vst [vmem:[%s1669_s8 + $0xe0] sm:$0xff] %v1454_v37   ;;  %v729_v46 = vmul.f32 %v1647_v42, %v581_v40  ;;  %v745_v47 = vmul.f32 %v1647_v42, %v621_v41 }
  0xef   : > { %v828_v60 = vadd.f32 %v1653_v44, %v760_v50  ;;  %v844_v61 = vadd.f32 %v1653_v44, %v776_v51 }
  0xf0   : > { %v797_v48 = vadd.f32 %v1653_v44, %v729_v46  ;;  %v813_v49 = vadd.f32 %v1653_v44, %v745_v47 }
  0xf1   : > { %v892_v4 = vmax.f32 %v828_v60, 0.0  ;;  %v908_v5 = vmax.f32 %v844_v61, 0.0 }
  0xf2   : > { %v861_v54 = vmax.f32 %v797_v48, 0.0  ;;  %v877_v55 = vmax.f32 %v813_v49, 0.0 }
  0xf4   : > { %v1339_v56 = vpack.c.bf16 %v861_v54, %v860_v52  ;;  %v1379_v57 = vpack.c.bf16 %v877_v55, %v876_v53  ;;  %v661_v58 = vpop.f32.mrf.mxu2  ;;  %v701_v59 = vpop.f32.mrf.mxu3 }
  0xf5   : > { %v761_v62 = vmul.f32 %v1647_v42, %v661_v58  ;;  %v777_v63 = vmul.f32 %v1647_v42, %v701_v59  ;;  %v584_v0 = vpop.f32.mrf.mxu0  ;;  %v624_v1 = vpop.f32.mrf.mxu1 }
  0xf6   : > { %1475 = vst [vmem:[%s1669_s8 + $0x28] sm:$0xff] %v1339_v56   ;;  %v730_v8 = vmul.f32 %v1647_v42, %v584_v0  ;;  %v746_v9 = vmul.f32 %v1647_v42, %v624_v1 }
  0xf7   : > { %1483 = vst [vmem:[%s1669_s8 + $0x68] sm:$0xff] %v1379_v57   ;;  %v829_v2 = vadd.f32 %v1653_v44, %v761_v62  ;;  %v845_v3 = vadd.f32 %v1653_v44, %v777_v63 }
  0xf8   : > { %v798_v16 = vadd.f32 %v1653_v44, %v730_v8  ;;  %v814_v17 = vadd.f32 %v1653_v44, %v746_v9 }
  0xf9   : > { %v893_v6 = vmax.f32 %v829_v2, 0.0  ;;  %v909_v7 = vmax.f32 %v845_v3, 0.0 }
  0xfa   : > { %v862_v24 = vmax.f32 %v798_v16, 0.0  ;;  %v878_v25 = vmax.f32 %v814_v17, 0.0 }
  0xfb   : > { %v1419_v10 = vpack.c.bf16 %v893_v6, %v892_v4  ;;  %v1459_v11 = vpack.c.bf16 %v909_v7, %v908_v5 }
  0xfc   : > { %v664_v12 = vpop.f32.mrf.mxu2  ;;  %v704_v13 = vpop.f32.mrf.mxu3 }
  0xfd   : > { %1491 = vst [vmem:[%s1669_s8 + $0xa8] sm:$0xff] %v1419_v10   ;;  %v586_v14 = vpop.f32.mrf.mxu0  ;;  %v626_v15 = vpop.f32.mrf.mxu1  ;;  %v762_v22 = vmul.f32 %v1647_v42, %v664_v12  ;;  %v778_v23 = vmul.f32 %v1647_v42, %v704_v13 }
  0xfe   : > { %1499 = vst [vmem:[%s1669_s8 + $0xe8] sm:$0xff] %v1459_v11   ;;  %v731_v18 = vmul.f32 %v1647_v42, %v586_v14  ;;  %v747_v19 = vmul.f32 %v1647_v42, %v626_v15 }
  0xff   : > { %v830_v32 = vadd.f32 %v1653_v44, %v762_v22  ;;  %v846_v33 = vadd.f32 %v1653_v44, %v778_v23 }
 0x100   : > { %v799_v20 = vadd.f32 %v1653_v44, %v731_v18  ;;  %v815_v21 = vadd.f32 %v1653_v44, %v747_v19 }
 0x101   : > { %v894_v40 = vmax.f32 %v830_v32, 0.0  ;;  %v910_v41 = vmax.f32 %v846_v33, 0.0 }
 0x102   : > { %v863_v26 = vmax.f32 %v799_v20, 0.0  ;;  %v879_v27 = vmax.f32 %v815_v21, 0.0 }
 0x104   : > { %v1344_v28 = vpack.c.bf16 %v863_v26, %v862_v24  ;;  %v1384_v29 = vpack.c.bf16 %v879_v27, %v878_v25  ;;  %v666_v30 = vpop.f32.mrf.mxu2  ;;  %v706_v31 = vpop.f32.mrf.mxu3 }
 0x105   : > { %v763_v34 = vmul.f32 %v1647_v42, %v666_v30  ;;  %v779_v35 = vmul.f32 %v1647_v42, %v706_v31  ;;  %v589_v36 = vpop.f32.mrf.mxu0  ;;  %v629_v37 = vpop.f32.mrf.mxu1 }
 0x106   : > { %1476 = vst [vmem:[%s1669_s8 + $0x30] sm:$0xff] %v1344_v28   ;;  %v732_v46 = vmul.f32 %v1647_v42, %v589_v36  ;;  %v748_v47 = vmul.f32 %v1647_v42, %v629_v37 }
 0x107   : > { %1484 = vst [vmem:[%s1669_s8 + $0x70] sm:$0xff] %v1384_v29   ;;  %v831_v38 = vadd.f32 %v1653_v44, %v763_v34  ;;  %v847_v39 = vadd.f32 %v1653_v44, %v779_v35 }
 0x108   : > { %v800_v54 = vadd.f32 %v1653_v44, %v732_v46  ;;  %v816_v55 = vadd.f32 %v1653_v44, %v748_v47 }
 0x109   : > { %v895_v43 = vmax.f32 %v831_v38, 0.0  ;;  %v911_v45 = vmax.f32 %v847_v39, 0.0 }
 0x10a   : > { %v864_v62 = vmax.f32 %v800_v54, 0.0  ;;  %v880_v63 = vmax.f32 %v816_v55, 0.0 }
 0x10b   : > { %v1424_v48 = vpack.c.bf16 %v895_v43, %v894_v40  ;;  %v1464_v49 = vpack.c.bf16 %v911_v45, %v910_v41 }
 0x10c   : > { %v669_v50 = vpop.f32.mrf.mxu2  ;;  %v709_v51 = vpop.f32.mrf.mxu3 }
 0x10d   : > { %1492 = vst [vmem:[%s1669_s8 + $0xb0] sm:$0xff] %v1424_v48   ;;  %v591_v52 = vpop.f32.mrf.mxu0  ;;  %v631_v53 = vpop.f32.mrf.mxu1  ;;  %v764_v60 = vmul.f32 %v1647_v42, %v669_v50  ;;  %v780_v61 = vmul.f32 %v1647_v42, %v709_v51 }
 0x10e   : > { %1500 = vst [vmem:[%s1669_s8 + $0xf0] sm:$0xff] %v1464_v49   ;;  %v733_v56 = vmul.f32 %v1647_v42, %v591_v52  ;;  %v749_v57 = vmul.f32 %v1647_v42, %v631_v53 }
 0x10f   : > { %v832_v6 = vadd.f32 %v1653_v44, %v764_v60  ;;  %v848_v7 = vadd.f32 %v1653_v44, %v780_v61 }
 0x110   : > { %v801_v58 = vadd.f32 %v1653_v44, %v733_v56  ;;  %v817_v59 = vadd.f32 %v1653_v44, %v749_v57 }
 0x111   : > { %v896_v12 = vmax.f32 %v832_v6, 0.0  ;;  %v912_v13 = vmax.f32 %v848_v7, 0.0 }
 0x112   : > { %v865_v0 = vmax.f32 %v801_v58, 0.0  ;;  %v881_v1 = vmax.f32 %v817_v59, 0.0 }
 0x114   : > { %v1349_v2 = vpack.c.bf16 %v865_v0, %v864_v62  ;;  %v1389_v3 = vpack.c.bf16 %v881_v1, %v880_v63  ;;  %v671_v4 = vpop.f32.mrf.mxu2  ;;  %v711_v5 = vpop.f32.mrf.mxu3 }
 0x115   : > { %v765_v8 = vmul.f32 %v1647_v42, %v671_v4  ;;  %v781_v9 = vmul.f32 %v1647_v42, %v711_v5 }
 0x116   : > { %1477 = vst [vmem:[%s1669_s8 + $0x38] sm:$0xff] %v1349_v2  }
 0x117   : > { %1485 = vst [vmem:[%s1669_s8 + $0x78] sm:$0xff] %v1389_v3   ;;  %v833_v10 = vadd.f32 %v1653_v44, %v765_v8  ;;  %v849_v11 = vadd.f32 %v1653_v44, %v781_v9 }
 0x119   : > { %v897_v14 = vmax.f32 %v833_v10, 0.0  ;;  %v913_v15 = vmax.f32 %v849_v11, 0.0 }
 0x11b   : > { %v1429_v16 = vpack.c.bf16 %v897_v14, %v896_v12  ;;  %v1469_v17 = vpack.c.bf16 %v913_v15, %v912_v13 }
 0x11d   : > { %1493 = vst [vmem:[%s1669_s8 + $0xb8] sm:$0xff] %v1429_v16  }
 0x11e   : > { %1501 = vst [vmem:[%s1669_s8 + $0xf8] sm:$0xff] %v1469_v17  }
 0x11f PF: > { %s14_s15 = sadd.s32 1, %s1525_s15  }
 0x120   : > { %p11_p4 = scmp.ge.s32.totalorder %s14_s15, 6  }
 0x122   :  { %13 = sbr.rel (!%p11_p4) target bundleno = 1 (0x1), region = 66 }

// kernel: deep_gcn_forward.7
= control target key start
LH: loop header
LB: loop body
LE: loop exit
PB: predicated region body
PF: predicated region fallthrough
CT: control target
= control target key end

     0   :  { %s964_s15 = smov 0   ;;  %s1123_s0 = inlined_call_operand.vmem [shape: bf16[512,36], index: 0, kind: input, shape index: {}]   ;;  %s1124_s1 = inlined_call_operand.vmem [shape: bf16[36,128], index: 1, kind: input, shape index: {}]   ;;  %s1125_s2 = inlined_call_operand.vmem [shape: f32[1,128], index: 2, kind: input, shape index: {}]   ;;  %s1126_s3 = inlined_call_operand.vmem [shape: f32[1,128], index: 3, kind: input, shape index: {}]   ;;  %s1127_s4 = inlined_call_operand.vmem [shape: bf16[512,128], index: 4, kind: output, shape index: {}]  }
   0x1 LB: > { %s700_s16 = sadd.s32 4294967295, %s937_s15   ;;  %p704_p0 = scmp.ge.s32.totalorder %s937_s15, 1  ;;  %s937_s15 = sphi %s964_s15, %s14_s15  }
   0x2   : > { %p163_p1 = scmp.lt.s32.totalorder %s937_s15, 3 }
   0x4   : > { %p164_p2 = pnand %p704_p0, %p163_p1 }
   0x5   : > { %s705_s19 = sshll.u32 (!%p164_p2), %s700_s16, 5 }
   0x6   : > { %167 = sbr.rel (%p164_p2) target bundleno = 227 (0xe3), region = 36  ;;  %p190_p3 = scmp.lt.s32.totalorder (!%p164_p2), %s705_s19, 63 }
   0xb   : > { %v238_v0 = vld [vmem:[%s1124_s1 + $0x10] sm:$0x3]  ;;  %vm383_vm0 = vcmask 1041408   ;;  %s1129_s19 = smov (!%p190_p3, %s705_s19), 63  ;;  %v816_v4 = vld [vmem:[%s1124_s1 + $0x8] sm:$0xff]  ;;  %v815_v5 = vld [vmem:[%s1124_s1] sm:$0xff] }
   0xc   : > { %v328_v1 = vunpack.c.l.b16 %v238_v0  ;;  %s706_s22 = sshll.u32 %s1129_s19, 2  ;;  %vm334_vm1 = vcmask 293888   ;;  %v1026_v24 = vld [vmem:[%s1125_s2] ss:$0 sm:$0xff] }
   0xd   : > { %s989_s27 = scalar_lea.vmem %s1123_s0, %s706_s22  ;;  %v1032_v26 = vld [vmem:[%s1126_s3] ss:$0 sm:$0xff]  ;;  %s1048_s8 = scalar_lea.vmem %s1127_s4, %s706_s22 }
   0xe   : > { %v331_v2 = vpack.c.b16 %v328_v1, %v328_v1  ;;  %v799_v6 = vld [vmem:[%s989_s27] sm:$0xff]  ;;  %v800_v10 = vld [vmem:[%s989_s27 + $0x8] sm:$0xff]  ;;  %v801_v14 = vld [vmem:[%s989_s27 + $0x10] sm:$0xff] }
   0xf   : > { %v803_v7 = vld [vmem:[%s989_s27 + $0x20] sm:$0xff]  ;;  %v804_v11 = vld [vmem:[%s989_s27 + $0x28] sm:$0xff]  ;;  %v805_v15 = vld [vmem:[%s989_s27 + $0x30] sm:$0xff] }
  0x10   : > { %v385_v3 = vsel %vm383_vm0, %v331_v2, 0  ;;  %v807_v8 = vld [vmem:[%s989_s27 + $0x40] sm:$0xff]  ;;  %v808_v12 = vld [vmem:[%s989_s27 + $0x48] sm:$0xff]  ;;  %v809_v16 = vld [vmem:[%s989_s27 + $0x50] sm:$0xff] }
  0x11   : > { %392 = vmatpush.bf16.msra.mxu0 %v385_v3  ;;  %912 = vmatpush.bf16.msra.mxu1 %v385_v3  ;;  %v811_v9 = vld [vmem:[%s989_s27 + $0x60] sm:$0xff]  ;;  %v812_v13 = vld [vmem:[%s989_s27 + $0x68] sm:$0xff]  ;;  %v813_v17 = vld [vmem:[%s989_s27 + $0x70] sm:$0xff] }
  0x12   : > { %913 = vmatpush.bf16.msra.mxu2 %v385_v3  ;;  %914 = vmatpush.bf16.msra.mxu3 %v385_v3  ;;  %v802_v18 = vld [vmem:[%s989_s27 + $0x18] sm:$0xff] }
  0x13   : > { %v806_v19 = vld [vmem:[%s989_s27 + $0x38] sm:$0xff] }
  0x14   : > { %v810_v20 = vld [vmem:[%s989_s27 + $0x58] sm:$0xff] }
  0x15   : > { %393 = vmatpush.bf16.msra.mxu0 %v816_v4  ;;  %915 = vmatpush.bf16.msra.mxu1 %v816_v4  ;;  %v814_v21 = vld [vmem:[%s989_s27 + $0x78] sm:$0xff] }
  0x16   : > { %916 = vmatpush.bf16.msra.mxu2 %v816_v4  ;;  %917 = vmatpush.bf16.msra.mxu3 %v816_v4 }
  0x19   : > { %394 = vmatpush.bf16.msra.mxu0 %v815_v5  ;;  %918 = vmatpush.bf16.msra.mxu1 %v815_v5 }
  0x1a   : > { %919 = vmatpush.bf16.msra.mxu2 %v815_v5  ;;  %920 = vmatpush.bf16.msra.mxu3 %v815_v5 }
  0x1c   : > { %781 = vmatmul.msk.bf16.vlgmr.msra.gmra.mxu0 %vm334_vm1, %v799_v6  ;;  %785 = vmatmul.msk.bf16.vlgmr.msra.gmra.mxu1 %vm334_vm1, %v803_v7 }
  0x1d   : > { %789 = vmatmul.msk.bf16.vlgmr.msra.gmra.mxu2 %vm334_vm1, %v807_v8  ;;  %793 = vmatmul.msk.bf16.vlgmr.msra.gmra.mxu3 %vm334_vm1, %v811_v9 }
  0x2c   : > { %782 = vmatmul.msk.bf16.gmra.mxu0 %vm334_vm1, %v800_v10  ;;  %786 = vmatmul.msk.bf16.gmra.mxu1 %vm334_vm1, %v804_v11 }
  0x2d   : > { %790 = vmatmul.msk.bf16.gmra.mxu2 %vm334_vm1, %v808_v12  ;;  %794 = vmatmul.msk.bf16.gmra.mxu3 %vm334_vm1, %v812_v13 }
  0x3c   : > { %783 = vmatmul.msk.bf16.gmra.mxu0 %vm334_vm1, %v801_v14  ;;  %787 = vmatmul.msk.bf16.gmra.mxu1 %vm334_vm1, %v805_v15 }
  0x3d   : > { %791 = vmatmul.msk.bf16.gmra.mxu2 %vm334_vm1, %v809_v16  ;;  %795 = vmatmul.msk.bf16.gmra.mxu3 %vm334_vm1, %v813_v17 }
  0x4c   : > { %784 = vmatmul.msk.bf16.gmra.mxu0 %vm334_vm1, %v802_v18  ;;  %788 = vmatmul.msk.bf16.gmra.mxu1 %vm334_vm1, %v806_v19 }
  0x4d   : > { %792 = vmatmul.msk.bf16.gmra.mxu2 %vm334_vm1, %v810_v20  ;;  %796 = vmatmul.msk.bf16.gmra.mxu3 %vm334_vm1, %v814_v21 }
  0x99   : > { %v396_v22 = vpop.f32.mrf.mxu0  ;;  %v416_v23 = vpop.f32.mrf.mxu1 }
  0x9a   : > { %v480_v25 = vmul.f32 %v1026_v24, %v396_v22  ;;  %v488_v27 = vmul.f32 %v1026_v24, %v416_v23 }
  0x9c   : > { %v516_v32 = vadd.f32 %v1032_v26, %v480_v25  ;;  %v524_v33 = vadd.f32 %v1032_v26, %v488_v27 }
  0x9e   : > { %v548_v40 = vmax.f32 %v516_v32, 0.0  ;;  %v556_v41 = vmax.f32 %v524_v33, 0.0 }
  0xa0   : > { %v436_v28 = vpop.f32.mrf.mxu2  ;;  %v456_v29 = vpop.f32.mrf.mxu3 }
  0xa1   : > { %v398_v30 = vpop.f32.mrf.mxu0  ;;  %v418_v31 = vpop.f32.mrf.mxu1  ;;  %v496_v38 = vmul.f32 %v1026_v24, %v436_v28  ;;  %v504_v39 = vmul.f32 %v1026_v24, %v456_v29 }
  0xa2   : > { %v481_v34 = vmul.f32 %v1026_v24, %v398_v30  ;;  %v489_v35 = vmul.f32 %v1026_v24, %v418_v31 }
  0xa3   : > { %v532_v48 = vadd.f32 %v1032_v26, %v496_v38  ;;  %v540_v49 = vadd.f32 %v1032_v26, %v504_v39 }
  0xa4   : > { %v517_v36 = vadd.f32 %v1032_v26, %v481_v34  ;;  %v525_v37 = vadd.f32 %v1032_v26, %v489_v35 }
  0xa5   : > { %v564_v56 = vmax.f32 %v532_v48, 0.0  ;;  %v572_v57 = vmax.f32 %v540_v49, 0.0 }
  0xa6   : > { %v549_v42 = vmax.f32 %v517_v36, 0.0  ;;  %v557_v43 = vmax.f32 %v525_v37, 0.0 }
  0xa8   : > { %v820_v44 = vpack.c.bf16 %v549_v42, %v548_v40  ;;  %v840_v45 = vpack.c.bf16 %v557_v43, %v556_v41  ;;  %v438_v46 = vpop.f32.mrf.mxu2  ;;  %v458_v47 = vpop.f32.mrf.mxu3 }
  0xa9   : > { %v497_v50 = vmul.f32 %v1026_v24, %v438_v46  ;;  %v505_v51 = vmul.f32 %v1026_v24, %v458_v47  ;;  %v401_v52 = vpop.f32.mrf.mxu0  ;;  %v421_v53 = vpop.f32.mrf.mxu1 }
  0xaa   : > { %821 = vst [vmem:[%s1048_s8] sm:$0xff] %v820_v44   ;;  %v482_v60 = vmul.f32 %v1026_v24, %v401_v52  ;;  %v490_v61 = vmul.f32 %v1026_v24, %v421_v53 }
  0xab   : > { %900 = vst [vmem:[%s1048_s8 + $0x20] sm:$0xff] %v840_v45   ;;  %v533_v54 = vadd.f32 %v1032_v26, %v497_v50  ;;  %v541_v55 = vadd.f32 %v1032_v26, %v505_v51 }
  0xac   : > { %v518_v4 = vadd.f32 %v1032_v26, %v482_v60  ;;  %v526_v5 = vadd.f32 %v1032_v26, %v490_v61 }
  0xad   : > { %v565_v58 = vmax.f32 %v533_v54, 0.0  ;;  %v573_v59 = vmax.f32 %v541_v55, 0.0 }
  0xae   : > { %v550_v12 = vmax.f32 %v518_v4, 0.0  ;;  %v558_v13 = vmax.f32 %v526_v5, 0.0 }
  0xaf   : > { %v860_v62 = vpack.c.bf16 %v565_v58, %v564_v56  ;;  %v880_v63 = vpack.c.bf16 %v573_v59, %v572_v57 }
  0xb0   : > { %v441_v0 = vpop.f32.mrf.mxu2  ;;  %v461_v1 = vpop.f32.mrf.mxu3 }
  0xb1   : > { %904 = vst [vmem:[%s1048_s8 + $0x40] sm:$0xff] %v860_v62   ;;  %v403_v2 = vpop.f32.mrf.mxu0  ;;  %v423_v3 = vpop.f32.mrf.mxu1  ;;  %v498_v10 = vmul.f32 %v1026_v24, %v441_v0  ;;  %v506_v11 = vmul.f32 %v1026_v24, %v461_v1 }
  0xb2   : > { %908 = vst [vmem:[%s1048_s8 + $0x60] sm:$0xff] %v880_v63   ;;  %v483_v6 = vmul.f32 %v1026_v24, %v403_v2  ;;  %v491_v7 = vmul.f32 %v1026_v24, %v423_v3 }
  0xb3   : > { %v534_v20 = vadd.f32 %v1032_v26, %v498_v10  ;;  %v542_v21 = vadd.f32 %v1032_v26, %v506_v11 }
  0xb4   : > { %v519_v8 = vadd.f32 %v1032_v26, %v483_v6  ;;  %v527_v9 = vadd.f32 %v1032_v26, %v491_v7 }
  0xb5   : > { %v566_v30 = vmax.f32 %v534_v20, 0.0  ;;  %v574_v31 = vmax.f32 %v542_v21, 0.0 }
  0xb6   : > { %v551_v14 = vmax.f32 %v519_v8, 0.0  ;;  %v559_v15 = vmax.f32 %v527_v9, 0.0 }
  0xb8   : > { %v825_v16 = vpack.c.bf16 %v551_v14, %v550_v12  ;;  %v845_v17 = vpack.c.bf16 %v559_v15, %v558_v13  ;;  %v443_v18 = vpop.f32.mrf.mxu2  ;;  %v463_v19 = vpop.f32.mrf.mxu3 }
  0xb9   : > { %v499_v22 = vmul.f32 %v1026_v24, %v443_v18  ;;  %v507_v23 = vmul.f32 %v1026_v24, %v463_v19  ;;  %v406_v25 = vpop.f32.mrf.mxu0  ;;  %v426_v27 = vpop.f32.mrf.mxu1 }
  0xba   : > { %897 = vst [vmem:[%s1048_s8 + $0x8] sm:$0xff] %v825_v16   ;;  %v484_v34 = vmul.f32 %v1026_v24, %v406_v25  ;;  %v492_v35 = vmul.f32 %v1026_v24, %v426_v27 }
  0xbb   : > { %901 = vst [vmem:[%s1048_s8 + $0x28] sm:$0xff] %v845_v17   ;;  %v535_v28 = vadd.f32 %v1032_v26, %v499_v22  ;;  %v543_v29 = vadd.f32 %v1032_v26, %v507_v23 }
  0xbc   : > { %v520_v42 = vadd.f32 %v1032_v26, %v484_v34  ;;  %v528_v43 = vadd.f32 %v1032_v26, %v492_v35 }
  0xbd   : > { %v567_v32 = vmax.f32 %v535_v28, 0.0  ;;  %v575_v33 = vmax.f32 %v543_v29, 0.0 }
  0xbe   : > { %v552_v50 = vmax.f32 %v520_v42, 0.0  ;;  %v560_v51 = vmax.f32 %v528_v43, 0.0 }
  0xbf   : > { %v865_v36 = vpack.c.bf16 %v567_v32, %v566_v30  ;;  %v885_v37 = vpack.c.bf16 %v575_v33, %v574_v31 }
  0xc0   : > { %v446_v38 = vpop.f32.mrf.mxu2  ;;  %v466_v39 = vpop.f32.mrf.mxu3 }
  0xc1   : > { %905 = vst [vmem:[%s1048_s8 + $0x48] sm:$0xff] %v865_v36   ;;  %v408_v40 = vpop.f32.mrf.mxu0  ;;  %v428_v41 = vpop.f32.mrf.mxu1  ;;  %v500_v48 = vmul.f32 %v1026_v24, %v446_v38  ;;  %v508_v49 = vmul.f32 %v1026_v24, %v466_v39 }
  0xc2   : > { %909 = vst [vmem:[%s1048_s8 + $0x68] sm:$0xff] %v885_v37   ;;  %v485_v44 = vmul.f32 %v1026_v24, %v408_v40  ;;  %v493_v45 = vmul.f32 %v1026_v24, %v428_v41 }
  0xc3   : > { %v536_v58 = vadd.f32 %v1032_v26, %v500_v48  ;;  %v544_v59 = vadd.f32 %v1032_v26, %v508_v49 }
  0xc4   : > { %v521_v46 = vadd.f32 %v1032_v26, %v485_v44  ;;  %v529_v47 = vadd.f32 %v1032_v26, %v493_v45 }
  0xc5   : > { %v568_v2 = vmax.f32 %v536_v58, 0.0  ;;  %v576_v3 = vmax.f32 %v544_v59, 0.0 }
  0xc6   : > { %v553_v52 = vmax.f32 %v521_v46, 0.0  ;;  %v561_v53 = vmax.f32 %v529_v47, 0.0 }
  0xc8   : > { %v830_v54 = vpack.c.bf16 %v553_v52, %v552_v50  ;;  %v850_v55 = vpack.c.bf16 %v561_v53, %v560_v51  ;;  %v448_v56 = vpop.f32.mrf.mxu2  ;;  %v468_v57 = vpop.f32.mrf.mxu3 }
  0xc9   : > { %v501_v60 = vmul.f32 %v1026_v24, %v448_v56  ;;  %v509_v61 = vmul.f32 %v1026_v24, %v468_v57  ;;  %v411_v62 = vpop.f32.mrf.mxu0  ;;  %v431_v63 = vpop.f32.mrf.mxu1 }
  0xca   : > { %898 = vst [vmem:[%s1048_s8 + $0x10] sm:$0xff] %v830_v54   ;;  %v486_v6 = vmul.f32 %v1026_v24, %v411_v62  ;;  %v494_v7 = vmul.f32 %v1026_v24, %v431_v63 }
  0xcb   : > { %902 = vst [vmem:[%s1048_s8 + $0x30] sm:$0xff] %v850_v55   ;;  %v537_v0 = vadd.f32 %v1032_v26, %v501_v60  ;;  %v545_v1 = vadd.f32 %v1032_v26, %v509_v61 }
  0xcc   : > { %v522_v14 = vadd.f32 %v1032_v26, %v486_v6  ;;  %v530_v15 = vadd.f32 %v1032_v26, %v494_v7 }
  0xcd   : > { %v569_v4 = vmax.f32 %v537_v0, 0.0  ;;  %v577_v5 = vmax.f32 %v545_v1, 0.0 }
  0xce   : > { %v554_v22 = vmax.f32 %v522_v14, 0.0  ;;  %v562_v23 = vmax.f32 %v530_v15, 0.0 }
  0xcf   : > { %v870_v8 = vpack.c.bf16 %v569_v4, %v568_v2  ;;  %v890_v9 = vpack.c.bf16 %v577_v5, %v576_v3 }
  0xd0   : > { %v451_v10 = vpop.f32.mrf.mxu2  ;;  %v471_v11 = vpop.f32.mrf.mxu3 }
  0xd1   : > { %906 = vst [vmem:[%s1048_s8 + $0x50] sm:$0xff] %v870_v8   ;;  %v413_v12 = vpop.f32.mrf.mxu0  ;;  %v433_v13 = vpop.f32.mrf.mxu1  ;;  %v502_v20 = vmul.f32 %v1026_v24, %v451_v10  ;;  %v510_v21 = vmul.f32 %v1026_v24, %v471_v11 }
  0xd2   : > { %910 = vst [vmem:[%s1048_s8 + $0x70] sm:$0xff] %v890_v9   ;;  %v487_v16 = vmul.f32 %v1026_v24, %v413_v12  ;;  %v495_v17 = vmul.f32 %v1026_v24, %v433_v13 }
  0xd3   : > { %v538_v32 = vadd.f32 %v1032_v26, %v502_v20  ;;  %v546_v33 = vadd.f32 %v1032_v26, %v510_v21 }
  0xd4   : > { %v523_v18 = vadd.f32 %v1032_v26, %v487_v16  ;;  %v531_v19 = vadd.f32 %v1032_v26, %v495_v17 }
  0xd5   : > { %v570_v38 = vmax.f32 %v538_v32, 0.0  ;;  %v578_v39 = vmax.f32 %v546_v33, 0.0 }
  0xd6   : > { %v555_v25 = vmax.f32 %v523_v18, 0.0  ;;  %v563_v27 = vmax.f32 %v531_v19, 0.0 }
  0xd8   : > { %v835_v28 = vpack.c.bf16 %v555_v25, %v554_v22  ;;  %v855_v29 = vpack.c.bf16 %v563_v27, %v562_v23  ;;  %v453_v30 = vpop.f32.mrf.mxu2  ;;  %v473_v31 = vpop.f32.mrf.mxu3 }
  0xd9   : > { %v503_v34 = vmul.f32 %v1026_v24, %v453_v30  ;;  %v511_v35 = vmul.f32 %v1026_v24, %v473_v31 }
  0xda   : > { %899 = vst [vmem:[%s1048_s8 + $0x18] sm:$0xff] %v835_v28  }
  0xdb   : > { %903 = vst [vmem:[%s1048_s8 + $0x38] sm:$0xff] %v855_v29   ;;  %v539_v36 = vadd.f32 %v1032_v26, %v503_v34  ;;  %v547_v37 = vadd.f32 %v1032_v26, %v511_v35 }
  0xdd   : > { %v571_v40 = vmax.f32 %v539_v36, 0.0  ;;  %v579_v41 = vmax.f32 %v547_v37, 0.0 }
  0xdf   : > { %v875_v42 = vpack.c.bf16 %v571_v40, %v570_v38  ;;  %v895_v43 = vpack.c.bf16 %v579_v41, %v578_v39 }
  0xe1   : > { %907 = vst [vmem:[%s1048_s8 + $0x58] sm:$0xff] %v875_v42  }
  0xe2   : > { %911 = vst [vmem:[%s1048_s8 + $0x78] sm:$0xff] %v895_v43  }
  0xe3 PF: > { %s14_s15 = sadd.s32 1, %s937_s15  }
  0xe4   : > { %p11_p4 = scmp.ge.s32.totalorder %s14_s15, 4  }
  0xe6   :  { %13 = sbr.rel (!%p11_p4) target bundleno = 1 (0x1), region = 66 }

// kernel: deep_gcn_forward.8
= control target key start
LH: loop header
LB: loop body
LE: loop exit
PB: predicated region body
PF: predicated region fallthrough
CT: control target
= control target key end

     0   :  { %s996_s15 = smov 0   ;;  %s1161_s0 = inlined_call_operand.vmem [shape: bf16[512,72], index: 0, kind: input, shape index: {}]   ;;  %s1162_s1 = inlined_call_operand.vmem [shape: bf16[72,128], index: 1, kind: input, shape index: {}]   ;;  %s1163_s2 = inlined_call_operand.vmem [shape: f32[1,128], index: 2, kind: input, shape index: {}]   ;;  %s1164_s3 = inlined_call_operand.vmem [shape: f32[1,128], index: 3, kind: input, shape index: {}]   ;;  %s1165_s4 = inlined_call_operand.vmem [shape: bf16[512,128], index: 4, kind: output, shape index: {}]  }
   0x1 LB: > { %s716_s16 = sadd.s32 4294967295, %s969_s15   ;;  %p720_p0 = scmp.ge.s32.totalorder %s969_s15, 1  ;;  %s969_s15 = sphi %s996_s15, %s14_s15  }
   0x2   : > { %p163_p1 = scmp.lt.s32.totalorder %s969_s15, 3 }
   0x4   : > { %p164_p2 = pnand %p720_p0, %p163_p1 }
   0x5   : > { %s721_s19 = sshll.u32 (!%p164_p2), %s716_s16, 5 }
   0x6   : > { %167 = sbr.rel (%p164_p2) target bundleno = 235 (0xeb), region = 36  ;;  %p190_p3 = scmp.lt.s32.totalorder (!%p164_p2), %s721_s19, 63 }
   0xb   : > { %v242_v0 = vld [vmem:[%s1162_s1 + $0x20] sm:$0xf]  ;;  %vm399_vm0 = vcmask 1043456   ;;  %v842_v4 = vld [vmem:[%s1162_s1 + $0x18] sm:$0xff]  ;;  %v841_v5 = vld [vmem:[%s1162_s1 + $0x10] sm:$0xff]  ;;  %s1167_s19 = smov (!%p190_p3, %s721_s19), 63 }
   0xc   : > { %v340_v1 = vunpack.c.l.b16 %v242_v0  ;;  %v840_v6 = vld [vmem:[%s1162_s1 + $0x8] sm:$0xff]  ;;  %s722_s26 = sshll.u32 %s1167_s19, 2  ;;  %v839_v7 = vld [vmem:[%s1162_s1] sm:$0xff]  ;;  %vm350_vm1 = vcmask 588800  }
   0xd   : > { %s1027_s5 = scalar_lea.vmem %s1161_s0, %s722_s26  ;;  %v1064_v26 = vld [vmem:[%s1163_s2] ss:$0 sm:$0xff]  ;;  %s1086_s12 = scalar_lea.vmem %s1165_s4, %s722_s26 }
   0xe   : > { %v345_v2 = vpack.c.b16 %v340_v1, %v340_v1  ;;  %v823_v8 = vld [vmem:[%s1027_s5] sm:$0xff]  ;;  %v824_v12 = vld [vmem:[%s1027_s5 + $0x8] sm:$0xff]  ;;  %v825_v16 = vld [vmem:[%s1027_s5 + $0x10] sm:$0xff] }
   0xf   : > { %v827_v9 = vld [vmem:[%s1027_s5 + $0x20] sm:$0xff]  ;;  %v828_v13 = vld [vmem:[%s1027_s5 + $0x28] sm:$0xff]  ;;  %v829_v17 = vld [vmem:[%s1027_s5 + $0x30] sm:$0xff] }
  0x10   : > { %v401_v3 = vsel %vm399_vm0, %v345_v2, 0  ;;  %v831_v10 = vld [vmem:[%s1027_s5 + $0x40] sm:$0xff]  ;;  %v832_v14 = vld [vmem:[%s1027_s5 + $0x48] sm:$0xff]  ;;  %v833_v18 = vld [vmem:[%s1027_s5 + $0x50] sm:$0xff] }
  0x11   : > { %406 = vmatpush.bf16.msra.mxu0 %v401_v3  ;;  %938 = vmatpush.bf16.msra.mxu1 %v401_v3  ;;  %v835_v11 = vld [vmem:[%s1027_s5 + $0x60] sm:$0xff]  ;;  %v836_v15 = vld [vmem:[%s1027_s5 + $0x68] sm:$0xff]  ;;  %v837_v19 = vld [vmem:[%s1027_s5 + $0x70] sm:$0xff] }
  0x12   : > { %939 = vmatpush.bf16.msra.mxu2 %v401_v3  ;;  %940 = vmatpush.bf16.msra.mxu3 %v401_v3  ;;  %v826_v20 = vld [vmem:[%s1027_s5 + $0x18] sm:$0xff]  ;;  %v1070_v28 = vld [vmem:[%s1164_s3] ss:$0 sm:$0xff] }
  0x13   : > { %v830_v21 = vld [vmem:[%s1027_s5 + $0x38] sm:$0xff] }
  0x14   : > { %v834_v22 = vld [vmem:[%s1027_s5 + $0x58] sm:$0xff] }
  0x15   : > { %407 = vmatpush.bf16.msra.mxu0 %v842_v4  ;;  %941 = vmatpush.bf16.msra.mxu1 %v842_v4  ;;  %v838_v23 = vld [vmem:[%s1027_s5 + $0x78] sm:$0xff] }
  0x16   : > { %942 = vmatpush.bf16.msra.mxu2 %v842_v4  ;;  %943 = vmatpush.bf16.msra.mxu3 %v842_v4 }
  0x19   : > { %408 = vmatpush.bf16.msra.mxu0 %v841_v5  ;;  %944 = vmatpush.bf16.msra.mxu1 %v841_v5 }
  0x1a   : > { %945 = vmatpush.bf16.msra.mxu2 %v841_v5  ;;  %946 = vmatpush.bf16.msra.mxu3 %v841_v5 }
  0x1d   : > { %409 = vmatpush.bf16.msra.mxu0 %v840_v6  ;;  %947 = vmatpush.bf16.msra.mxu1 %v840_v6 }
  0x1e   : > { %948 = vmatpush.bf16.msra.mxu2 %v840_v6  ;;  %949 = vmatpush.bf16.msra.mxu3 %v840_v6 }
  0x21   : > { %410 = vmatpush.bf16.msra.mxu0 %v839_v7  ;;  %950 = vmatpush.bf16.msra.mxu1 %v839_v7 }
  0x22   : > { %951 = vmatpush.bf16.msra.mxu2 %v839_v7  ;;  %952 = vmatpush.bf16.msra.mxu3 %v839_v7 }
  0x24   : > { %805 = vmatmul.msk.bf16.vlgmr.msra.gmra.mxu0 %vm350_vm1, %v823_v8  ;;  %809 = vmatmul.msk.bf16.vlgmr.msra.gmra.mxu1 %vm350_vm1, %v827_v9 }
  0x25   : > { %813 = vmatmul.msk.bf16.vlgmr.msra.gmra.mxu2 %vm350_vm1, %v831_v10  ;;  %817 = vmatmul.msk.bf16.vlgmr.msra.gmra.mxu3 %vm350_vm1, %v835_v11 }
  0x34   : > { %806 = vmatmul.msk.bf16.gmra.mxu0 %vm350_vm1, %v824_v12  ;;  %810 = vmatmul.msk.bf16.gmra.mxu1 %vm350_vm1, %v828_v13 }
  0x35   : > { %814 = vmatmul.msk.bf16.gmra.mxu2 %vm350_vm1, %v832_v14  ;;  %818 = vmatmul.msk.bf16.gmra.mxu3 %vm350_vm1, %v836_v15 }
  0x44   : > { %807 = vmatmul.msk.bf16.gmra.mxu0 %vm350_vm1, %v825_v16  ;;  %811 = vmatmul.msk.bf16.gmra.mxu1 %vm350_vm1, %v829_v17 }
  0x45   : > { %815 = vmatmul.msk.bf16.gmra.mxu2 %vm350_vm1, %v833_v18  ;;  %819 = vmatmul.msk.bf16.gmra.mxu3 %vm350_vm1, %v837_v19 }
  0x54   : > { %808 = vmatmul.msk.bf16.gmra.mxu0 %vm350_vm1, %v826_v20  ;;  %812 = vmatmul.msk.bf16.gmra.mxu1 %vm350_vm1, %v830_v21 }
  0x55   : > { %816 = vmatmul.msk.bf16.gmra.mxu2 %vm350_vm1, %v834_v22  ;;  %820 = vmatmul.msk.bf16.gmra.mxu3 %vm350_vm1, %v838_v23 }
  0xa1   : > { %v412_v24 = vpop.f32.mrf.mxu0  ;;  %v432_v25 = vpop.f32.mrf.mxu1 }
  0xa2   : > { %v496_v27 = vmul.f32 %v1064_v26, %v412_v24  ;;  %v504_v29 = vmul.f32 %v1064_v26, %v432_v25 }
  0xa4   : > { %v532_v34 = vadd.f32 %v1070_v28, %v496_v27  ;;  %v540_v35 = vadd.f32 %v1070_v28, %v504_v29 }
  0xa6   : > { %v564_v42 = vmax.f32 %v532_v34, 0.0  ;;  %v572_v43 = vmax.f32 %v540_v35, 0.0 }
  0xa8   : > { %v452_v30 = vpop.f32.mrf.mxu2  ;;  %v472_v31 = vpop.f32.mrf.mxu3 }
  0xa9   : > { %v414_v32 = vpop.f32.mrf.mxu0  ;;  %v434_v33 = vpop.f32.mrf.mxu1  ;;  %v512_v40 = vmul.f32 %v1064_v26, %v452_v30  ;;  %v520_v41 = vmul.f32 %v1064_v26, %v472_v31 }
  0xaa   : > { %v497_v36 = vmul.f32 %v1064_v26, %v414_v32  ;;  %v505_v37 = vmul.f32 %v1064_v26, %v434_v33 }
  0xab   : > { %v548_v50 = vadd.f32 %v1070_v28, %v512_v40  ;;  %v556_v51 = vadd.f32 %v1070_v28, %v520_v41 }
  0xac   : > { %v533_v38 = vadd.f32 %v1070_v28, %v497_v36  ;;  %v541_v39 = vadd.f32 %v1070_v28, %v505_v37 }
  0xad   : > { %v580_v58 = vmax.f32 %v548_v50, 0.0  ;;  %v588_v59 = vmax.f32 %v556_v51, 0.0 }
  0xae   : > { %v565_v44 = vmax.f32 %v533_v38, 0.0  ;;  %v573_v45 = vmax.f32 %v541_v39, 0.0 }
  0xb0   : > { %v846_v46 = vpack.c.bf16 %v565_v44, %v564_v42  ;;  %v866_v47 = vpack.c.bf16 %v573_v45, %v572_v43  ;;  %v454_v48 = vpop.f32.mrf.mxu2  ;;  %v474_v49 = vpop.f32.mrf.mxu3 }
  0xb1   : > { %v513_v52 = vmul.f32 %v1064_v26, %v454_v48  ;;  %v521_v53 = vmul.f32 %v1064_v26, %v474_v49  ;;  %v417_v54 = vpop.f32.mrf.mxu0  ;;  %v437_v55 = vpop.f32.mrf.mxu1 }
  0xb2   : > { %847 = vst [vmem:[%s1086_s12] sm:$0xff] %v846_v46   ;;  %v498_v62 = vmul.f32 %v1064_v26, %v417_v54  ;;  %v506_v63 = vmul.f32 %v1064_v26, %v437_v55 }
  0xb3   : > { %926 = vst [vmem:[%s1086_s12 + $0x20] sm:$0xff] %v866_v47   ;;  %v549_v56 = vadd.f32 %v1070_v28, %v513_v52  ;;  %v557_v57 = vadd.f32 %v1070_v28, %v521_v53 }
  0xb4   : > { %v534_v6 = vadd.f32 %v1070_v28, %v498_v62  ;;  %v542_v7 = vadd.f32 %v1070_v28, %v506_v63 }
  0xb5   : > { %v581_v60 = vmax.f32 %v549_v56, 0.0  ;;  %v589_v61 = vmax.f32 %v557_v57, 0.0 }
  0xb6   : > { %v566_v14 = vmax.f32 %v534_v6, 0.0  ;;  %v574_v15 = vmax.f32 %v542_v7, 0.0 }
  0xb7   : > { %v886_v0 = vpack.c.bf16 %v581_v60, %v580_v58  ;;  %v906_v1 = vpack.c.bf16 %v589_v61, %v588_v59 }
  0xb8   : > { %v457_v2 = vpop.f32.mrf.mxu2  ;;  %v477_v3 = vpop.f32.mrf.mxu3 }
  0xb9   : > { %930 = vst [vmem:[%s1086_s12 + $0x40] sm:$0xff] %v886_v0   ;;  %v419_v4 = vpop.f32.mrf.mxu0  ;;  %v439_v5 = vpop.f32.mrf.mxu1  ;;  %v514_v12 = vmul.f32 %v1064_v26, %v457_v2  ;;  %v522_v13 = vmul.f32 %v1064_v26, %v477_v3 }
  0xba   : > { %934 = vst [vmem:[%s1086_s12 + $0x60] sm:$0xff] %v906_v1   ;;  %v499_v8 = vmul.f32 %v1064_v26, %v419_v4  ;;  %v507_v9 = vmul.f32 %v1064_v26, %v439_v5 }
  0xbb   : > { %v550_v22 = vadd.f32 %v1070_v28, %v514_v12  ;;  %v558_v23 = vadd.f32 %v1070_v28, %v522_v13 }
  0xbc   : > { %v535_v10 = vadd.f32 %v1070_v28, %v499_v8  ;;  %v543_v11 = vadd.f32 %v1070_v28, %v507_v9 }
  0xbd   : > { %v582_v32 = vmax.f32 %v550_v22, 0.0  ;;  %v590_v33 = vmax.f32 %v558_v23, 0.0 }
  0xbe   : > { %v567_v16 = vmax.f32 %v535_v10, 0.0  ;;  %v575_v17 = vmax.f32 %v543_v11, 0.0 }
  0xc0   : > { %v851_v18 = vpack.c.bf16 %v567_v16, %v566_v14  ;;  %v871_v19 = vpack.c.bf16 %v575_v17, %v574_v15  ;;  %v459_v20 = vpop.f32.mrf.mxu2  ;;  %v479_v21 = vpop.f32.mrf.mxu3 }
  0xc1   : > { %v515_v24 = vmul.f32 %v1064_v26, %v459_v20  ;;  %v523_v25 = vmul.f32 %v1064_v26, %v479_v21  ;;  %v422_v27 = vpop.f32.mrf.mxu0  ;;  %v442_v29 = vpop.f32.mrf.mxu1 }
  0xc2   : > { %923 = vst [vmem:[%s1086_s12 + $0x8] sm:$0xff] %v851_v18   ;;  %v500_v36 = vmul.f32 %v1064_v26, %v422_v27  ;;  %v508_v37 = vmul.f32 %v1064_v26, %v442_v29 }
  0xc3   : > { %927 = vst [vmem:[%s1086_s12 + $0x28] sm:$0xff] %v871_v19   ;;  %v551_v30 = vadd.f32 %v1070_v28, %v515_v24  ;;  %v559_v31 = vadd.f32 %v1070_v28, %v523_v25 }
  0xc4   : > { %v536_v44 = vadd.f32 %v1070_v28, %v500_v36  ;;  %v544_v45 = vadd.f32 %v1070_v28, %v508_v37 }
  0xc5   : > { %v583_v34 = vmax.f32 %v551_v30, 0.0  ;;  %v591_v35 = vmax.f32 %v559_v31, 0.0 }
  0xc6   : > { %v568_v52 = vmax.f32 %v536_v44, 0.0  ;;  %v576_v53 = vmax.f32 %v544_v45, 0.0 }
  0xc7   : > { %v891_v38 = vpack.c.bf16 %v583_v34, %v582_v32  ;;  %v911_v39 = vpack.c.bf16 %v591_v35, %v590_v33 }
  0xc8   : > { %v462_v40 = vpop.f32.mrf.mxu2  ;;  %v482_v41 = vpop.f32.mrf.mxu3 }
  0xc9   : > { %931 = vst [vmem:[%s1086_s12 + $0x48] sm:$0xff] %v891_v38   ;;  %v424_v42 = vpop.f32.mrf.mxu0  ;;  %v444_v43 = vpop.f32.mrf.mxu1  ;;  %v516_v50 = vmul.f32 %v1064_v26, %v462_v40  ;;  %v524_v51 = vmul.f32 %v1064_v26, %v482_v41 }
  0xca   : > { %935 = vst [vmem:[%s1086_s12 + $0x68] sm:$0xff] %v911_v39   ;;  %v501_v46 = vmul.f32 %v1064_v26, %v424_v42  ;;  %v509_v47 = vmul.f32 %v1064_v26, %v444_v43 }
  0xcb   : > { %v552_v60 = vadd.f32 %v1070_v28, %v516_v50  ;;  %v560_v61 = vadd.f32 %v1070_v28, %v524_v51 }
  0xcc   : > { %v537_v48 = vadd.f32 %v1070_v28, %v501_v46  ;;  %v545_v49 = vadd.f32 %v1070_v28, %v509_v47 }
  0xcd   : > { %v584_v4 = vmax.f32 %v552_v60, 0.0  ;;  %v592_v5 = vmax.f32 %v560_v61, 0.0 }
  0xce   : > { %v569_v54 = vmax.f32 %v537_v48, 0.0  ;;  %v577_v55 = vmax.f32 %v545_v49, 0.0 }
  0xd0   : > { %v856_v56 = vpack.c.bf16 %v569_v54, %v568_v52  ;;  %v876_v57 = vpack.c.bf16 %v577_v55, %v576_v53  ;;  %v464_v58 = vpop.f32.mrf.mxu2  ;;  %v484_v59 = vpop.f32.mrf.mxu3 }
  0xd1   : > { %v517_v62 = vmul.f32 %v1064_v26, %v464_v58  ;;  %v525_v63 = vmul.f32 %v1064_v26, %v484_v59  ;;  %v427_v0 = vpop.f32.mrf.mxu0  ;;  %v447_v1 = vpop.f32.mrf.mxu1 }
  0xd2   : > { %924 = vst [vmem:[%s1086_s12 + $0x10] sm:$0xff] %v856_v56   ;;  %v502_v8 = vmul.f32 %v1064_v26, %v427_v0  ;;  %v510_v9 = vmul.f32 %v1064_v26, %v447_v1 }
  0xd3   : > { %928 = vst [vmem:[%s1086_s12 + $0x30] sm:$0xff] %v876_v57   ;;  %v553_v2 = vadd.f32 %v1070_v28, %v517_v62  ;;  %v561_v3 = vadd.f32 %v1070_v28, %v525_v63 }
  0xd4   : > { %v538_v16 = vadd.f32 %v1070_v28, %v502_v8  ;;  %v546_v17 = vadd.f32 %v1070_v28, %v510_v9 }
  0xd5   : > { %v585_v6 = vmax.f32 %v553_v2, 0.0  ;;  %v593_v7 = vmax.f32 %v561_v3, 0.0 }
  0xd6   : > { %v570_v24 = vmax.f32 %v538_v16, 0.0  ;;  %v578_v25 = vmax.f32 %v546_v17, 0.0 }
  0xd7   : > { %v896_v10 = vpack.c.bf16 %v585_v6, %v584_v4  ;;  %v916_v11 = vpack.c.bf16 %v593_v7, %v592_v5 }
  0xd8   : > { %v467_v12 = vpop.f32.mrf.mxu2  ;;  %v487_v13 = vpop.f32.mrf.mxu3 }
  0xd9   : > { %932 = vst [vmem:[%s1086_s12 + $0x50] sm:$0xff] %v896_v10   ;;  %v429_v14 = vpop.f32.mrf.mxu0  ;;  %v449_v15 = vpop.f32.mrf.mxu1  ;;  %v518_v22 = vmul.f32 %v1064_v26, %v467_v12  ;;  %v526_v23 = vmul.f32 %v1064_v26, %v487_v13 }
  0xda   : > { %936 = vst [vmem:[%s1086_s12 + $0x70] sm:$0xff] %v916_v11   ;;  %v503_v18 = vmul.f32 %v1064_v26, %v429_v14  ;;  %v511_v19 = vmul.f32 %v1064_v26, %v449_v15 }
  0xdb   : > { %v554_v34 = vadd.f32 %v1070_v28, %v518_v22  ;;  %v562_v35 = vadd.f32 %v1070_v28, %v526_v23 }
  0xdc   : > { %v539_v20 = vadd.f32 %v1070_v28, %v503_v18  ;;  %v547_v21 = vadd.f32 %v1070_v28, %v511_v19 }
  0xdd   : > { %v586_v40 = vmax.f32 %v554_v34, 0.0  ;;  %v594_v41 = vmax.f32 %v562_v35, 0.0 }
  0xde   : > { %v571_v27 = vmax.f32 %v539_v20, 0.0  ;;  %v579_v29 = vmax.f32 %v547_v21, 0.0 }
  0xe0   : > { %v861_v30 = vpack.c.bf16 %v571_v27, %v570_v24  ;;  %v881_v31 = vpack.c.bf16 %v579_v29, %v578_v25  ;;  %v469_v32 = vpop.f32.mrf.mxu2  ;;  %v489_v33 = vpop.f32.mrf.mxu3 }
  0xe1   : > { %v519_v36 = vmul.f32 %v1064_v26, %v469_v32  ;;  %v527_v37 = vmul.f32 %v1064_v26, %v489_v33 }
  0xe2   : > { %925 = vst [vmem:[%s1086_s12 + $0x18] sm:$0xff] %v861_v30  }
  0xe3   : > { %929 = vst [vmem:[%s1086_s12 + $0x38] sm:$0xff] %v881_v31   ;;  %v555_v38 = vadd.f32 %v1070_v28, %v519_v36  ;;  %v563_v39 = vadd.f32 %v1070_v28, %v527_v37 }
  0xe5   : > { %v587_v42 = vmax.f32 %v555_v38, 0.0  ;;  %v595_v43 = vmax.f32 %v563_v39, 0.0 }
  0xe7   : > { %v901_v44 = vpack.c.bf16 %v587_v42, %v586_v40  ;;  %v921_v45 = vpack.c.bf16 %v595_v43, %v594_v41 }
  0xe9   : > { %933 = vst [vmem:[%s1086_s12 + $0x58] sm:$0xff] %v901_v44  }
  0xea   : > { %937 = vst [vmem:[%s1086_s12 + $0x78] sm:$0xff] %v921_v45  }
  0xeb PF: > { %s14_s15 = sadd.s32 1, %s969_s15  }
  0xec   : > { %p11_p4 = scmp.ge.s32.totalorder %s14_s15, 4  }
  0xee   :  { %13 = sbr.rel (!%p11_p4) target bundleno = 1 (0x1), region = 66 }

// kernel: deep_gcn_forward.9
= control target key start
LH: loop header
LB: loop body
LE: loop exit
PB: predicated region body
PF: predicated region fallthrough
CT: control target
= control target key end

     0   :  { %s1285_s15 = smov 0   ;;  %s1513_s0 = inlined_call_operand.vmem [shape: bf16[512,144], index: 0, kind: input, shape index: {}]   ;;  %s1514_s1 = inlined_call_operand.vmem [shape: bf16[144,128], index: 1, kind: input, shape index: {}]   ;;  %s1515_s2 = inlined_call_operand.vmem [shape: f32[1,128], index: 2, kind: input, shape index: {}]   ;;  %s1516_s3 = inlined_call_operand.vmem [shape: f32[1,128], index: 3, kind: input, shape index: {}]   ;;  %s1517_s4 = inlined_call_operand.vmem [shape: bf16[512,128], index: 4, kind: output, shape index: {}]  }
   0x1 LB: > { %s904_s16 = sadd.s32 4294967295, %s1258_s15   ;;  %p908_p0 = scmp.ge.s32.totalorder %s1258_s15, 1  ;;  %s1258_s15 = sphi %s1285_s15, %s14_s15  }
   0x2   : > { %p164_p1 = scmp.lt.s32.totalorder %s1258_s15, 3 }
   0x4   : > { %p165_p2 = pnand %p908_p0, %p164_p1 }
   0x5   : > { %s909_s21 = sshll.u32 (!%p165_p2), %s904_s16, 5 }
   0x6   : > { %168 = sbr.rel (%p165_p2) target bundleno = 306 (0x132), region = 36  ;;  %p192_p3 = scmp.lt.s32.totalorder (!%p165_p2), %s909_s21, 63 }
   0xb   : > { %v1136_v0 = vld [vmem:[%s1514_s1 + $0x38] sm:$0xff]  ;;  %v1137_v1 = vld [vmem:[%s1514_s1 + $0x40] sm:$0xff]  ;;  %v1135_v2 = vld [vmem:[%s1514_s1 + $0x30] sm:$0xff]  ;;  %s1519_s21 = smov (!%p192_p3, %s909_s21), 63  ;;  %vm453_vm0 = vcmask 130048  }
   0xc   : > { %502 = vmatpush.bf16.msra.mxu0 %v1136_v0  ;;  %1233 = vmatpush.bf16.msra.mxu2 %v1136_v0  ;;  %s1096_s24 = sshll.u32 %s1519_s21, 3  ;;  %v1134_v3 = vld [vmem:[%s1514_s1 + $0x28] sm:$0xff]  ;;  %v1133_v7 = vld [vmem:[%s1514_s1 + $0x20] sm:$0xff]  ;;  %v1132_v11 = vld [vmem:[%s1514_s1 + $0x18] sm:$0xff]  ;;  %s913_s19 = sshll.u32 %s1519_s21, 2 }
   0xd   : > { %598 = vmatpush.bf16.msra.mxu1 %v1137_v1  ;;  %1241 = vmatpush.bf16.msra.mxu3 %v1137_v1  ;;  %s1308_s27 = scalar_lea.vmem %s1513_s0, %s1096_s24  ;;  %v1131_v12 = vld [vmem:[%s1514_s1 + $0x10] sm:$0xff]  ;;  %v1130_v16 = vld [vmem:[%s1514_s1 + $0x8] sm:$0xff]  ;;  %v1129_v20 = vld [vmem:[%s1514_s1] sm:$0xff]  ;;  %s1430_s23 = scalar_lea.vmem %s1517_s4, %s913_s19 }
   0xe   : > { %v1097_v4 = vld [vmem:[%s1308_s27 + $0x4] sm:$0xf]  ;;  %v918_v5 = vld [vmem:[%s1308_s27 + $0x8] sm:$0xf0]  ;;  %v1115_v8 = vld [vmem:[%s1308_s27 + $0x94] sm:$0xf] }
   0xf   : > { %v921_v6 = vor.u32 %v1097_v4, %v918_v5  ;;  %v990_v9 = vld [vmem:[%s1308_s27 + $0x98] sm:$0xf0]  ;;  %v1099_v13 = vld [vmem:[%s1308_s27 + $0x14] sm:$0xf]  ;;  %v1117_v17 = vld [vmem:[%s1308_s27 + $0xa4] sm:$0xf] }
  0x10   : > { %503 = vmatpush.bf16.msra.mxu0 %v1135_v2  ;;  %1234 = vmatpush.bf16.msra.mxu2 %v1135_v2  ;;  %v993_v10 = vor.u32 %v1115_v8, %v990_v9  ;;  %v926_v14 = vld [vmem:[%s1308_s27 + $0x18] sm:$0xf0]  ;;  %v998_v18 = vld [vmem:[%s1308_s27 + $0xa8] sm:$0xf0]  ;;  %v916_v21 = vld [vmem:[%s1308_s27] sm:$0xf] }
  0x11   : > { %1078 = vmatmul.msk.bf16.vlgmr.msra.gmra.mxu1 %vm453_vm0, %v921_v6  ;;  %v929_v15 = vor.u32 %v1099_v13, %v926_v14  ;;  %v1001_v19 = vor.u32 %v1117_v17, %v998_v18  ;;  %v1098_v22 = vld [vmem:[%s1308_s27 + $0x4] sm:$0xf0]  ;;  %v980_v23 = vld [vmem:[%s1308_s27 + $0x80] sm:$0xf]  ;;  %v1101_v27 = vld [vmem:[%s1308_s27 + $0x24] sm:$0xf] }
  0x12   : > { %1087 = vmatmul.msk.bf16.vlgmr.msra.gmra.mxu3 %vm453_vm0, %v993_v10  ;;  %v1114_v24 = vld [vmem:[%s1308_s27 + $0x84] sm:$0xf0]  ;;  %v917_v25 = vor.u32 %v1098_v22, %v916_v21  ;;  %v934_v28 = vld [vmem:[%s1308_s27 + $0x28] sm:$0xf0]  ;;  %v1119_v30 = vld [vmem:[%s1308_s27 + $0xb4] sm:$0xf] }
  0x13   : > { %v981_v26 = vor.u32 %v1114_v24, %v980_v23  ;;  %v937_v29 = vor.u32 %v1101_v27, %v934_v28  ;;  %v1006_v31 = vld [vmem:[%s1308_s27 + $0xb8] sm:$0xf0]  ;;  %v924_v33 = vld [vmem:[%s1308_s27 + $0x10] sm:$0xf]  ;;  %v1100_v34 = vld [vmem:[%s1308_s27 + $0x14] sm:$0xf0] }
  0x14   : > { %504 = vmatpush.bf16.msra.mxu0 %v1134_v3  ;;  %1235 = vmatpush.bf16.msra.mxu2 %v1134_v3  ;;  %v1009_v32 = vor.u32 %v1119_v30, %v1006_v31  ;;  %v988_v35 = vld [vmem:[%s1308_s27 + $0x90] sm:$0xf]  ;;  %v1116_v36 = vld [vmem:[%s1308_s27 + $0x94] sm:$0xf0]  ;;  %v925_v37 = vor.u32 %v1100_v34, %v924_v33  ;;  %v1103_v39 = vld [vmem:[%s1308_s27 + $0x34] sm:$0xf] }
  0x15   : > { %v989_v38 = vor.u32 %v1116_v36, %v988_v35  ;;  %v942_v40 = vld [vmem:[%s1308_s27 + $0x38] sm:$0xf0]  ;;  %v1121_v42 = vld [vmem:[%s1308_s27 + $0xc4] sm:$0xf]  ;;  %v1014_v43 = vld [vmem:[%s1308_s27 + $0xc8] sm:$0xf0] }
  0x16   : > { %v945_v41 = vor.u32 %v1103_v39, %v942_v40  ;;  %v1017_v44 = vor.u32 %v1121_v42, %v1014_v43  ;;  %v932_v45 = vld [vmem:[%s1308_s27 + $0x20] sm:$0xf]  ;;  %v1102_v46 = vld [vmem:[%s1308_s27 + $0x24] sm:$0xf0]  ;;  %v1105_v51 = vld [vmem:[%s1308_s27 + $0x44] sm:$0xf] }
  0x17   : > { %v996_v47 = vld [vmem:[%s1308_s27 + $0xa0] sm:$0xf]  ;;  %v1118_v48 = vld [vmem:[%s1308_s27 + $0xa4] sm:$0xf0]  ;;  %v933_v49 = vor.u32 %v1102_v46, %v932_v45  ;;  %v950_v52 = vld [vmem:[%s1308_s27 + $0x48] sm:$0xf0] }
  0x18   : > { %505 = vmatpush.bf16.msra.mxu0 %v1133_v7  ;;  %1236 = vmatpush.bf16.msra.mxu2 %v1133_v7  ;;  %v997_v50 = vor.u32 %v1118_v48, %v996_v47  ;;  %v953_v53 = vor.u32 %v1105_v51, %v950_v52  ;;  %v1123_v54 = vld [vmem:[%s1308_s27 + $0xd4] sm:$0xf]  ;;  %v1022_v55 = vld [vmem:[%s1308_s27 + $0xd8] sm:$0xf0]  ;;  %v940_v57 = vld [vmem:[%s1308_s27 + $0x30] sm:$0xf] }
  0x19   : > { %v1025_v56 = vor.u32 %v1123_v54, %v1022_v55  ;;  %v1104_v58 = vld [vmem:[%s1308_s27 + $0x34] sm:$0xf0]  ;;  %v1004_v59 = vld [vmem:[%s1308_s27 + $0xb0] sm:$0xf]  ;;  %v1107_v63 = vld [vmem:[%s1308_s27 + $0x54] sm:$0xf] }
  0x1a   : > { %v1120_v60 = vld [vmem:[%s1308_s27 + $0xb4] sm:$0xf0]  ;;  %v941_v61 = vor.u32 %v1104_v58, %v940_v57  ;;  %v958_v0 = vld [vmem:[%s1308_s27 + $0x58] sm:$0xf0]  ;;  %v1125_v2 = vld [vmem:[%s1308_s27 + $0xe4] sm:$0xf] }
  0x1b   : > { %v1005_v62 = vor.u32 %v1120_v60, %v1004_v59  ;;  %v961_v1 = vor.u32 %v1107_v63, %v958_v0  ;;  %v1030_v3 = vld [vmem:[%s1308_s27 + $0xe8] sm:$0xf0]  ;;  %v948_v5 = vld [vmem:[%s1308_s27 + $0x40] sm:$0xf]  ;;  %v1106_v6 = vld [vmem:[%s1308_s27 + $0x44] sm:$0xf0] }
  0x1c   : > { %506 = vmatpush.bf16.msra.mxu0 %v1132_v11  ;;  %1237 = vmatpush.bf16.msra.mxu2 %v1132_v11  ;;  %v1033_v4 = vor.u32 %v1125_v2, %v1030_v3  ;;  %v1012_v7 = vld [vmem:[%s1308_s27 + $0xc0] sm:$0xf]  ;;  %v1122_v8 = vld [vmem:[%s1308_s27 + $0xc4] sm:$0xf0]  ;;  %v949_v9 = vor.u32 %v1106_v6, %v948_v5  ;;  %v1109_v11 = vld [vmem:[%s1308_s27 + $0x64] sm:$0xf] }
  0x1d   : > { %v1013_v10 = vor.u32 %v1122_v8, %v1012_v7  ;;  %v1127_v14 = vld [vmem:[%s1308_s27 + $0xf4] sm:$0xf]  ;;  %v956_v17 = vld [vmem:[%s1308_s27 + $0x50] sm:$0xf]  ;;  %v1108_v18 = vld [vmem:[%s1308_s27 + $0x54] sm:$0xf0] }
  0x1e   : > { %v957_v21 = vor.u32 %v1108_v18, %v956_v17  ;;  %v1111_v23 = vld [vmem:[%s1308_s27 + $0x74] sm:$0xf]  ;;  %v974_v24 = vld [vmem:[%s1308_s27 + $0x78] sm:$0xf0]  ;;  %v1110_v27 = vld [vmem:[%s1308_s27 + $0x64] sm:$0xf0] }
  0x1f   : > { %v1028_v28 = vld [vmem:[%s1308_s27 + $0xe0] sm:$0xf]  ;;  %v982_v33 = vld [vmem:[%s1308_s27 + $0x88] sm:$0xf0]  ;;  %v972_v36 = vld [vmem:[%s1308_s27 + $0x70] sm:$0xf] }
  0x20   : > { %507 = vmatpush.bf16.msra.mxu0 %v1131_v12  ;;  %1238 = vmatpush.bf16.msra.mxu2 %v1131_v12  ;;  %v966_v12 = vld [vmem:[%s1308_s27 + $0x68] sm:$0xf0]  ;;  %v1128_v39 = vld [vmem:[%s1308_s27 + $0xf4] sm:$0xf0]  ;;  %v1411_v48 = vld [vmem:[%s1515_s2] ss:$0 sm:$0xff] }
  0x21   : > { %1079 = vmatmul.msk.bf16.gmra.mxu1 %vm453_vm0, %v929_v15  ;;  %v969_v13 = vor.u32 %v1109_v11, %v966_v12  ;;  %v1038_v15 = vld [vmem:[%s1308_s27 + $0xf8] sm:$0xf0] }
  0x22   : > { %1088 = vmatmul.msk.bf16.gmra.mxu3 %vm453_vm0, %v1001_v19  ;;  %v1020_v19 = vld [vmem:[%s1308_s27 + $0xd0] sm:$0xf] }
  0x24   : > { %508 = vmatpush.bf16.msra.mxu0 %v1130_v16  ;;  %1239 = vmatpush.bf16.msra.mxu2 %v1130_v16  ;;  %v1041_v16 = vor.u32 %v1127_v14, %v1038_v15 }
  0x28   : > { %509 = vmatpush.bf16.msra.mxu0 %v1129_v20  ;;  %1240 = vmatpush.bf16.msra.mxu2 %v1129_v20  ;;  %v1124_v20 = vld [vmem:[%s1308_s27 + $0xd4] sm:$0xf0] }
  0x29   : > { %v1021_v22 = vor.u32 %v1124_v20, %v1020_v19 }
  0x2b   : > { %510 = vmatmul.bf16.vlgmr.msra.gmra.mxu0 %v917_v25  ;;  %550 = vmatmul.bf16.vlgmr.msra.gmra.mxu2 %v981_v26  ;;  %v977_v25 = vor.u32 %v1111_v23, %v974_v24  ;;  %v964_v26 = vld [vmem:[%s1308_s27 + $0x60] sm:$0xf] }
  0x2c   : > { %v965_v30 = vor.u32 %v1110_v27, %v964_v26 }
  0x31   : > { %1080 = vmatmul.msk.bf16.gmra.mxu1 %vm453_vm0, %v937_v29  ;;  %v1126_v29 = vld [vmem:[%s1308_s27 + $0xe4] sm:$0xf0] }
  0x32   : > { %1089 = vmatmul.msk.bf16.gmra.mxu3 %vm453_vm0, %v1009_v32  ;;  %v1029_v31 = vor.u32 %v1126_v29, %v1028_v28  ;;  %v1113_v32 = vld [vmem:[%s1308_s27 + $0x84] sm:$0xf] }
  0x33   : > { %v985_v34 = vor.u32 %v1113_v32, %v982_v33 }
  0x3b   : > { %515 = vmatmul.bf16.gmra.mxu0 %v925_v37  ;;  %555 = vmatmul.bf16.gmra.mxu2 %v989_v38  ;;  %v1112_v37 = vld [vmem:[%s1308_s27 + $0x74] sm:$0xf0]  ;;  %v1036_v38 = vld [vmem:[%s1308_s27 + $0xf0] sm:$0xf] }
  0x3c   : > { %v973_v40 = vor.u32 %v1112_v37, %v972_v36 }
  0x41   : > { %1081 = vmatmul.msk.bf16.gmra.mxu1 %vm453_vm0, %v945_v41  ;;  %v1037_v41 = vor.u32 %v1128_v39, %v1036_v38 }
  0x42   : > { %1090 = vmatmul.msk.bf16.gmra.mxu3 %vm453_vm0, %v1017_v44 }
  0x4b   : > { %520 = vmatmul.bf16.gmra.mxu0 %v933_v49  ;;  %560 = vmatmul.bf16.gmra.mxu2 %v997_v50  ;;  %v1417_v50 = vld [vmem:[%s1516_s3] ss:$0 sm:$0xff] }
  0x51   : > { %1082 = vmatmul.msk.bf16.gmra.mxu1 %vm453_vm0, %v953_v53 }
  0x52   : > { %1091 = vmatmul.msk.bf16.gmra.mxu3 %vm453_vm0, %v1025_v56 }
  0x5b   : > { %525 = vmatmul.bf16.gmra.mxu0 %v941_v61  ;;  %565 = vmatmul.bf16.gmra.mxu2 %v1005_v62 }
  0x61   : > { %1083 = vmatmul.msk.bf16.gmra.mxu1 %vm453_vm0, %v961_v1 }
  0x62   : > { %1092 = vmatmul.msk.bf16.gmra.mxu3 %vm453_vm0, %v1033_v4 }
  0x6b   : > { %530 = vmatmul.bf16.gmra.mxu0 %v949_v9  ;;  %570 = vmatmul.bf16.gmra.mxu2 %v1013_v10 }
  0x71   : > { %1084 = vmatmul.msk.bf16.gmra.mxu1 %vm453_vm0, %v969_v13 }
  0x72   : > { %1093 = vmatmul.msk.bf16.gmra.mxu3 %vm453_vm0, %v1041_v16 }
  0x7b   : > { %535 = vmatmul.bf16.gmra.mxu0 %v957_v21  ;;  %575 = vmatmul.bf16.gmra.mxu2 %v1021_v22 }
  0x81   : > { %1085 = vmatmul.msk.bf16.gmra.mxu1 %vm453_vm0, %v977_v25 }
  0x8b   : > { %540 = vmatmul.bf16.gmra.mxu0 %v965_v30  ;;  %580 = vmatmul.bf16.gmra.mxu2 %v1029_v31 }
  0x8e   : > { %v600_v35 = vpop.f32.mrf.mxu1 }
  0x91   : > { %1086 = vmatmul.msk.bf16.gmra.mxu1 %vm453_vm0, %v985_v34 }
  0x95   : > { %v645_v44 = vpop.f32.mrf.mxu3 }
  0x96   : > { %v602_v42 = vpop.f32.mrf.mxu1 }
  0x9b   : > { %545 = vmatmul.bf16.gmra.mxu0 %v973_v40  ;;  %585 = vmatmul.bf16.gmra.mxu2 %v1037_v41 }
  0x9d   : > { %v647_v52 = vpop.f32.mrf.mxu3 }
  0x9e   : > { %v605_v43 = vpop.f32.mrf.mxu1 }
  0xa5   : > { %v650_v1 = vpop.f32.mrf.mxu3 }
  0xa6   : > { %v607_v46 = vpop.f32.mrf.mxu1 }
  0xa8   : > { %v511_v45 = vpop.f32.mrf.mxu0 }
  0xa9   : > { %v601_v47 = vadd.f32 %v600_v35, %v511_v45 }
  0xab   : > { %v684_v49 = vmul.f32 %v1411_v48, %v601_v47 }
  0xad   : > { %v720_v56 = vadd.f32 %v1417_v50, %v684_v49  ;;  %v652_v11 = vpop.f32.mrf.mxu3 }
  0xae   : > { %v1419_v51 = vpop.f32.mrf.mxu2  ;;  %v610_v55 = vpop.f32.mrf.mxu1 }
  0xaf   : > { %v752_v59 = vmax.f32 %v720_v56, 0.0 }
  0xb0   : > { %v513_v53 = vpop.f32.mrf.mxu0 }
  0xb1   : > { %v603_v54 = vadd.f32 %v602_v42, %v513_v53 }
  0xb3   : > { %v685_v57 = vmul.f32 %v1411_v48, %v603_v54 }
  0xb5   : > { %v721_v58 = vadd.f32 %v1417_v50, %v685_v57  ;;  %v655_v25 = vpop.f32.mrf.mxu3 }
  0xb6   : > { %v1425_v61 = vpop.f32.mrf.mxu2  ;;  %v612_v0 = vpop.f32.mrf.mxu1 }
  0xb7   : > { %v753_v60 = vmax.f32 %v721_v58, 0.0 }
  0xb8   : > { %v516_v62 = vpop.f32.mrf.mxu0 }
  0xb9   : > { %v1141_v63 = vpack.c.bf16 %v753_v60, %v752_v59  ;;  %v606_v2 = vadd.f32 %v605_v43, %v516_v62 }
  0xbb   : > { %1142 = vst [vmem:[%s1430_s23] sm:$0xff] %v1141_v63   ;;  %v686_v3 = vmul.f32 %v1411_v48, %v606_v2 }
  0xbd   : > { %v722_v9 = vadd.f32 %v1417_v50, %v686_v3  ;;  %v657_v42 = vpop.f32.mrf.mxu3 }
  0xbe   : > { %v556_v4 = vpop.f32.mrf.mxu2  ;;  %v615_v7 = vpop.f32.mrf.mxu1 }
  0xbf   : > { %v646_v8 = vadd.f32 %v645_v44, %v556_v4  ;;  %v754_v14 = vmax.f32 %v722_v9, 0.0 }
  0xc0   : > { %v518_v5 = vpop.f32.mrf.mxu0 }
  0xc1   : > { %v608_v6 = vadd.f32 %v607_v46, %v518_v5  ;;  %v702_v13 = vmul.f32 %v1411_v48, %v646_v8 }
  0xc3   : > { %v687_v10 = vmul.f32 %v1411_v48, %v608_v6  ;;  %v738_v21 = vadd.f32 %v1417_v50, %v702_v13 }
  0xc5   : > { %v723_v12 = vadd.f32 %v1417_v50, %v687_v10  ;;  %v770_v26 = vmax.f32 %v738_v21, 0.0  ;;  %v660_v63 = vpop.f32.mrf.mxu3 }
  0xc6   : > { %v558_v16 = vpop.f32.mrf.mxu2  ;;  %v617_v20 = vpop.f32.mrf.mxu1 }
  0xc7   : > { %v755_v15 = vmax.f32 %v723_v12, 0.0  ;;  %v648_v17 = vadd.f32 %v647_v52, %v558_v16 }
  0xc8   : > { %v521_v18 = vpop.f32.mrf.mxu0 }
  0xc9   : > { %v1146_v19 = vpack.c.bf16 %v755_v15, %v754_v14  ;;  %v703_v22 = vmul.f32 %v1411_v48, %v648_v17  ;;  %v611_v23 = vadd.f32 %v610_v55, %v521_v18 }
  0xcb   : > { %1218 = vst [vmem:[%s1430_s23 + $0x8] sm:$0xff] %v1146_v19   ;;  %v739_v24 = vadd.f32 %v1417_v50, %v703_v22  ;;  %v688_v28 = vmul.f32 %v1411_v48, %v611_v23 }
  0xcd   : > { %v771_v27 = vmax.f32 %v739_v24, 0.0  ;;  %v724_v35 = vadd.f32 %v1417_v50, %v688_v28  ;;  %v662_v15 = vpop.f32.mrf.mxu3 }
  0xce   : > { %v561_v29 = vpop.f32.mrf.mxu2  ;;  %v620_v33 = vpop.f32.mrf.mxu1 }
  0xcf   : > { %v1186_v30 = vpack.c.bf16 %v771_v27, %v770_v26  ;;  %v651_v34 = vadd.f32 %v650_v1, %v561_v29  ;;  %v756_v39 = vmax.f32 %v724_v35, 0.0 }
  0xd0   : > { %v523_v31 = vpop.f32.mrf.mxu0 }
  0xd1   : > { %v613_v32 = vadd.f32 %v612_v0, %v523_v31  ;;  %1226 = vst [vmem:[%s1430_s23 + $0x48] sm:$0xff] %v1186_v30   ;;  %v704_v38 = vmul.f32 %v1411_v48, %v651_v34 }
  0xd3   : > { %v689_v36 = vmul.f32 %v1411_v48, %v613_v32  ;;  %v740_v47 = vadd.f32 %v1417_v50, %v704_v38 }
  0xd5   : > { %v725_v37 = vadd.f32 %v1417_v50, %v689_v36  ;;  %v772_v54 = vmax.f32 %v740_v47, 0.0  ;;  %v665_v29 = vpop.f32.mrf.mxu3 }
  0xd6   : > { %v563_v41 = vpop.f32.mrf.mxu2  ;;  %v622_v46 = vpop.f32.mrf.mxu1 }
  0xd7   : > { %v757_v40 = vmax.f32 %v725_v37, 0.0  ;;  %v653_v43 = vadd.f32 %v652_v11, %v563_v41 }
  0xd8   : > { %v526_v44 = vpop.f32.mrf.mxu0 }
  0xd9   : > { %v1151_v45 = vpack.c.bf16 %v757_v40, %v756_v39  ;;  %v705_v49 = vmul.f32 %v1411_v48, %v653_v43  ;;  %v616_v52 = vadd.f32 %v615_v7, %v526_v44 }
  0xdb   : > { %1219 = vst [vmem:[%s1430_s23 + $0x10] sm:$0xff] %v1151_v45   ;;  %v741_v53 = vadd.f32 %v1417_v50, %v705_v49  ;;  %v690_v56 = vmul.f32 %v1411_v48, %v616_v52 }
  0xdd   : > { %v773_v55 = vmax.f32 %v741_v53, 0.0  ;;  %v726_v1 = vadd.f32 %v1417_v50, %v690_v56 }
  0xde   : > { %v566_v57 = vpop.f32.mrf.mxu2  ;;  %v625_v62 = vpop.f32.mrf.mxu1 }
  0xdf   : > { %v1191_v58 = vpack.c.bf16 %v773_v55, %v772_v54  ;;  %v656_v0 = vadd.f32 %v655_v25, %v566_v57  ;;  %v758_v5 = vmax.f32 %v726_v1, 0.0 }
  0xe0   : > { %v528_v59 = vpop.f32.mrf.mxu0 }
  0xe1   : > { %v618_v60 = vadd.f32 %v617_v20, %v528_v59  ;;  %1227 = vst [vmem:[%s1430_s23 + $0x50] sm:$0xff] %v1191_v58   ;;  %v706_v4 = vmul.f32 %v1411_v48, %v656_v0 }
  0xe3   : > { %v691_v2 = vmul.f32 %v1411_v48, %v618_v60  ;;  %v742_v12 = vadd.f32 %v1417_v50, %v706_v4 }
  0xe5   : > { %v727_v3 = vadd.f32 %v1417_v50, %v691_v2  ;;  %v774_v17 = vmax.f32 %v742_v12, 0.0 }
  0xe6   : > { %v568_v7 = vpop.f32.mrf.mxu2  ;;  %v627_v11 = vpop.f32.mrf.mxu1 }
  0xe7   : > { %v759_v6 = vmax.f32 %v727_v3, 0.0  ;;  %v658_v8 = vadd.f32 %v657_v42, %v568_v7 }
  0xe8   : > { %v531_v9 = vpop.f32.mrf.mxu0 }
  0xe9   : > { %v1156_v10 = vpack.c.bf16 %v759_v6, %v758_v5  ;;  %v707_v13 = vmul.f32 %v1411_v48, %v658_v8  ;;  %v621_v14 = vadd.f32 %v620_v33, %v531_v9 }
  0xeb   : > { %1220 = vst [vmem:[%s1430_s23 + $0x18] sm:$0xff] %v1156_v10   ;;  %v743_v16 = vadd.f32 %v1417_v50, %v707_v13  ;;  %v692_v19 = vmul.f32 %v1411_v48, %v621_v14 }
  0xed   : > { %v775_v18 = vmax.f32 %v743_v16, 0.0  ;;  %v728_v26 = vadd.f32 %v1417_v50, %v692_v19 }
  0xee   : > { %v571_v20 = vpop.f32.mrf.mxu2  ;;  %v630_v24 = vpop.f32.mrf.mxu1 }
  0xef   : > { %v1196_v21 = vpack.c.bf16 %v775_v18, %v774_v17  ;;  %v661_v25 = vadd.f32 %v660_v63, %v571_v20  ;;  %v760_v31 = vmax.f32 %v728_v26, 0.0 }
  0xf0   : > { %v533_v22 = vpop.f32.mrf.mxu0 }
  0xf1   : > { %v623_v23 = vadd.f32 %v622_v46, %v533_v22  ;;  %1228 = vst [vmem:[%s1430_s23 + $0x58] sm:$0xff] %v1196_v21   ;;  %v708_v30 = vmul.f32 %v1411_v48, %v661_v25  ;;  %v667_v46 = vpop.f32.mrf.mxu3 }
  0xf3   : > { %v693_v27 = vmul.f32 %v1411_v48, %v623_v23  ;;  %v744_v38 = vadd.f32 %v1417_v50, %v708_v30 }
  0xf5   : > { %v729_v28 = vadd.f32 %v1417_v50, %v693_v27  ;;  %v776_v42 = vmax.f32 %v744_v38, 0.0 }
  0xf6   : > { %v573_v33 = vpop.f32.mrf.mxu2  ;;  %v632_v37 = vpop.f32.mrf.mxu1 }
  0xf7   : > { %v761_v32 = vmax.f32 %v729_v28, 0.0  ;;  %v663_v34 = vadd.f32 %v662_v15, %v573_v33 }
  0xf8   : > { %v536_v35 = vpop.f32.mrf.mxu0 }
  0xf9   : > { %v1161_v36 = vpack.c.bf16 %v761_v32, %v760_v31  ;;  %v709_v39 = vmul.f32 %v1411_v48, %v663_v34  ;;  %v626_v40 = vadd.f32 %v625_v62, %v536_v35  ;;  %v670_v2 = vpop.f32.mrf.mxu3 }
  0xfb   : > { %1221 = vst [vmem:[%s1430_s23 + $0x20] sm:$0xff] %v1161_v36   ;;  %v745_v41 = vadd.f32 %v1417_v50, %v709_v39  ;;  %v694_v44 = vmul.f32 %v1411_v48, %v626_v40 }
  0xfd   : > { %v777_v43 = vmax.f32 %v745_v41, 0.0  ;;  %v730_v55 = vadd.f32 %v1417_v50, %v694_v44 }
  0xfe   : > { %v576_v45 = vpop.f32.mrf.mxu2  ;;  %v635_v53 = vpop.f32.mrf.mxu1 }
  0xff   : > { %v1201_v47 = vpack.c.bf16 %v777_v43, %v776_v42  ;;  %v666_v54 = vadd.f32 %v665_v29, %v576_v45  ;;  %v762_v59 = vmax.f32 %v730_v55, 0.0 }
 0x100   : > { %v538_v49 = vpop.f32.mrf.mxu0 }
 0x101   : > { %v628_v52 = vadd.f32 %v627_v11, %v538_v49  ;;  %1229 = vst [vmem:[%s1430_s23 + $0x60] sm:$0xff] %v1201_v47   ;;  %v710_v58 = vmul.f32 %v1411_v48, %v666_v54  ;;  %v672_v18 = vpop.f32.mrf.mxu3 }
 0x103   : > { %v695_v56 = vmul.f32 %v1411_v48, %v628_v52  ;;  %v746_v4 = vadd.f32 %v1417_v50, %v710_v58 }
 0x105   : > { %v731_v57 = vadd.f32 %v1417_v50, %v695_v56  ;;  %v778_v8 = vmax.f32 %v746_v4, 0.0 }
 0x106   : > { %v578_v62 = vpop.f32.mrf.mxu2  ;;  %v637_v3 = vpop.f32.mrf.mxu1 }
 0x107   : > { %v763_v60 = vmax.f32 %v731_v57, 0.0  ;;  %v668_v63 = vadd.f32 %v667_v46, %v578_v62 }
 0x108   : > { %v541_v0 = vpop.f32.mrf.mxu0 }
 0x109   : > { %v1166_v1 = vpack.c.bf16 %v763_v60, %v762_v59  ;;  %v711_v5 = vmul.f32 %v1411_v48, %v668_v63  ;;  %v631_v6 = vadd.f32 %v630_v24, %v541_v0 }
 0x10b   : > { %1222 = vst [vmem:[%s1430_s23 + $0x28] sm:$0xff] %v1166_v1   ;;  %v747_v7 = vadd.f32 %v1417_v50, %v711_v5  ;;  %v696_v10 = vmul.f32 %v1411_v48, %v631_v6 }
 0x10d   : > { %v779_v9 = vmax.f32 %v747_v7, 0.0  ;;  %v732_v17 = vadd.f32 %v1417_v50, %v696_v10 }
 0x10e   : > { %v581_v11 = vpop.f32.mrf.mxu2  ;;  %v640_v15 = vpop.f32.mrf.mxu1 }
 0x10f   : > { %v1206_v12 = vpack.c.bf16 %v779_v9, %v778_v8  ;;  %v671_v16 = vadd.f32 %v670_v2, %v581_v11  ;;  %v641_v20 = vadd.f32 %v640_v15, %v1419_v51  ;;  %v764_v23 = vmax.f32 %v732_v17, 0.0 }
 0x110   : > { %v543_v13 = vpop.f32.mrf.mxu0 }
 0x111   : > { %v633_v14 = vadd.f32 %v632_v37, %v543_v13  ;;  %1230 = vst [vmem:[%s1430_s23 + $0x68] sm:$0xff] %v1206_v12   ;;  %v712_v22 = vmul.f32 %v1411_v48, %v671_v16  ;;  %v700_v26 = vmul.f32 %v1411_v48, %v641_v20  ;;  %v675_v37 = vpop.f32.mrf.mxu3 }
 0x113   : > { %v697_v19 = vmul.f32 %v1411_v48, %v633_v14  ;;  %v748_v31 = vadd.f32 %v1417_v50, %v712_v22  ;;  %v736_v34 = vadd.f32 %v1417_v50, %v700_v26 }
 0x115   : > { %v733_v21 = vadd.f32 %v1417_v50, %v697_v19  ;;  %v780_v38 = vmax.f32 %v748_v31, 0.0  ;;  %v768_v43 = vmax.f32 %v736_v34, 0.0 }
 0x116   : > { %v583_v25 = vpop.f32.mrf.mxu2  ;;  %v642_v30 = vpop.f32.mrf.mxu1 }
 0x117   : > { %v765_v24 = vmax.f32 %v733_v21, 0.0  ;;  %v673_v27 = vadd.f32 %v672_v18, %v583_v25  ;;  %v643_v33 = vadd.f32 %v642_v30, %v1425_v61 }
 0x118   : > { %v546_v28 = vpop.f32.mrf.mxu0 }
 0x119   : > { %v1171_v29 = vpack.c.bf16 %v765_v24, %v764_v23  ;;  %v713_v32 = vmul.f32 %v1411_v48, %v673_v27  ;;  %v636_v51 = vadd.f32 %v635_v53, %v546_v28  ;;  %v701_v36 = vmul.f32 %v1411_v48, %v643_v33  ;;  %v677_v57 = vpop.f32.mrf.mxu3 }
 0x11b   : > { %1223 = vst [vmem:[%s1430_s23 + $0x30] sm:$0xff] %v1171_v29   ;;  %v749_v35 = vadd.f32 %v1417_v50, %v713_v32  ;;  %v737_v40 = vadd.f32 %v1417_v50, %v701_v36  ;;  %v698_v41 = vmul.f32 %v1411_v48, %v636_v51 }
 0x11d   : > { %v781_v39 = vmax.f32 %v749_v35, 0.0  ;;  %v769_v44 = vmax.f32 %v737_v40, 0.0  ;;  %v734_v52 = vadd.f32 %v1417_v50, %v698_v41 }
 0x11e   : > { %v586_v42 = vpop.f32.mrf.mxu2 }
 0x11f   : > { %v1211_v61 = vpack.c.bf16 %v781_v39, %v780_v38  ;;  %v1181_v47 = vpack.c.bf16 %v769_v44, %v768_v43  ;;  %v676_v49 = vadd.f32 %v675_v37, %v586_v42  ;;  %v766_v56 = vmax.f32 %v734_v52, 0.0 }
 0x120   : > { %v548_v45 = vpop.f32.mrf.mxu0 }
 0x121   : > { %v638_v46 = vadd.f32 %v637_v3, %v548_v45  ;;  %1231 = vst [vmem:[%s1430_s23 + $0x70] sm:$0xff] %v1211_v61   ;;  %v714_v55 = vmul.f32 %v1411_v48, %v676_v49 }
 0x122   : > { %1225 = vst [vmem:[%s1430_s23 + $0x40] sm:$0xff] %v1181_v47  }
 0x123   : > { %v699_v53 = vmul.f32 %v1411_v48, %v638_v46  ;;  %v750_v63 = vadd.f32 %v1417_v50, %v714_v55 }
 0x125   : > { %v735_v54 = vadd.f32 %v1417_v50, %v699_v53  ;;  %v782_v2 = vmax.f32 %v750_v63, 0.0 }
 0x126   : > { %v588_v59 = vpop.f32.mrf.mxu2 }
 0x127   : > { %v767_v58 = vmax.f32 %v735_v54, 0.0  ;;  %v678_v60 = vadd.f32 %v677_v57, %v588_v59 }
 0x129   : > { %v1176_v62 = vpack.c.bf16 %v767_v58, %v766_v56  ;;  %v715_v0 = vmul.f32 %v1411_v48, %v678_v60 }
 0x12b   : > { %1224 = vst [vmem:[%s1430_s23 + $0x38] sm:$0xff] %v1176_v62   ;;  %v751_v1 = vadd.f32 %v1417_v50, %v715_v0 }
 0x12d   : > { %v783_v3 = vmax.f32 %v751_v1, 0.0 }
 0x12f   : > { %v1216_v4 = vpack.c.bf16 %v783_v3, %v782_v2 }
 0x131   : > { %1232 = vst [vmem:[%s1430_s23 + $0x78] sm:$0xff] %v1216_v4  }
 0x132 PF: > { %s14_s15 = sadd.s32 1, %s1258_s15  }
 0x133   : > { %p11_p4 = scmp.ge.s32.totalorder %s14_s15, 4  }
 0x135   :  { %13 = sbr.rel (!%p11_p4) target bundleno = 1 (0x1), region = 66 }

// kernel: deep_gcn_forward.10
= control target key start
LH: loop header
LB: loop body
LE: loop exit
PB: predicated region body
PF: predicated region fallthrough
CT: control target
= control target key end

     0   :  { %s1771_s18 = smov 0   ;;  %s2196_s0 = inlined_call_operand.vmem [shape: bf16[512,288], index: 0, kind: input, shape index: {}]   ;;  %s2197_s1 = inlined_call_operand.vmem [shape: bf16[288,128], index: 1, kind: input, shape index: {}]   ;;  %s2198_s2 = inlined_call_operand.vmem [shape: f32[1,128], index: 2, kind: input, shape index: {}]   ;;  %s2199_s3 = inlined_call_operand.vmem [shape: f32[1,128], index: 3, kind: input, shape index: {}]   ;;  %s2200_s4 = inlined_call_operand.vmem [shape: f32[256,128], index: 4, kind: input, shape index: {}]   ;;  %s2201_s5 = inlined_call_operand.vmem [shape: bf16[512,128], index: 5, kind: output, shape index: {}]  }
   0x1 LB: > { %s1252_s19 = sadd.s32 4294967295, %s1739_s18   ;;  %p1256_p0 = scmp.ge.s32.totalorder %s1739_s18, 1  ;;  %s1739_s18 = sphi %s1771_s18, %s15_s18  }
   0x2   : > { %p189_p1 = scmp.lt.s32.totalorder %s1739_s18, 3 }
   0x4   : > { %p190_p2 = pnand %p1256_p0, %p189_p1 }
   0x5   : > { %s1257_s26 = sshll.u32 (!%p190_p2), %s1252_s19, 5 }
   0x6   : > { %193 = sbr.rel (%p190_p2) target bundleno = 380 (0x17c), region = 40  ;;  %p219_p3 = scmp.lt.s32.totalorder (!%p190_p2), %s1257_s26, 63 }
   0xb   : > { %v1598_v0 = vld [vmem:[%s2197_s1 + $0x38] sm:$0xff]  ;;  %v1790_v2 = vld [vmem:[%s2197_s1 + $0x88] sm:$0xff]  ;;  %v1597_v3 = vld [vmem:[%s2197_s1 + $0x30] sm:$0xff]  ;;  %s2203_s26 = smov (!%p219_p3, %s1257_s26), 63  ;;  %vm680_vm0 = vcmask 261120  }
   0xc   : > { %v1785_v1 = vld [vmem:[%s2197_s1 + $0x78] sm:$0xff]  ;;  %729 = vmatpush.bf16.msra.mxu0 %v1598_v0  ;;  %1704 = vmatpush.bf16.msra.mxu3 %v1598_v0  ;;  %v1605_v4 = vld [vmem:[%s2197_s1 + $0x70] sm:$0xff]  ;;  %v1803_v5 = vld [vmem:[%s2197_s1 + $0x80] sm:$0xff]  ;;  %s1722_s8 = smul.u32 12, %s2203_s26  ;;  %s1260_s23 = sshll.u32 %s2203_s26, 2 }
   0xd   : > { %818 = vmatpush.bf16.msra.mxu1 %v1785_v1  ;;  %913 = vmatpush.bf16.msra.mxu2 %v1790_v2  ;;  %v1596_v6 = vld [vmem:[%s2197_s1 + $0x28] sm:$0xff]  ;;  %v1595_v11 = vld [vmem:[%s2197_s1 + $0x20] sm:$0xff]  ;;  %v1594_v13 = vld [vmem:[%s2197_s1 + $0x18] sm:$0xff]  ;;  %s1975_s27 = scalar_lea.vmem %s2201_s5, %s1260_s23 }
   0xe   : > { %v1604_v7 = vld [vmem:[%s2197_s1 + $0x68] sm:$0xff]  ;;  %s1818_s15 = scalar_lea.vmem %s2196_s0, %s1722_s8  ;;  %v1603_v12 = vld [vmem:[%s2197_s1 + $0x60] sm:$0xff]  ;;  %v1602_v14 = vld [vmem:[%s2197_s1 + $0x58] sm:$0xff] }
   0xf   : > { %v1271_v8 = vld [vmem:[%s1818_s15 + $0x8] sm:$0xf]  ;;  %v1545_v9 = vld [vmem:[%s1818_s15 + $0x10] sm:$0xf0]  ;;  %v1283_v17 = vld [vmem:[%s1818_s15 + $0x20] sm:$0xf] }
  0x10   : > { %730 = vmatpush.bf16.msra.mxu0 %v1597_v3  ;;  %1705 = vmatpush.bf16.msra.mxu3 %v1597_v3  ;;  %v1272_v10 = vor.u32 %v1545_v9, %v1271_v8  ;;  %v1593_v15 = vld [vmem:[%s2197_s1 + $0x10] sm:$0xff]  ;;  %v1548_v18 = vld [vmem:[%s1818_s15 + $0x28] sm:$0xf0]  ;;  %v1591_v22 = vld [vmem:[%s2197_s1] sm:$0xff] }
  0x11   : > { %819 = vmatpush.bf16.msra.mxu1 %v1605_v4  ;;  %914 = vmatpush.bf16.msra.mxu2 %v1803_v5  ;;  %v1601_v16 = vld [vmem:[%s2197_s1 + $0x50] sm:$0xff]  ;;  %v1592_v19 = vld [vmem:[%s2197_s1 + $0x8] sm:$0xff]  ;;  %v1284_v21 = vor.u32 %v1548_v18, %v1283_v17  ;;  %v1263_v23 = vld [vmem:[%s1818_s15] sm:$0xf] }
  0x12   : > { %v1600_v20 = vld [vmem:[%s2197_s1 + $0x48] sm:$0xff]  ;;  %v1407_v25 = vld [vmem:[%s1818_s15 + $0x120] sm:$0xf]  ;;  %v1543_v28 = vld [vmem:[%s1818_s15 + $0x4] sm:$0xf] }
  0x13   : > { %v1544_v24 = vld [vmem:[%s1818_s15 + $0x8] sm:$0xf0]  ;;  %v1599_v27 = vld [vmem:[%s2197_s1 + $0x40] sm:$0xff]  ;;  %v1265_v29 = vld [vmem:[%s1818_s15 + $0xc] sm:$0xf0] }
  0x14   : > { %731 = vmatpush.bf16.msra.mxu0 %v1596_v6  ;;  %1706 = vmatpush.bf16.msra.mxu3 %v1596_v6  ;;  %v1580_v26 = vld [vmem:[%s1818_s15 + $0x128] sm:$0xf0]  ;;  %v1264_v30 = vor.u32 %v1544_v24, %v1263_v23  ;;  %v1268_v32 = vor.u32 %v1543_v28, %v1265_v29  ;;  %v1295_v33 = vld [vmem:[%s1818_s15 + $0x38] sm:$0xf]  ;;  %v1551_v34 = vld [vmem:[%s1818_s15 + $0x40] sm:$0xf0] }
  0x15   : > { %820 = vmatpush.bf16.msra.mxu1 %v1604_v7  ;;  %1525 = vmatmul.msk.bf16.vlgmr.msra.gmra.mxu2 %vm680_vm0, %v1272_v10  ;;  %v1408_v31 = vor.u32 %v1580_v26, %v1407_v25  ;;  %v1296_v35 = vor.u32 %v1551_v34, %v1295_v33  ;;  %v1275_v36 = vld [vmem:[%s1818_s15 + $0x18] sm:$0xf]  ;;  %v1547_v37 = vld [vmem:[%s1818_s15 + $0x20] sm:$0xf0]  ;;  %v1546_v40 = vld [vmem:[%s1818_s15 + $0x1c] sm:$0xf] }
  0x16   : > { %v1419_v38 = vld [vmem:[%s1818_s15 + $0x138] sm:$0xf]  ;;  %v1583_v39 = vld [vmem:[%s1818_s15 + $0x140] sm:$0xf0]  ;;  %v1277_v41 = vld [vmem:[%s1818_s15 + $0x24] sm:$0xf0]  ;;  %v1276_v42 = vor.u32 %v1547_v37, %v1275_v36 }
  0x17   : > { %v1420_v43 = vor.u32 %v1583_v39, %v1419_v38  ;;  %v1280_v44 = vor.u32 %v1546_v40, %v1277_v41  ;;  %v1307_v45 = vld [vmem:[%s1818_s15 + $0x50] sm:$0xf]  ;;  %v1554_v46 = vld [vmem:[%s1818_s15 + $0x58] sm:$0xf0]  ;;  %v1549_v52 = vld [vmem:[%s1818_s15 + $0x34] sm:$0xf] }
  0x18   : > { %732 = vmatpush.bf16.msra.mxu0 %v1595_v11  ;;  %1707 = vmatpush.bf16.msra.mxu3 %v1595_v11  ;;  %v1308_v47 = vor.u32 %v1554_v46, %v1307_v45  ;;  %v1287_v48 = vld [vmem:[%s1818_s15 + $0x30] sm:$0xf]  ;;  %v1550_v49 = vld [vmem:[%s1818_s15 + $0x38] sm:$0xf0]  ;;  %v1289_v53 = vld [vmem:[%s1818_s15 + $0x3c] sm:$0xf0] }
  0x19   : > { %821 = vmatpush.bf16.msra.mxu1 %v1603_v12  ;;  %v1431_v50 = vld [vmem:[%s1818_s15 + $0x150] sm:$0xf]  ;;  %v1586_v51 = vld [vmem:[%s1818_s15 + $0x158] sm:$0xf0]  ;;  %v1288_v54 = vor.u32 %v1550_v49, %v1287_v48  ;;  %v1292_v56 = vor.u32 %v1549_v52, %v1289_v53  ;;  %v1319_v57 = vld [vmem:[%s1818_s15 + $0x68] sm:$0xf] }
  0x1a   : > { %v1432_v55 = vor.u32 %v1586_v51, %v1431_v50  ;;  %v1557_v58 = vld [vmem:[%s1818_s15 + $0x70] sm:$0xf0]  ;;  %v1299_v60 = vld [vmem:[%s1818_s15 + $0x48] sm:$0xf]  ;;  %v1552_v0 = vld [vmem:[%s1818_s15 + $0x4c] sm:$0xf] }
  0x1b   : > { %v1320_v59 = vor.u32 %v1557_v58, %v1319_v57  ;;  %v1553_v61 = vld [vmem:[%s1818_s15 + $0x50] sm:$0xf0]  ;;  %v1443_v62 = vld [vmem:[%s1818_s15 + $0x168] sm:$0xf]  ;;  %v1560_v6 = vld [vmem:[%s1818_s15 + $0x88] sm:$0xf0] }
  0x1c   : > { %733 = vmatpush.bf16.msra.mxu0 %v1594_v13  ;;  %1708 = vmatpush.bf16.msra.mxu3 %v1594_v13  ;;  %v1589_v63 = vld [vmem:[%s1818_s15 + $0x170] sm:$0xf0]  ;;  %v1311_v8 = vld [vmem:[%s1818_s15 + $0x60] sm:$0xf]  ;;  %v1556_v9 = vld [vmem:[%s1818_s15 + $0x68] sm:$0xf0] }
  0x1d   : > { %822 = vmatpush.bf16.msra.mxu1 %v1602_v14  ;;  %v1444_v3 = vor.u32 %v1589_v63, %v1443_v62  ;;  %v1579_v10 = vld [vmem:[%s1818_s15 + $0x124] sm:$0xf]  ;;  %v1409_v11 = vld [vmem:[%s1818_s15 + $0x12c] sm:$0xf0]  ;;  %v1343_v17 = vld [vmem:[%s1818_s15 + $0x98] sm:$0xf] }
  0x1e   : > { %v1313_v13 = vld [vmem:[%s1818_s15 + $0x6c] sm:$0xf0]  ;;  %v1563_v18 = vld [vmem:[%s1818_s15 + $0xa0] sm:$0xf0]  ;;  %v1421_v23 = vld [vmem:[%s1818_s15 + $0x144] sm:$0xf0] }
  0x1f   : > { %v1558_v24 = vld [vmem:[%s1818_s15 + $0x7c] sm:$0xf]  ;;  %v1325_v25 = vld [vmem:[%s1818_s15 + $0x84] sm:$0xf0]  ;;  %v1355_v29 = vld [vmem:[%s1818_s15 + $0xb0] sm:$0xf] }
  0x20   : > { %734 = vmatpush.bf16.msra.mxu0 %v1593_v15  ;;  %1709 = vmatpush.bf16.msra.mxu3 %v1593_v15  ;;  %v1412_v15 = vor.u32 %v1579_v10, %v1409_v11  ;;  %v1328_v28 = vor.u32 %v1558_v24, %v1325_v25  ;;  %v1562_v33 = vld [vmem:[%s1818_s15 + $0x98] sm:$0xf0]  ;;  %v1585_v34 = vld [vmem:[%s1818_s15 + $0x154] sm:$0xf]  ;;  %v1337_v37 = vld [vmem:[%s1818_s15 + $0x9c] sm:$0xf0] }
  0x21   : > { %823 = vmatpush.bf16.msra.mxu1 %v1601_v16  ;;  %v1561_v36 = vld [vmem:[%s1818_s15 + $0x94] sm:$0xf]  ;;  %v1367_v41 = vld [vmem:[%s1818_s15 + $0xc8] sm:$0xf]  ;;  %v1588_v46 = vld [vmem:[%s1818_s15 + $0x16c] sm:$0xf] }
  0x22   : > { %v1340_v40 = vor.u32 %v1561_v36, %v1337_v37  ;;  %v1565_v45 = vld [vmem:[%s1818_s15 + $0xb0] sm:$0xf0]  ;;  %v1564_v48 = vld [vmem:[%s1818_s15 + $0xac] sm:$0xf]  ;;  %v1349_v49 = vld [vmem:[%s1818_s15 + $0xb4] sm:$0xf0] }
  0x23   : > { %v1352_v53 = vor.u32 %v1564_v48, %v1349_v49  ;;  %v1359_v58 = vld [vmem:[%s1818_s15 + $0xc0] sm:$0xf]  ;;  %v1567_v62 = vld [vmem:[%s1818_s15 + $0xc4] sm:$0xf]  ;;  %v1361_v63 = vld [vmem:[%s1818_s15 + $0xcc] sm:$0xf0] }
  0x24   : > { %735 = vmatpush.bf16.msra.mxu0 %v1592_v19  ;;  %1710 = vmatpush.bf16.msra.mxu3 %v1592_v19  ;;  %v1344_v19 = vor.u32 %v1563_v18, %v1343_v17  ;;  %v1391_v10 = vld [vmem:[%s1818_s15 + $0xf8] sm:$0xf]  ;;  %v1575_v11 = vld [vmem:[%s1818_s15 + $0x100] sm:$0xf0]  ;;  %v1951_v17 = vld [vmem:[%s2199_s3] ss:$0 sm:$0xff] }
  0x25   : > { %824 = vmatpush.bf16.msra.mxu1 %v1600_v20  ;;  %1526 = vmatmul.msk.bf16.gmra.mxu2 %vm680_vm0, %v1284_v21  ;;  %v1559_v21 = vld [vmem:[%s1818_s15 + $0x80] sm:$0xf0]  ;;  %v1570_v24 = vld [vmem:[%s1818_s15 + $0xdc] sm:$0xf]  ;;  %v1373_v25 = vld [vmem:[%s1818_s15 + $0xe4] sm:$0xf0] }
  0x26   : > { %v1376_v36 = vor.u32 %v1570_v24, %v1373_v25  ;;  %v1576_v24 = vld [vmem:[%s1818_s15 + $0x10c] sm:$0xf]  ;;  %v1397_v25 = vld [vmem:[%s1818_s15 + $0x114] sm:$0xf0] }
  0x28   : > { %736 = vmatpush.bf16.msra.mxu0 %v1591_v22  ;;  %1711 = vmatpush.bf16.msra.mxu3 %v1591_v22  ;;  %v1582_v22 = vld [vmem:[%s1818_s15 + $0x13c] sm:$0xf] }
  0x29   : > { %825 = vmatpush.bf16.msra.mxu1 %v1599_v27 }
  0x2b   : > { %737 = vmatmul.bf16.vlgmr.msra.gmra.mxu0 %v1264_v30  ;;  %797 = vmatmul.bf16.vlgmr.msra.gmra.mxu3 %v1408_v31  ;;  %v1566_v30 = vld [vmem:[%s1818_s15 + $0xb8] sm:$0xf0] }
  0x2c   : > { %1712 = vmatpush.bf16.msrb.mxu3 %v1785_v1  ;;  %826 = vmatmul.bf16.vlgmr.msra.gmra.mxu1 %v1268_v32  ;;  %v1301_v1 = vld [vmem:[%s1818_s15 + $0x54] sm:$0xf0]  ;;  %v1356_v31 = vor.u32 %v1566_v30, %v1355_v29  ;;  %v1335_v32 = vld [vmem:[%s1818_s15 + $0x90] sm:$0xf]  ;;  %v1068_v29 = vld [vmem:[%s2200_s4] sm:$0xff] }
  0x2d   : > { %v1336_v38 = vor.u32 %v1562_v33, %v1335_v32  ;;  %v1069_v30 = vld [vmem:[%s2200_s4 + $0x8] sm:$0xff] }
  0x30   : > { %1713 = vmatpush.bf16.msrb.mxu3 %v1605_v4  ;;  %v1304_v4 = vor.u32 %v1552_v0, %v1301_v1 }
  0x34   : > { %1714 = vmatpush.bf16.msrb.mxu3 %v1604_v7 }
  0x35   : > { %1527 = vmatmul.msk.bf16.gmra.mxu2 %vm680_vm0, %v1296_v35  ;;  %v1433_v35 = vld [vmem:[%s1818_s15 + $0x15c] sm:$0xf0] }
  0x36   : > { %v1436_v39 = vor.u32 %v1585_v34, %v1433_v35 }
  0x38   : > { %1715 = vmatpush.bf16.msrb.mxu3 %v1603_v12  ;;  %v1555_v12 = vld [vmem:[%s1818_s15 + $0x64] sm:$0xf] }
  0x3b   : > { %742 = vmatmul.bf16.gmra.mxu0 %v1276_v42  ;;  %802 = vmatmul.bf16.gmra.mxu3 %v1420_v43  ;;  %v1569_v42 = vld [vmem:[%s1818_s15 + $0xd0] sm:$0xf0] }
  0x3c   : > { %1716 = vmatpush.bf16.msrb.mxu3 %v1602_v14  ;;  %831 = vmatmul.bf16.gmra.mxu1 %v1280_v44  ;;  %v1312_v14 = vor.u32 %v1556_v9, %v1311_v8  ;;  %v1368_v43 = vor.u32 %v1569_v42, %v1367_v41  ;;  %v1347_v44 = vld [vmem:[%s1818_s15 + $0xa8] sm:$0xf]  ;;  %v1941_v8 = vld [vmem:[%s2198_s2] ss:$0 sm:$0xff] }
  0x3d   : > { %v1348_v50 = vor.u32 %v1565_v45, %v1347_v44  ;;  %v1403_v44 = vld [vmem:[%s1818_s15 + $0x110] sm:$0xf]  ;;  %v1578_v45 = vld [vmem:[%s1818_s15 + $0x118] sm:$0xf0] }
  0x3e   : > { %v1404_v49 = vor.u32 %v1578_v45, %v1403_v44  ;;  %v1427_v45 = vld [vmem:[%s1818_s15 + $0x140] sm:$0xf] }
  0x40   : > { %1717 = vmatpush.bf16.msrb.mxu3 %v1601_v16  ;;  %v1316_v16 = vor.u32 %v1555_v12, %v1313_v13 }
  0x44   : > { %1718 = vmatpush.bf16.msrb.mxu3 %v1600_v20  ;;  %v1323_v20 = vld [vmem:[%s1818_s15 + $0x78] sm:$0xf] }
  0x45   : > { %1528 = vmatmul.msk.bf16.gmra.mxu2 %vm680_vm0, %v1308_v47  ;;  %v1324_v26 = vor.u32 %v1559_v21, %v1323_v20  ;;  %v1445_v47 = vld [vmem:[%s1818_s15 + $0x174] sm:$0xf0]  ;;  %v1571_v21 = vld [vmem:[%s1818_s15 + $0xe0] sm:$0xf0] }
  0x46   : > { %v1448_v51 = vor.u32 %v1588_v46, %v1445_v47 }
  0x48   : > { %1719 = vmatpush.bf16.msrb.mxu3 %v1599_v27  ;;  %v1424_v27 = vor.u32 %v1582_v22, %v1421_v23  ;;  %v1451_v22 = vld [vmem:[%s1818_s15 + $0x170] sm:$0xf]  ;;  %v1590_v23 = vld [vmem:[%s1818_s15 + $0x178] sm:$0xf0] }
  0x49   : > { %v1452_v32 = vor.u32 %v1590_v23, %v1451_v22  ;;  %v1395_v22 = vld [vmem:[%s1818_s15 + $0x108] sm:$0xf]  ;;  %v1577_v23 = vld [vmem:[%s1818_s15 + $0x110] sm:$0xf0] }
  0x4b   : > { %747 = vmatmul.bf16.gmra.mxu0 %v1288_v54  ;;  %807 = vmatmul.bf16.gmra.mxu3 %v1432_v55  ;;  %v1379_v54 = vld [vmem:[%s1818_s15 + $0xe0] sm:$0xf]  ;;  %v1572_v55 = vld [vmem:[%s1818_s15 + $0xe8] sm:$0xf0] }
  0x4c   : > { %1720 = vmatpush.bf16.msra.mxu3 %v1790_v2  ;;  %836 = vmatmul.bf16.gmra.mxu1 %v1292_v56  ;;  %v1300_v2 = vor.u32 %v1553_v61, %v1299_v60  ;;  %v1380_v57 = vor.u32 %v1572_v55, %v1379_v54  ;;  %v1439_v60 = vld [vmem:[%s1818_s15 + $0x158] sm:$0xf]  ;;  %v1587_v61 = vld [vmem:[%s1818_s15 + $0x160] sm:$0xf0]  ;;  %v1574_v54 = vld [vmem:[%s1818_s15 + $0xf8] sm:$0xf0] }
  0x4d   : > { %v1440_v1 = vor.u32 %v1587_v61, %v1439_v60  ;;  %v1573_v55 = vld [vmem:[%s1818_s15 + $0xf4] sm:$0xf]  ;;  %v1071_v61 = vld [vmem:[%s2200_s4 + $0x18] sm:$0xff] }
  0x4e   : > { %v1070_v60 = vld [vmem:[%s2200_s4 + $0x10] sm:$0xff] }
  0x50   : > { %1721 = vmatpush.bf16.msra.mxu3 %v1803_v5  ;;  %v1331_v5 = vld [vmem:[%s1818_s15 + $0x80] sm:$0xf] }
  0x51   : > { %v1332_v7 = vor.u32 %v1560_v6, %v1331_v5 }
  0x55   : > { %1529 = vmatmul.msk.bf16.gmra.mxu2 %vm680_vm0, %v1320_v59  ;;  %v1568_v59 = vld [vmem:[%s1818_s15 + $0xc8] sm:$0xf0] }
  0x56   : > { %v1360_v0 = vor.u32 %v1568_v59, %v1359_v58 }
  0x5b   : > { %752 = vmatmul.bf16.gmra.mxu0 %v1300_v2  ;;  %812 = vmatmul.bf16.gmra.mxu3 %v1444_v3 }
  0x5c   : > { %841 = vmatmul.bf16.gmra.mxu1 %v1304_v4  ;;  %v1364_v4 = vor.u32 %v1567_v62, %v1361_v63 }
  0x65   : > { %1530 = vmatmul.msk.bf16.gmra.mxu2 %vm680_vm0, %v1332_v7 }
  0x6b   : > { %757 = vmatmul.bf16.gmra.mxu0 %v1312_v14  ;;  %886 = vmatmul.bf16.vlgmr.msrb.gmra.mxu3 %v1412_v15  ;;  %v1392_v15 = vor.u32 %v1575_v11, %v1391_v10 }
  0x6c   : > { %846 = vmatmul.bf16.gmra.mxu1 %v1316_v16 }
  0x75   : > { %1531 = vmatmul.msk.bf16.gmra.mxu2 %vm680_vm0, %v1344_v19  ;;  %v1371_v19 = vld [vmem:[%s1818_s15 + $0xd8] sm:$0xf] }
  0x7b   : > { %762 = vmatmul.bf16.gmra.mxu0 %v1324_v26  ;;  %891 = vmatmul.bf16.gmra.mxu3 %v1424_v27 }
  0x7c   : > { %851 = vmatmul.bf16.gmra.mxu1 %v1328_v28 }
  0x85   : > { %1532 = vmatmul.msk.bf16.gmra.mxu2 %vm680_vm0, %v1356_v31  ;;  %v1372_v31 = vor.u32 %v1571_v21, %v1371_v19 }
  0x8b   : > { %767 = vmatmul.bf16.gmra.mxu0 %v1336_v38  ;;  %896 = vmatmul.bf16.gmra.mxu3 %v1436_v39 }
  0x8c   : > { %856 = vmatmul.bf16.gmra.mxu1 %v1340_v40 }
  0x95   : > { %1533 = vmatmul.msk.bf16.gmra.mxu2 %vm680_vm0, %v1368_v43 }
  0x98   : > { %v916_v52 = vpop.f32.mrf.mxu2 }
  0x9b   : > { %772 = vmatmul.bf16.gmra.mxu0 %v1348_v50  ;;  %901 = vmatmul.bf16.gmra.mxu3 %v1448_v51 }
  0x9c   : > { %861 = vmatmul.bf16.gmra.mxu1 %v1352_v53  ;;  %v1383_v53 = vld [vmem:[%s1818_s15 + $0xf0] sm:$0xf] }
  0x9d   : > { %v1384_v62 = vor.u32 %v1574_v54, %v1383_v53 }
  0xa0   : > { %v918_v56 = vpop.f32.mrf.mxu2 }
  0xa5   : > { %1534 = vmatmul.msk.bf16.gmra.mxu2 %vm680_vm0, %v1380_v57 }
  0xa8   : > { %v921_v2 = vpop.f32.mrf.mxu2  ;;  %v738_v3 = vpop.f32.mrf.mxu0 }
  0xa9   : > { %v827_v5 = vpop.f32.mrf.mxu1 }
  0xaa   : > { %v828_v6 = vadd.f32 %v827_v5, %v738_v3 }
  0xab   : > { %777 = vmatmul.bf16.gmra.mxu0 %v1360_v0  ;;  %1539 = vmatmul.msk.bf16.vlgmr.msra.gmra.mxu3 %vm680_vm0, %v1440_v1 }
  0xac   : > { %866 = vmatmul.bf16.gmra.mxu1 %v1364_v4  ;;  %v917_v7 = vadd.f32 %v916_v52, %v828_v6 }
  0xae   : > { %v1943_v9 = vpop.f32.mrf.mxu3  ;;  %v1000_v16 = vmul.f32 %v1941_v8, %v917_v7 }
  0xb0   : > { %v923_v12 = vpop.f32.mrf.mxu2  ;;  %v740_v13 = vpop.f32.mrf.mxu0  ;;  %v1036_v26 = vadd.f32 %v1951_v17, %v1000_v16 }
  0xb1   : > { %v829_v14 = vpop.f32.mrf.mxu1 }
  0xb2   : > { %v830_v18 = vadd.f32 %v829_v14, %v740_v13  ;;  %v1100_v38 = vadd.f32 %v1068_v29, %v1036_v26  ;;  %v1581_v13 = vld [vmem:[%s1818_s15 + $0x130] sm:$0xf0] }
  0xb4   : > { %v919_v20 = vadd.f32 %v918_v56, %v830_v18  ;;  %v1385_v56 = vld [vmem:[%s1818_s15 + $0xfc] sm:$0xf0] }
  0xb5   : > { %1535 = vmatmul.msk.bf16.gmra.mxu2 %vm680_vm0, %v1392_v15 }
  0xb6   : > { %v1001_v27 = vmul.f32 %v1941_v8, %v919_v20  ;;  %v1962_v28 = vpop.f32.mrf.mxu3 }
  0xb8   : > { %v1037_v33 = vadd.f32 %v1951_v17, %v1001_v27  ;;  %v926_v34 = vpop.f32.mrf.mxu2  ;;  %v743_v35 = vpop.f32.mrf.mxu0 }
  0xb9   : > { %v832_v37 = vpop.f32.mrf.mxu1 }
  0xba   : > { %v1101_v39 = vadd.f32 %v1069_v30, %v1037_v33  ;;  %v833_v40 = vadd.f32 %v832_v37, %v743_v35  ;;  %v1072_v30 = vld [vmem:[%s2200_s4 + $0x20] sm:$0xff] }
  0xbb   : > { %782 = vmatmul.bf16.gmra.mxu0 %v1372_v31  ;;  %1540 = vmatmul.msk.bf16.gmra.mxu3 %vm680_vm0, %v1452_v32  ;;  %v1073_v31 = vld [vmem:[%s2200_s4 + $0x28] sm:$0xff]  ;;  %v1396_v32 = vor.u32 %v1577_v23, %v1395_v22 }
  0xbc   : > { %v1612_v41 = vpack.c.bf16 %v1101_v39, %v1100_v38  ;;  %871 = vmatmul.bf16.gmra.mxu1 %v1376_v36  ;;  %v922_v42 = vadd.f32 %v921_v2, %v833_v40  ;;  %v1388_v2 = vor.u32 %v1573_v55, %v1385_v56  ;;  %v1400_v36 = vor.u32 %v1576_v24, %v1397_v25 }
  0xbe   : > { %1613 = vst [vmem:[%s1975_s27] sm:$0xff] %v1612_v41   ;;  %v1979_v43 = vpop.f32.mrf.mxu3  ;;  %v1002_v50 = vmul.f32 %v1941_v8, %v922_v42 }
  0xc0   : > { %v928_v46 = vpop.f32.mrf.mxu2  ;;  %v745_v47 = vpop.f32.mrf.mxu0  ;;  %v1038_v57 = vadd.f32 %v1951_v17, %v1002_v50 }
  0xc1   : > { %v834_v48 = vpop.f32.mrf.mxu1 }
  0xc2   : > { %v835_v51 = vadd.f32 %v834_v48, %v745_v47  ;;  %v1102_v4 = vadd.f32 %v1070_v60, %v1038_v57  ;;  %v1074_v57 = vld [vmem:[%s2200_s4 + $0x30] sm:$0xff] }
  0xc4   : > { %v924_v52 = vadd.f32 %v923_v12, %v835_v51  ;;  %v1415_v12 = vld [vmem:[%s1818_s15 + $0x128] sm:$0xf] }
  0xc5   : > { %1536 = vmatmul.msk.bf16.gmra.mxu2 %vm680_vm0, %v1404_v49  ;;  %v1416_v18 = vor.u32 %v1581_v13, %v1415_v12 }
  0xc6   : > { %v1003_v58 = vmul.f32 %v1941_v8, %v924_v52  ;;  %v1991_v59 = vpop.f32.mrf.mxu3 }
  0xc8   : > { %v1039_v63 = vadd.f32 %v1951_v17, %v1003_v58  ;;  %v931_v0 = vpop.f32.mrf.mxu2  ;;  %v748_v1 = vpop.f32.mrf.mxu0  ;;  %v1075_v58 = vld [vmem:[%s2200_s4 + $0x38] sm:$0xff] }
  0xc9   : > { %v837_v3 = vpop.f32.mrf.mxu1 }
  0xca   : > { %v1103_v5 = vadd.f32 %v1071_v61, %v1039_v63  ;;  %v838_v6 = vadd.f32 %v837_v3, %v748_v1 }
  0xcb   : > { %787 = vmatmul.bf16.gmra.mxu0 %v1384_v62 }
  0xcc   : > { %v1617_v7 = vpack.c.bf16 %v1103_v5, %v1102_v4  ;;  %876 = vmatmul.bf16.gmra.mxu1 %v1388_v2  ;;  %v927_v10 = vadd.f32 %v926_v34, %v838_v6 }
  0xce   : > { %1689 = vst [vmem:[%s1975_s27 + $0x8] sm:$0xff] %v1617_v7   ;;  %v2001_v11 = vpop.f32.mrf.mxu3  ;;  %v1004_v19 = vmul.f32 %v1941_v8, %v927_v10 }
  0xd0   : > { %v933_v14 = vpop.f32.mrf.mxu2  ;;  %v750_v15 = vpop.f32.mrf.mxu0  ;;  %v1040_v26 = vadd.f32 %v1951_v17, %v1004_v19 }
  0xd1   : > { %v839_v16 = vpop.f32.mrf.mxu1 }
  0xd2   : > { %v840_v20 = vadd.f32 %v839_v16, %v750_v15  ;;  %v1104_v38 = vadd.f32 %v1072_v30, %v1040_v26 }
  0xd4   : > { %v929_v21 = vadd.f32 %v928_v46, %v840_v20  ;;  %v1584_v46 = vld [vmem:[%s1818_s15 + $0x148] sm:$0xf0]  ;;  %v1076_v20 = vld [vmem:[%s2200_s4 + $0x40] sm:$0xff] }
  0xd5   : > { %1537 = vmatmul.msk.bf16.gmra.mxu2 %vm680_vm0, %v1416_v18  ;;  %v1428_v50 = vor.u32 %v1584_v46, %v1427_v45  ;;  %v1078_v45 = vld [vmem:[%s2200_s4 + $0x50] sm:$0xff] }
  0xd6   : > { %v1005_v27 = vmul.f32 %v1941_v8, %v929_v21  ;;  %v2013_v29 = vpop.f32.mrf.mxu3 }
  0xd8   : > { %v1041_v33 = vadd.f32 %v1951_v17, %v1005_v27  ;;  %v936_v34 = vpop.f32.mrf.mxu2  ;;  %v753_v35 = vpop.f32.mrf.mxu0 }
  0xd9   : > { %v842_v37 = vpop.f32.mrf.mxu1 }
  0xda   : > { %v1105_v39 = vadd.f32 %v1073_v31, %v1041_v33  ;;  %v843_v40 = vadd.f32 %v842_v37, %v753_v35 }
  0xdb   : > { %792 = vmatmul.bf16.gmra.mxu0 %v1396_v32 }
  0xdc   : > { %v1622_v41 = vpack.c.bf16 %v1105_v39, %v1104_v38  ;;  %881 = vmatmul.bf16.gmra.mxu1 %v1400_v36  ;;  %v932_v42 = vadd.f32 %v931_v0, %v843_v40 }
  0xde   : > { %1690 = vst [vmem:[%s1975_s27 + $0x10] sm:$0xff] %v1622_v41   ;;  %v2023_v44 = vpop.f32.mrf.mxu3  ;;  %v1006_v51 = vmul.f32 %v1941_v8, %v932_v42 }
  0xe0   : > { %v938_v47 = vpop.f32.mrf.mxu2  ;;  %v755_v48 = vpop.f32.mrf.mxu0  ;;  %v1042_v54 = vadd.f32 %v1951_v17, %v1006_v51 }
  0xe1   : > { %v844_v49 = vpop.f32.mrf.mxu1 }
  0xe2   : > { %v845_v52 = vadd.f32 %v844_v49, %v755_v48  ;;  %v1106_v0 = vadd.f32 %v1074_v57, %v1042_v54 }
  0xe4   : > { %v934_v53 = vadd.f32 %v933_v14, %v845_v52 }
  0xe5   : > { %1538 = vmatmul.msk.bf16.gmra.mxu2 %vm680_vm0, %v1428_v50 }
  0xe6   : > { %v1007_v55 = vmul.f32 %v1941_v8, %v934_v53  ;;  %v2031_v56 = vpop.f32.mrf.mxu3 }
  0xe8   : > { %v1043_v60 = vadd.f32 %v1951_v17, %v1007_v55  ;;  %v941_v61 = vpop.f32.mrf.mxu2  ;;  %v758_v62 = vpop.f32.mrf.mxu0 }
  0xe9   : > { %v847_v63 = vpop.f32.mrf.mxu1 }
  0xea   : > { %v1107_v1 = vadd.f32 %v1075_v58, %v1043_v60  ;;  %v848_v2 = vadd.f32 %v847_v63, %v758_v62 }
  0xec   : > { %v1627_v3 = vpack.c.bf16 %v1107_v1, %v1106_v0  ;;  %v937_v4 = vadd.f32 %v936_v34, %v848_v2 }
  0xee   : > { %1691 = vst [vmem:[%s1975_s27 + $0x18] sm:$0xff] %v1627_v3   ;;  %v887_v5 = vpop.f32.mrf.mxu3  ;;  %v1008_v13 = vmul.f32 %v1941_v8, %v937_v4  ;;  %v1080_v3 = vld [vmem:[%s2200_s4 + $0x60] sm:$0xff]  ;;  %v1081_v4 = vld [vmem:[%s2200_s4 + $0x68] sm:$0xff] }
  0xef   : > { %v2042_v6 = vadd.f32 %v887_v5, %v1943_v9  ;;  %v1077_v9 = vld [vmem:[%s2200_s4 + $0x48] sm:$0xff] }
  0xf0   : > { %v943_v7 = vpop.f32.mrf.mxu2  ;;  %v760_v10 = vpop.f32.mrf.mxu0  ;;  %v1044_v16 = vadd.f32 %v1951_v17, %v1008_v13 }
  0xf1   : > { %v849_v12 = vpop.f32.mrf.mxu1 }
  0xf2   : > { %v850_v14 = vadd.f32 %v849_v12, %v760_v10  ;;  %v1108_v26 = vadd.f32 %v1076_v20, %v1044_v16 }
  0xf4   : > { %v939_v15 = vadd.f32 %v938_v47, %v850_v14 }
  0xf6   : > { %v1009_v18 = vmul.f32 %v1941_v8, %v939_v15  ;;  %v889_v19 = vpop.f32.mrf.mxu3 }
  0xf7   : > { %v2054_v21 = vadd.f32 %v889_v19, %v1962_v28 }
  0xf8   : > { %v1045_v22 = vadd.f32 %v1951_v17, %v1009_v18  ;;  %v946_v23 = vpop.f32.mrf.mxu2  ;;  %v763_v24 = vpop.f32.mrf.mxu0 }
  0xf9   : > { %v852_v25 = vpop.f32.mrf.mxu1 }
  0xfa   : > { %v1109_v27 = vadd.f32 %v1077_v9, %v1045_v22  ;;  %v853_v30 = vadd.f32 %v852_v25, %v763_v24 }
  0xfc   : > { %v1632_v31 = vpack.c.bf16 %v1109_v27, %v1108_v26  ;;  %v942_v32 = vadd.f32 %v941_v61, %v853_v30 }
  0xfe   : > { %1692 = vst [vmem:[%s1975_s27 + $0x20] sm:$0xff] %v1632_v31   ;;  %v892_v33 = vpop.f32.mrf.mxu3  ;;  %v1010_v28 = vmul.f32 %v1941_v8, %v942_v32  ;;  %v1082_v31 = vld [vmem:[%s2200_s4 + $0x70] sm:$0xff]  ;;  %v1083_v32 = vld [vmem:[%s2200_s4 + $0x78] sm:$0xff] }
  0xff   : > { %v2059_v34 = vadd.f32 %v892_v33, %v1979_v43  ;;  %v1079_v43 = vld [vmem:[%s2200_s4 + $0x58] sm:$0xff] }
 0x100   : > { %v948_v35 = vpop.f32.mrf.mxu2  ;;  %v765_v36 = vpop.f32.mrf.mxu0  ;;  %v1046_v40 = vadd.f32 %v1951_v17, %v1010_v28 }
 0x101   : > { %v854_v37 = vpop.f32.mrf.mxu1 }
 0x102   : > { %v855_v38 = vadd.f32 %v854_v37, %v765_v36  ;;  %v1110_v51 = vadd.f32 %v1078_v45, %v1046_v40 }
 0x104   : > { %v944_v39 = vadd.f32 %v943_v7, %v855_v38 }
 0x106   : > { %v1011_v41 = vmul.f32 %v1941_v8, %v944_v39  ;;  %v894_v42 = vpop.f32.mrf.mxu3 }
 0x107   : > { %v2071_v46 = vadd.f32 %v894_v42, %v1991_v59 }
 0x108   : > { %v1047_v47 = vadd.f32 %v1951_v17, %v1011_v41  ;;  %v951_v48 = vpop.f32.mrf.mxu2  ;;  %v768_v49 = vpop.f32.mrf.mxu0 }
 0x109   : > { %v857_v50 = vpop.f32.mrf.mxu1 }
 0x10a   : > { %v1111_v52 = vadd.f32 %v1079_v43, %v1047_v47  ;;  %v858_v53 = vadd.f32 %v857_v50, %v768_v49 }
 0x10c   : > { %v1637_v54 = vpack.c.bf16 %v1111_v52, %v1110_v51  ;;  %v947_v55 = vadd.f32 %v946_v23, %v858_v53 }
 0x10e   : > { %1693 = vst [vmem:[%s1975_s27 + $0x28] sm:$0xff] %v1637_v54   ;;  %v897_v57 = vpop.f32.mrf.mxu3  ;;  %v1012_v62 = vmul.f32 %v1941_v8, %v947_v55 }
 0x10f   : > { %v898_v45 = vadd.f32 %v897_v57, %v2001_v11  ;;  %v1084_v11 = vld [vmem:[%s2200_s4 + $0x80] sm:$0xff]  ;;  %v1085_v57 = vld [vmem:[%s2200_s4 + $0x88] sm:$0xff] }
 0x110   : > { %v953_v58 = vpop.f32.mrf.mxu2  ;;  %v770_v60 = vpop.f32.mrf.mxu0  ;;  %v1048_v0 = vadd.f32 %v1951_v17, %v1012_v62 }
 0x111   : > { %v859_v61 = vpop.f32.mrf.mxu1 }
 0x112   : > { %v860_v59 = vadd.f32 %v859_v61, %v770_v60  ;;  %v1112_v13 = vadd.f32 %v1080_v3, %v1048_v0  ;;  %v1096_v3 = vld [vmem:[%s2200_s4 + $0xe0] sm:$0xff] }
 0x114   : > { %v949_v63 = vadd.f32 %v948_v35, %v860_v59 }
 0x116   : > { %v1013_v1 = vmul.f32 %v1941_v8, %v949_v63  ;;  %v899_v2 = vpop.f32.mrf.mxu3 }
 0x117   : > { %v900_v53 = vadd.f32 %v899_v2, %v2013_v29 }
 0x118   : > { %v1049_v5 = vadd.f32 %v1951_v17, %v1013_v1  ;;  %v956_v7 = vpop.f32.mrf.mxu2  ;;  %v773_v10 = vpop.f32.mrf.mxu0 }
 0x119   : > { %v862_v12 = vpop.f32.mrf.mxu1 }
 0x11a   : > { %v1113_v14 = vadd.f32 %v1081_v4, %v1049_v5  ;;  %v863_v15 = vadd.f32 %v862_v12, %v773_v10  ;;  %v1097_v5 = vld [vmem:[%s2200_s4 + $0xe8] sm:$0xff] }
 0x11c   : > { %v1642_v16 = vpack.c.bf16 %v1113_v14, %v1112_v13  ;;  %v952_v18 = vadd.f32 %v951_v48, %v863_v15 }
 0x11e   : > { %1694 = vst [vmem:[%s1975_s27 + $0x30] sm:$0xff] %v1642_v16   ;;  %v902_v19 = vpop.f32.mrf.mxu3  ;;  %v1014_v23 = vmul.f32 %v1941_v8, %v952_v18 }
 0x11f   : > { %v903_v18 = vadd.f32 %v902_v19, %v2023_v44  ;;  %v1086_v44 = vld [vmem:[%s2200_s4 + $0x90] sm:$0xff]  ;;  %v1087_v19 = vld [vmem:[%s2200_s4 + $0x98] sm:$0xff] }
 0x120   : > { %v958_v20 = vpop.f32.mrf.mxu2  ;;  %v775_v9 = vpop.f32.mrf.mxu0  ;;  %v1050_v26 = vadd.f32 %v1951_v17, %v1014_v23 }
 0x121   : > { %v864_v22 = vpop.f32.mrf.mxu1 }
 0x122   : > { %v865_v24 = vadd.f32 %v864_v22, %v775_v9  ;;  %v1114_v28 = vadd.f32 %v1082_v31, %v1050_v26 }
 0x124   : > { %v954_v25 = vadd.f32 %v953_v58, %v865_v24 }
 0x126   : > { %v1015_v27 = vmul.f32 %v1941_v8, %v954_v25  ;;  %v904_v30 = vpop.f32.mrf.mxu3 }
 0x127   : > { %v905_v31 = vadd.f32 %v904_v30, %v2031_v56 }
 0x128   : > { %v1051_v33 = vadd.f32 %v1951_v17, %v1015_v27  ;;  %v961_v35 = vpop.f32.mrf.mxu2  ;;  %v778_v36 = vpop.f32.mrf.mxu0 }
 0x129   : > { %v867_v37 = vpop.f32.mrf.mxu1 }
 0x12a   : > { %v1115_v38 = vadd.f32 %v1083_v32, %v1051_v33  ;;  %v868_v39 = vadd.f32 %v867_v37, %v778_v36 }
 0x12c   : > { %v1647_v40 = vpack.c.bf16 %v1115_v38, %v1114_v28  ;;  %v957_v41 = vadd.f32 %v956_v7, %v868_v39 }
 0x12e   : > { %1695 = vst [vmem:[%s1975_s27 + $0x38] sm:$0xff] %v1647_v40   ;;  %v986_v42 = vpop.f32.mrf.mxu3  ;;  %v1016_v50 = vmul.f32 %v1941_v8, %v957_v41 }
 0x12f   : > { %v987_v48 = vadd.f32 %v986_v42, %v898_v45  ;;  %v1098_v42 = vld [vmem:[%s2200_s4 + $0xf0] sm:$0xff] }
 0x130   : > { %v963_v43 = vpop.f32.mrf.mxu2  ;;  %v780_v47 = vpop.f32.mrf.mxu0  ;;  %v1052_v55 = vadd.f32 %v1951_v17, %v1016_v50 }
 0x131   : > { %v869_v49 = vpop.f32.mrf.mxu1  ;;  %v1028_v54 = vmul.f32 %v1941_v8, %v987_v48 }
 0x132   : > { %v870_v51 = vadd.f32 %v869_v49, %v780_v47  ;;  %v1116_v2 = vadd.f32 %v1084_v11, %v1052_v55 }
 0x133   : > { %v1064_v63 = vadd.f32 %v1951_v17, %v1028_v54 }
 0x134   : > { %v959_v52 = vadd.f32 %v958_v20, %v870_v51 }
 0x135   : > { %v1128_v13 = vadd.f32 %v1096_v3, %v1064_v63 }
 0x136   : > { %v1017_v58 = vmul.f32 %v1941_v8, %v959_v52  ;;  %v988_v60 = vpop.f32.mrf.mxu3 }
 0x137   : > { %v989_v61 = vadd.f32 %v988_v60, %v900_v53 }
 0x138   : > { %v1053_v62 = vadd.f32 %v1951_v17, %v1017_v58  ;;  %v966_v29 = vpop.f32.mrf.mxu2  ;;  %v783_v59 = vpop.f32.mrf.mxu0 }
 0x139   : > { %v1029_v0 = vmul.f32 %v1941_v8, %v989_v61  ;;  %v872_v1 = vpop.f32.mrf.mxu1 }
 0x13a   : > { %v1117_v4 = vadd.f32 %v1085_v57, %v1053_v62  ;;  %v873_v7 = vadd.f32 %v872_v1, %v783_v59  ;;  %v1088_v59 = vld [vmem:[%s2200_s4 + $0xa0] sm:$0xff] }
 0x13b   : > { %v1065_v10 = vadd.f32 %v1951_v17, %v1029_v0 }
 0x13c   : > { %v1652_v12 = vpack.c.bf16 %v1117_v4, %v1116_v2  ;;  %v962_v15 = vadd.f32 %v961_v35, %v873_v7 }
 0x13d   : > { %v1129_v14 = vadd.f32 %v1097_v5, %v1065_v10 }
 0x13e   : > { %1696 = vst [vmem:[%s1975_s27 + $0x40] sm:$0xff] %v1652_v12   ;;  %v991_v16 = vpop.f32.mrf.mxu3  ;;  %v1018_v25 = vmul.f32 %v1941_v8, %v962_v15 }
 0x13f   : > { %v1682_v20 = vpack.c.bf16 %v1129_v14, %v1128_v13  ;;  %v992_v23 = vadd.f32 %v991_v16, %v903_v18 }
 0x140   : > { %v968_v9 = vpop.f32.mrf.mxu2  ;;  %v785_v22 = vpop.f32.mrf.mxu0  ;;  %v1054_v33 = vadd.f32 %v1951_v17, %v1018_v25 }
 0x141   : > { %1702 = vst [vmem:[%s1975_s27 + $0x70] sm:$0xff] %v1682_v20   ;;  %v874_v24 = vpop.f32.mrf.mxu1  ;;  %v1030_v32 = vmul.f32 %v1941_v8, %v992_v23 }
 0x142   : > { %v875_v26 = vadd.f32 %v874_v24, %v785_v22  ;;  %v1118_v41 = vadd.f32 %v1086_v44, %v1054_v33  ;;  %v1093_v24 = vld [vmem:[%s2200_s4 + $0xc8] sm:$0xff] }
 0x143   : > { %v1066_v38 = vadd.f32 %v1951_v17, %v1030_v32  ;;  %v1090_v32 = vld [vmem:[%s2200_s4 + $0xb0] sm:$0xff] }
 0x144   : > { %v964_v27 = vadd.f32 %v963_v43, %v875_v26  ;;  %v1099_v43 = vld [vmem:[%s2200_s4 + $0xf8] sm:$0xff] }
 0x145   : > { %v1130_v50 = vadd.f32 %v1098_v42, %v1066_v38 }
 0x146   : > { %v1019_v35 = vmul.f32 %v1941_v8, %v964_v27  ;;  %v993_v36 = vpop.f32.mrf.mxu3 }
 0x147   : > { %v994_v37 = vadd.f32 %v993_v36, %v905_v31 }
 0x148   : > { %v1055_v28 = vadd.f32 %v1951_v17, %v1019_v35  ;;  %v971_v56 = vpop.f32.mrf.mxu2  ;;  %v788_v30 = vpop.f32.mrf.mxu0  ;;  %v1091_v35 = vld [vmem:[%s2200_s4 + $0xb8] sm:$0xff] }
 0x149   : > { %v1031_v39 = vmul.f32 %v1941_v8, %v994_v37  ;;  %v877_v40 = vpop.f32.mrf.mxu1 }
 0x14a   : > { %v1119_v45 = vadd.f32 %v1087_v19, %v1055_v28  ;;  %v878_v47 = vadd.f32 %v877_v40, %v788_v30 }
 0x14b   : > { %v1067_v48 = vadd.f32 %v1951_v17, %v1031_v39 }
 0x14c   : > { %v1657_v49 = vpack.c.bf16 %v1119_v45, %v1118_v41  ;;  %v967_v52 = vadd.f32 %v966_v29, %v878_v47  ;;  %v1089_v29 = vld [vmem:[%s2200_s4 + $0xa8] sm:$0xff]  ;;  %v1094_v45 = vld [vmem:[%s2200_s4 + $0xd0] sm:$0xff] }
 0x14d   : > { %v1131_v51 = vadd.f32 %v1099_v43, %v1067_v48  ;;  %v1095_v43 = vld [vmem:[%s2200_s4 + $0xd8] sm:$0xff] }
 0x14e   : > { %1697 = vst [vmem:[%s1975_s27 + $0x48] sm:$0xff] %v1657_v49   ;;  %v1020_v60 = vmul.f32 %v1941_v8, %v967_v52 }
 0x14f   : > { %v1687_v53 = vpack.c.bf16 %v1131_v51, %v1130_v50 }
 0x150   : > { %v973_v54 = vpop.f32.mrf.mxu2  ;;  %v790_v55 = vpop.f32.mrf.mxu0  ;;  %v1056_v61 = vadd.f32 %v1951_v17, %v1020_v60 }
 0x151   : > { %1703 = vst [vmem:[%s1975_s27 + $0x78] sm:$0xff] %v1687_v53   ;;  %v879_v58 = vpop.f32.mrf.mxu1 }
 0x152   : > { %v880_v11 = vadd.f32 %v879_v58, %v790_v55  ;;  %v1120_v3 = vadd.f32 %v1088_v59, %v1056_v61 }
 0x154   : > { %v969_v57 = vadd.f32 %v968_v9, %v880_v11 }
 0x156   : > { %v1021_v62 = vmul.f32 %v1941_v8, %v969_v57 }
 0x158   : > { %v1057_v63 = vadd.f32 %v1951_v17, %v1021_v62  ;;  %v976_v0 = vpop.f32.mrf.mxu2  ;;  %v793_v1 = vpop.f32.mrf.mxu0 }
 0x159   : > { %v882_v2 = vpop.f32.mrf.mxu1  ;;  %v977_v7 = vadd.f32 %v976_v0, %v2042_v6  ;;  %v1092_v6 = vld [vmem:[%s2200_s4 + $0xc0] sm:$0xff] }
 0x15a   : > { %v1121_v4 = vadd.f32 %v1089_v29, %v1057_v63  ;;  %v883_v5 = vadd.f32 %v882_v2, %v793_v1 }
 0x15b   : > { %v1024_v13 = vmul.f32 %v1941_v8, %v977_v7 }
 0x15c   : > { %v1662_v10 = vpack.c.bf16 %v1121_v4, %v1120_v3  ;;  %v972_v12 = vadd.f32 %v971_v56, %v883_v5 }
 0x15d   : > { %v1060_v22 = vadd.f32 %v1951_v17, %v1024_v13 }
 0x15e   : > { %1698 = vst [vmem:[%s1975_s27 + $0x50] sm:$0xff] %v1662_v10   ;;  %v1022_v20 = vmul.f32 %v1941_v8, %v972_v12 }
 0x15f   : > { %v1124_v31 = vadd.f32 %v1092_v6, %v1060_v22 }
 0x160   : > { %v978_v14 = vpop.f32.mrf.mxu2  ;;  %v795_v15 = vpop.f32.mrf.mxu0  ;;  %v1058_v26 = vadd.f32 %v1951_v17, %v1022_v20 }
 0x161   : > { %v979_v16 = vadd.f32 %v978_v14, %v2054_v21  ;;  %v884_v18 = vpop.f32.mrf.mxu1 }
 0x162   : > { %v885_v9 = vadd.f32 %v884_v18, %v795_v15  ;;  %v1122_v37 = vadd.f32 %v1090_v32, %v1058_v26 }
 0x163   : > { %v1025_v23 = vmul.f32 %v1941_v8, %v979_v16 }
 0x164   : > { %v974_v25 = vadd.f32 %v973_v54, %v885_v9 }
 0x165   : > { %v1061_v21 = vadd.f32 %v1951_v17, %v1025_v23 }
 0x166   : > { %v1023_v27 = vmul.f32 %v1941_v8, %v974_v25 }
 0x167   : > { %v1125_v33 = vadd.f32 %v1093_v24, %v1061_v21 }
 0x168   : > { %v1059_v36 = vadd.f32 %v1951_v17, %v1023_v27  ;;  %v981_v44 = vpop.f32.mrf.mxu2 }
 0x169   : > { %v1672_v19 = vpack.c.bf16 %v1125_v33, %v1124_v31  ;;  %v982_v56 = vadd.f32 %v981_v44, %v2059_v34 }
 0x16a   : > { %v1123_v28 = vadd.f32 %v1091_v35, %v1059_v36 }
 0x16b   : > { %1700 = vst [vmem:[%s1975_s27 + $0x60] sm:$0xff] %v1672_v19   ;;  %v1026_v38 = vmul.f32 %v1941_v8, %v982_v56 }
 0x16c   : > { %v1667_v30 = vpack.c.bf16 %v1123_v28, %v1122_v37 }
 0x16d   : > { %v1062_v41 = vadd.f32 %v1951_v17, %v1026_v38 }
 0x16e   : > { %1699 = vst [vmem:[%s1975_s27 + $0x58] sm:$0xff] %v1667_v30  }
 0x16f   : > { %v1126_v47 = vadd.f32 %v1094_v45, %v1062_v41 }
 0x170   : > { %v983_v39 = vpop.f32.mrf.mxu2 }
 0x171   : > { %v984_v40 = vadd.f32 %v983_v39, %v2071_v46 }
 0x173   : > { %v1027_v42 = vmul.f32 %v1941_v8, %v984_v40 }
 0x175   : > { %v1063_v34 = vadd.f32 %v1951_v17, %v1027_v42 }
 0x177   : > { %v1127_v48 = vadd.f32 %v1095_v43, %v1063_v34 }
 0x179   : > { %v1677_v49 = vpack.c.bf16 %v1127_v48, %v1126_v47 }
 0x17b   : > { %1701 = vst [vmem:[%s1975_s27 + $0x68] sm:$0xff] %v1677_v49  }
 0x17c PF: > { %s15_s18 = sadd.s32 1, %s1739_s18  }
 0x17d   : > { %p12_p4 = scmp.ge.s32.totalorder %s15_s18, 4  }
 0x17f   :  { %14 = sbr.rel (!%p12_p4) target bundleno = 1 (0x1), region = 70 }

// kernel: deep_gcn_forward.11
= control target key start
LH: loop header
LB: loop body
LE: loop exit
PB: predicated region body
PF: predicated region fallthrough
CT: control target
= control target key end

     0   :  { %s4941_s25 = smov 0   ;;  %s4943_s26 = smov 0   ;;  %s6266_s0 = inlined_call_operand.vmem [shape: bf16[512,128], index: 0, kind: input, shape index: {}]   ;;  %s6267_s1 = inlined_call_operand.vmem [shape: bf16[2,128,128], index: 1, kind: input, shape index: {}]   ;;  %s6268_s2 = inlined_call_operand.vmem [shape: f32[2,1,128], index: 2, kind: input, shape index: {}, may-alias: {2,5}]   ;;  %s6269_s3 = inlined_call_operand.vmem [shape: f32[2,1,128], index: 3, kind: input, shape index: {}, may-alias: {3,6}]   ;;  %s6270_s4 = inlined_call_operand.vmem [shape: bf16[2,128,128], index: 4, kind: input, shape index: {}]   ;;  %s6271_s5 = inlined_call_operand.vmem [shape: f32[2,1,128], index: 5, kind: input, shape index: {}, may-alias: {2,5}]   ;;  %s6272_s6 = inlined_call_operand.vmem [shape: f32[2,1,128], index: 6, kind: input, shape index: {}, may-alias: {3,6}]   ;;  %s6273_s7 = inlined_call_operand.vmem [shape: bf16[128,1024], index: 7, kind: input, shape index: {}]   ;;  %s6274_s8 = inlined_call_operand.vmem [shape: f32[1,1024], index: 8, kind: input, shape index: {}]   ;;  %s6275_s9 = inlined_call_operand.vmem [shape: f32[1,1024], index: 9, kind: input, shape index: {}]   ;;  %s6276_s10 = inlined_call_operand.vmem [shape: bf16[1024,128], index: 10, kind: input, shape index: {}]   ;;  %s6277_s11 = inlined_call_operand.vmem [shape: f32[1,128], index: 11, kind: input, shape index: {}]   ;;  %s6278_s12 = inlined_call_operand.vmem [shape: bf16[2,512,128], index: 12, kind: output, shape index: {0}]   ;;  %s6279_s13 = inlined_call_operand.vmem [shape: f32[16,128], index: 13, kind: output, shape index: {1}]  }
   0x1   :  { %s4945_s27 = smov 0  }
   0x2 LB: > { %s4954_s28 = sadd.s32 4294967295, %s4869_s27   ;;  %s4956_s29 = sadd.s32 1, %s4869_s27   ;;  %s4869_s27 = sphi %s4945_s27, %s6283_s27   ;;  %s4865_s26 = sphi %s4943_s26, %s6282_s26   ;;  %s4861_s25 = sphi %s4941_s25, %s6281_s25  }
   0x3   : > { %s285_s30 = ssub.s32 %s4869_s27, %s4956_s29  ;;  %s288_s14 = sadd.s32 1, %s4865_s26 }
   0x4   : > { %p286_p0 = scmp.eq.s32.totalorder %s285_s30, 0  ;;  %p298_p1 = scmp.ne.s32.totalorder %s4865_s26, %s4861_s25 }
   0x5   : > { %p299_p2 = scmp.eq.s32.totalorder %s4954_s28, 1  ;;  %p3663_p3 = scmp.ge.s32.totalorder %s4869_s27, 1 }
   0x6   : > { %s4964_s15 = scalar_select %p286_p0, %s4865_s26, %s288_s14  }
   0x7   : > { %p4966_p4 = por %p299_p2, %p298_p1  ;;  %p391_p5 = scmp.lt.s32.totalorder %s4869_s27, 3 }
   0x9   : > { %p392_p6 = pnand %p3663_p3, %p391_p5 }
   0xa   : > { %s3665_s27 = sshll.u32 (!%p392_p6), %s4954_s28, 5  ;;  %p445_p8 = scmp.lt.s32.totalorder (!%p392_p6), %s4954_s28, 1 }
   0xb   : > { %395 = sbr.rel (%p392_p6) target bundleno = 1134 (0x46e), region = 68  ;;  %p439_p7 = scmp.lt.s32.totalorder (!%p392_p6), %s3665_s27, 63 }
  0x10   : > { %v4468_v0 = vld [vmem:[%s6267_s1 + $0x38] sm:$0xff]  ;;  %v4467_v1 = vld [vmem:[%s6267_s1 + $0x30] sm:$0xff]  ;;  %v4466_v2 = vld [vmem:[%s6267_s1 + $0x28] sm:$0xff]  ;;  %s6285_s27 = smov (!%p439_p7, %s3665_s27), 63  ;;  %s4621_s30 = sshll.u32 (%p4966_p4), %s4954_s28, 7 }
  0x11   : > { %641 = vmatpush.bf16.msra.mxu0 %v4468_v0  ;;  %v4465_v3 = vld [vmem:[%s6267_s1 + $0x20] sm:$0xff]  ;;  %v4464_v4 = vld [vmem:[%s6267_s1 + $0x18] sm:$0xff]  ;;  %v4463_v5 = vld [vmem:[%s6267_s1 + $0x10] sm:$0xff]  ;;  %s3666_s21 = sshll.u32 %s6285_s27, 2  ;;  %s429_s27 = sand.u32 1, %s4861_s25  }
  0x12   : > { %v4462_v6 = vld [vmem:[%s6267_s1 + $0x8] sm:$0xff]  ;;  %v4461_v7 = vld [vmem:[%s6267_s1] sm:$0xff]  ;;  %s4998_s14 = scalar_lea.vmem %s6266_s0, %s3666_s21  ;;  %v4476_v13 = vld [vmem:[%s6270_s4 + $0x38] sm:$0xff]  ;;  %s3664_s17 = sshll.u32 %s429_s27, 8 }
  0x13   : > { %v4445_v8 = vld [vmem:[%s4998_s14] sm:$0xff]  ;;  %v4446_v9 = vld [vmem:[%s4998_s14 + $0x8] sm:$0xff]  ;;  %v4447_v10 = vld [vmem:[%s4998_s14 + $0x10] sm:$0xff]  ;;  %914 = vmatpush.bf16.msra.mxu1 %v4476_v13  ;;  %s5134_s25 = scalar_lea.vmem [#allocation2], %s3664_s17  ;;  %s6192_s17 = scalar_lea.vmem (%p4966_p4), %s6278_s12, %s4621_s30 }
  0x14   : > { %v4448_v11 = vld [vmem:[%s4998_s14 + $0x18] sm:$0xff]  ;;  %v4449_v12 = vld [vmem:[%s4998_s14 + $0x20] sm:$0xff]  ;;  %v4450_v14 = vld [vmem:[%s4998_s14 + $0x28] sm:$0xff]  ;;  %s446_s20 = scalar_select %p445_p8, %s4954_s28, 1 }
  0x15   : > { %642 = vmatpush.bf16.msra.mxu0 %v4467_v1  ;;  %v4475_v15 = vld [vmem:[%s6270_s4 + $0x30] sm:$0xff]  ;;  %v4474_v16 = vld [vmem:[%s6270_s4 + $0x28] sm:$0xff]  ;;  %v4473_v17 = vld [vmem:[%s6270_s4 + $0x20] sm:$0xff] }
  0x16   : > { %v4451_v18 = vld [vmem:[%s4998_s14 + $0x30] sm:$0xff]  ;;  %v4472_v19 = vld [vmem:[%s6270_s4 + $0x18] sm:$0xff]  ;;  %v4470_v21 = vld [vmem:[%s6270_s4 + $0x8] sm:$0xff]  ;;  %s3667_s21 = sshll.u32 %s446_s20, 3 }
  0x17   : > { %915 = vmatpush.bf16.msra.mxu1 %v4475_v15  ;;  %v4471_v20 = vld [vmem:[%s6270_s4 + $0x10] sm:$0xff]  ;;  %v4469_v22 = vld [vmem:[%s6270_s4] sm:$0xff]  ;;  %v4452_v23 = vld [vmem:[%s4998_s14 + $0x38] sm:$0xff]  ;;  %s448_s24 = scalar_lea.vmem %s6279_s13, %s3667_s21 }
  0x18   : > { %v4453_v24 = vld [vmem:[%s4998_s14 + $0x40] sm:$0xff]  ;;  %v4454_v36 = vld [vmem:[%s4998_s14 + $0x48] sm:$0xff]  ;;  %v4455_v46 = vld [vmem:[%s4998_s14 + $0x50] sm:$0xff] }
  0x19   : > { %643 = vmatpush.bf16.msra.mxu0 %v4466_v2  ;;  %v5036_v26 = vld [vmem:[%s6268_s2] ss:$0 sm:$0xff]  ;;  %v4456_v56 = vld [vmem:[%s4998_s14 + $0x58] sm:$0xff] }
  0x1a   : > { %v5042_v28 = vld [vmem:[%s6269_s3] ss:$0 sm:$0xff] }
  0x1b   : > { %916 = vmatpush.bf16.msra.mxu1 %v4474_v16  ;;  %v4457_v2 = vld [vmem:[%s4998_s14 + $0x60] sm:$0xff] }
  0x1d   : > { %644 = vmatpush.bf16.msra.mxu0 %v4465_v3 }
  0x1f   : > { %917 = vmatpush.bf16.msra.mxu1 %v4473_v17 }
  0x21   : > { %645 = vmatpush.bf16.msra.mxu0 %v4464_v4 }
  0x23   : > { %918 = vmatpush.bf16.msra.mxu1 %v4472_v19 }
  0x25   : > { %646 = vmatpush.bf16.msra.mxu0 %v4463_v5 }
  0x27   : > { %919 = vmatpush.bf16.msra.mxu1 %v4471_v20 }
  0x29   : > { %647 = vmatpush.bf16.msra.mxu0 %v4462_v6 }
  0x2b   : > { %920 = vmatpush.bf16.msra.mxu1 %v4470_v21 }
  0x2d   : > { %648 = vmatpush.bf16.msra.mxu0 %v4461_v7 }
  0x2f   : > { %921 = vmatpush.bf16.msra.mxu1 %v4469_v22  ;;  %v4459_v22 = vld [vmem:[%s4998_s14 + $0x70] sm:$0xff] }
  0x30   : > { %649 = vmatmul.bf16.vlgmr.msra.gmra.mxu0 %v4445_v8 }
  0x40   : > { %654 = vmatmul.bf16.gmra.mxu0 %v4446_v9 }
  0x50   : > { %659 = vmatmul.bf16.gmra.mxu0 %v4447_v10 }
  0x60   : > { %664 = vmatmul.bf16.gmra.mxu0 %v4448_v11 }
  0x70   : > { %669 = vmatmul.bf16.gmra.mxu0 %v4449_v12  ;;  %v4458_v12 = vld [vmem:[%s4998_s14 + $0x68] sm:$0xff] }
  0x80   : > { %674 = vmatmul.bf16.gmra.mxu0 %v4450_v14 }
  0x90   : > { %679 = vmatmul.bf16.gmra.mxu0 %v4451_v18 }
  0xa0   : > { %684 = vmatmul.bf16.gmra.mxu0 %v4452_v23 }
  0xad   : > { %v650_v25 = vpop.f32.mrf.mxu0 }
  0xae   : > { %v734_v27 = vmul.f32 %v5036_v26, %v650_v25 }
  0xb0   : > { %689 = vmatmul.bf16.gmra.mxu0 %v4453_v24  ;;  %v770_v30 = vadd.f32 %v5042_v28, %v734_v27  ;;  %v4484_v24 = vld [vmem:[%s6267_s1 + $0x78] sm:$0xff]  ;;  %v4483_v27 = vld [vmem:[%s6267_s1 + $0x70] sm:$0xff] }
  0xb1   : > { %1364 = vmatpush.bf16.msra.mxu2 %v4484_v24 }
  0xb2   : > { %v802_v33 = vmax.f32 %v770_v30, 0.0 }
  0xb5   : > { %v652_v29 = vpop.f32.mrf.mxu0  ;;  %1365 = vmatpush.bf16.msra.mxu2 %v4483_v27  ;;  %v451_v27 = vld [vmem:[%s4998_s14 + $0x8] sm:$0xff]  }
  0xb6   : > { %v735_v31 = vmul.f32 %v5036_v26, %v652_v29 }
  0xb8   : > { %v771_v32 = vadd.f32 %v5042_v28, %v735_v31 }
  0xba   : > { %v803_v34 = vmax.f32 %v771_v32, 0.0  ;;  %v4482_v32 = vld [vmem:[%s6267_s1 + $0x68] sm:$0xff] }
  0xbb   : > { %1366 = vmatpush.bf16.msra.mxu2 %v4482_v32  ;;  %v1077_v32 = vunpack.c.l.bf16 %v451_v27 }
  0xbc   : > { %v834_v35 = vpack.c.bf16 %v803_v34, %v802_v33 }
  0xbd   : > { %v655_v37 = vpop.f32.mrf.mxu0 }
  0xbe   : > { %922 = vmatmul.bf16.vlgmr.msra.gmra.mxu1 %v834_v35  ;;  %v736_v38 = vmul.f32 %v5036_v26, %v655_v37 }
  0xc0   : > { %694 = vmatmul.bf16.gmra.mxu0 %v4454_v36  ;;  %v772_v40 = vadd.f32 %v5042_v28, %v736_v38  ;;  %v4481_v36 = vld [vmem:[%s6267_s1 + $0x60] sm:$0xff]  ;;  %v4460_v38 = vld [vmem:[%s4998_s14 + $0x78] sm:$0xff] }
  0xc1   : > { %1367 = vmatpush.bf16.msra.mxu2 %v4481_v36 }
  0xc2   : > { %v804_v43 = vmax.f32 %v772_v40, 0.0  ;;  %v4480_v40 = vld [vmem:[%s6267_s1 + $0x58] sm:$0xff] }
  0xc5   : > { %v657_v39 = vpop.f32.mrf.mxu0  ;;  %1368 = vmatpush.bf16.msra.mxu2 %v4480_v40 }
  0xc6   : > { %v737_v41 = vmul.f32 %v5036_v26, %v657_v39 }
  0xc8   : > { %v773_v42 = vadd.f32 %v5042_v28, %v737_v41 }
  0xca   : > { %v805_v44 = vmax.f32 %v773_v42, 0.0  ;;  %v4479_v42 = vld [vmem:[%s6267_s1 + $0x50] sm:$0xff] }
  0xcb   : > { %1369 = vmatpush.bf16.msra.mxu2 %v4479_v42 }
  0xcc   : > { %v835_v45 = vpack.c.bf16 %v805_v44, %v804_v43 }
  0xcd   : > { %v660_v47 = vpop.f32.mrf.mxu0 }
  0xce   : > { %927 = vmatmul.bf16.gmra.mxu1 %v835_v45  ;;  %v738_v48 = vmul.f32 %v5036_v26, %v660_v47 }
  0xd0   : > { %699 = vmatmul.bf16.gmra.mxu0 %v4455_v46  ;;  %v774_v50 = vadd.f32 %v5042_v28, %v738_v48  ;;  %v4478_v46 = vld [vmem:[%s6267_s1 + $0x48] sm:$0xff] }
  0xd1   : > { %1370 = vmatpush.bf16.msra.mxu2 %v4478_v46 }
  0xd2   : > { %v806_v53 = vmax.f32 %v774_v50, 0.0  ;;  %v4477_v50 = vld [vmem:[%s6267_s1 + $0x40] sm:$0xff] }
  0xd5   : > { %v662_v49 = vpop.f32.mrf.mxu0  ;;  %1371 = vmatpush.bf16.msra.mxu2 %v4477_v50 }
  0xd6   : > { %v739_v51 = vmul.f32 %v5036_v26, %v662_v49 }
  0xd8   : > { %v775_v52 = vadd.f32 %v5042_v28, %v739_v51 }
  0xda   : > { %v807_v54 = vmax.f32 %v775_v52, 0.0 }
  0xdc   : > { %v836_v55 = vpack.c.bf16 %v807_v54, %v806_v53 }
  0xdd   : > { %v665_v57 = vpop.f32.mrf.mxu0 }
  0xde   : > { %932 = vmatmul.bf16.gmra.mxu1 %v836_v55  ;;  %v740_v58 = vmul.f32 %v5036_v26, %v665_v57 }
  0xe0   : > { %704 = vmatmul.bf16.gmra.mxu0 %v4456_v56  ;;  %v776_v60 = vadd.f32 %v5042_v28, %v740_v58  ;;  %v5113_v58 = vld [vmem:[%s6271_s5] ss:$0 sm:$0xff] }
  0xe2   : > { %v808_v63 = vmax.f32 %v776_v60, 0.0 }
  0xe5   : > { %v667_v59 = vpop.f32.mrf.mxu0 }
  0xe6   : > { %v741_v61 = vmul.f32 %v5036_v26, %v667_v59 }
  0xe8   : > { %v777_v62 = vadd.f32 %v5042_v28, %v741_v61 }
  0xea   : > { %v809_v0 = vmax.f32 %v777_v62, 0.0 }
  0xec   : > { %v837_v1 = vpack.c.bf16 %v809_v0, %v808_v63  ;;  %v5119_v63 = vld [vmem:[%s6272_s6] ss:$0 sm:$0xff] }
  0xed   : > { %v670_v3 = vpop.f32.mrf.mxu0 }
  0xee   : > { %937 = vmatmul.bf16.gmra.mxu1 %v837_v1  ;;  %v742_v4 = vmul.f32 %v5036_v26, %v670_v3  ;;  %v449_v1 = vld [vmem:[%s4998_s14] sm:$0xff]  }
  0xf0   : > { %709 = vmatmul.bf16.gmra.mxu0 %v4457_v2  ;;  %v778_v6 = vadd.f32 %v5042_v28, %v742_v4  ;;  %v1075_v4 = vunpack.c.l.bf16 %v449_v1 }
  0xf2   : > { %v810_v9 = vmax.f32 %v778_v6, 0.0 }
  0xf5   : > { %v672_v5 = vpop.f32.mrf.mxu0 }
  0xf6   : > { %v743_v7 = vmul.f32 %v5036_v26, %v672_v5 }
  0xf8   : > { %v779_v8 = vadd.f32 %v5042_v28, %v743_v7 }
  0xfa   : > { %v811_v10 = vmax.f32 %v779_v8, 0.0 }
  0xfc   : > { %v838_v11 = vpack.c.bf16 %v811_v10, %v810_v9  ;;  %v1076_v9 = vunpack.c.h.bf16 %v449_v1 }
  0xfd   : > { %v675_v13 = vpop.f32.mrf.mxu0 }
  0xfe   : > { %942 = vmatmul.bf16.gmra.mxu1 %v838_v11  ;;  %v744_v14 = vmul.f32 %v5036_v26, %v675_v13 }
 0x100   : > { %714 = vmatmul.bf16.gmra.mxu0 %v4458_v12  ;;  %v780_v16 = vadd.f32 %v5042_v28, %v744_v14 }
 0x102   : > { %v812_v19 = vmax.f32 %v780_v16, 0.0 }
 0x105   : > { %v677_v15 = vpop.f32.mrf.mxu0 }
 0x106   : > { %v745_v17 = vmul.f32 %v5036_v26, %v677_v15 }
 0x108   : > { %v781_v18 = vadd.f32 %v5042_v28, %v745_v17 }
 0x10a   : > { %v813_v20 = vmax.f32 %v781_v18, 0.0 }
 0x10c   : > { %v839_v21 = vpack.c.bf16 %v813_v20, %v812_v19 }
 0x10d   : > { %v680_v23 = vpop.f32.mrf.mxu0 }
 0x10e   : > { %947 = vmatmul.bf16.gmra.mxu1 %v839_v21  ;;  %v746_v25 = vmul.f32 %v5036_v26, %v680_v23 }
 0x110   : > { %719 = vmatmul.bf16.gmra.mxu0 %v4459_v22  ;;  %v782_v30 = vadd.f32 %v5042_v28, %v746_v25 }
 0x112   : > { %v814_v34 = vmax.f32 %v782_v30, 0.0 }
 0x115   : > { %v682_v29 = vpop.f32.mrf.mxu0 }
 0x116   : > { %v747_v31 = vmul.f32 %v5036_v26, %v682_v29 }
 0x118   : > { %v783_v33 = vadd.f32 %v5042_v28, %v747_v31 }
 0x11a   : > { %v815_v35 = vmax.f32 %v783_v33, 0.0 }
 0x11c   : > { %v840_v37 = vpack.c.bf16 %v815_v35, %v814_v34 }
 0x11d   : > { %v685_v39 = vpop.f32.mrf.mxu0 }
 0x11e   : > { %952 = vmatmul.bf16.gmra.mxu1 %v840_v37  ;;  %v748_v41 = vmul.f32 %v5036_v26, %v685_v39  ;;  %v1078_v37 = vunpack.c.h.bf16 %v451_v27 }
 0x120   : > { %724 = vmatmul.bf16.gmra.mxu0 %v4460_v38  ;;  %v784_v44 = vadd.f32 %v5042_v28, %v748_v41 }
 0x122   : > { %v816_v48 = vmax.f32 %v784_v44, 0.0 }
 0x125   : > { %v687_v43 = vpop.f32.mrf.mxu0 }
 0x126   : > { %v749_v45 = vmul.f32 %v5036_v26, %v687_v43 }
 0x128   : > { %v785_v47 = vadd.f32 %v5042_v28, %v749_v45 }
 0x12a   : > { %v817_v49 = vmax.f32 %v785_v47, 0.0 }
 0x12c   : > { %v841_v51 = vpack.c.bf16 %v817_v49, %v816_v48 }
 0x12d   : > { %v690_v52 = vpop.f32.mrf.mxu0 }
 0x12e   : > { %957 = vmatmul.bf16.gmra.mxu1 %v841_v51  ;;  %v750_v53 = vmul.f32 %v5036_v26, %v690_v52 }
 0x130   : > { %v786_v55 = vadd.f32 %v5042_v28, %v750_v53 }
 0x132   : > { %v818_v59 = vmax.f32 %v786_v55, 0.0 }
 0x135   : > { %v692_v54 = vpop.f32.mrf.mxu0 }
 0x136   : > { %v751_v56 = vmul.f32 %v5036_v26, %v692_v54  ;;  %v453_v54 = vld [vmem:[%s4998_s14 + $0x10] sm:$0xff]  }
 0x137   : > { %v1080_v1 = vunpack.c.h.bf16 %v453_v54 }
 0x138   : > { %v787_v57 = vadd.f32 %v5042_v28, %v751_v56 }
 0x13a   : > { %v819_v60 = vmax.f32 %v787_v57, 0.0 }
 0x13b   : > { %v923_v61 = vpop.f32.mrf.mxu1 }
 0x13c   : > { %v1007_v62 = vmul.f32 %v5113_v58, %v923_v61  ;;  %v842_v0 = vpack.c.bf16 %v819_v60, %v818_v59  ;;  %v1079_v59 = vunpack.c.l.bf16 %v453_v54 }
 0x13d   : > { %v695_v2 = vpop.f32.mrf.mxu0 }
 0x13e   : > { %962 = vmatmul.bf16.gmra.mxu1 %v842_v0  ;;  %v1043_v3 = vadd.f32 %v5119_v63, %v1007_v62  ;;  %v752_v5 = vmul.f32 %v5036_v26, %v695_v2 }
 0x140   : > { %v1107_v7 = vadd.f32 %v1075_v4, %v1043_v3  ;;  %v788_v11 = vadd.f32 %v5042_v28, %v752_v5 }
 0x142   : > { %v5130_v16 = vpack.c.bf16 %v1107_v7, %v1107_v7  ;;  %v820_v17 = vmax.f32 %v788_v11, 0.0 }
 0x143   : > { %v925_v6 = vpop.f32.mrf.mxu1 }
 0x144   : > { %v1008_v8 = vmul.f32 %v5113_v58, %v925_v6  ;;  %v1252_v24 = vunpack.c.l.b16 %v5130_v16 }
 0x145   : > { %v697_v10 = vpop.f32.mrf.mxu0 }
 0x146   : > { %v1044_v12 = vadd.f32 %v5119_v63, %v1008_v8  ;;  %v753_v13 = vmul.f32 %v5036_v26, %v697_v10 }
 0x148   : > { %v1108_v14 = vadd.f32 %v1076_v9, %v1044_v12  ;;  %v789_v15 = vadd.f32 %v5042_v28, %v753_v13 }
 0x14a   : > { %v4625_v18 = vpack.c.bf16 %v1108_v14, %v1107_v7  ;;  %v821_v19 = vmax.f32 %v789_v15, 0.0  ;;  %v5132_v20 = vpack.c.bf16 %v1108_v14, %v1108_v14 }
 0x14b   : > { %v928_v21 = vpop.f32.mrf.mxu1 }
 0x14c   : > { %4626 = vst [vmem:[%s5134_s25] sm:$0xff] %v4625_v18   ;;  %v1009_v22 = vmul.f32 %v5113_v58, %v928_v21  ;;  %v843_v23 = vpack.c.bf16 %v821_v19, %v820_v17  ;;  %v1253_v25 = vunpack.c.l.b16 %v5132_v20  ;;  %v455_v19 = vld [vmem:[%s4998_s14 + $0x18] sm:$0xff]  }
 0x14d   : > { %v700_v29 = vpop.f32.mrf.mxu0 }
 0x14e   : > { %967 = vmatmul.bf16.gmra.mxu1 %v843_v23  ;;  %v1284_v30 = vpack.c.b16 %v1253_v25, %v1252_v24  ;;  %v1045_v31 = vadd.f32 %v5119_v63, %v1009_v22  ;;  %v754_v33 = vmul.f32 %v5036_v26, %v700_v29  ;;  %v1081_v24 = vunpack.c.l.bf16 %v455_v19 }
 0x150   : > { %1372 = vmatmul.bf16.vlgmr.msra.gmra.mxu2 %v1284_v30  ;;  %v1109_v35 = vadd.f32 %v1077_v32, %v1045_v31  ;;  %v790_v39 = vadd.f32 %v5042_v28, %v754_v33  ;;  %v1082_v31 = vunpack.c.h.bf16 %v455_v19 }
 0x152   : > { %v5148_v44 = vpack.c.bf16 %v1109_v35, %v1109_v35  ;;  %v822_v45 = vmax.f32 %v790_v39, 0.0 }
 0x153   : > { %v930_v34 = vpop.f32.mrf.mxu1 }
 0x154   : > { %v1010_v36 = vmul.f32 %v5113_v58, %v930_v34  ;;  %v1254_v52 = vunpack.c.l.b16 %v5148_v44 }
 0x155   : > { %v702_v38 = vpop.f32.mrf.mxu0 }
 0x156   : > { %v1046_v40 = vadd.f32 %v5119_v63, %v1010_v36  ;;  %v755_v41 = vmul.f32 %v5036_v26, %v702_v38 }
 0x158   : > { %v1110_v42 = vadd.f32 %v1078_v37, %v1046_v40  ;;  %v791_v43 = vadd.f32 %v5042_v28, %v755_v41 }
 0x15a   : > { %v4630_v46 = vpack.c.bf16 %v1110_v42, %v1109_v35  ;;  %v823_v47 = vmax.f32 %v791_v43, 0.0  ;;  %v5150_v48 = vpack.c.bf16 %v1110_v42, %v1110_v42 }
 0x15b   : > { %v933_v49 = vpop.f32.mrf.mxu1 }
 0x15c   : > { %4782 = vst [vmem:[%s5134_s25 + $0x8] sm:$0xff] %v4630_v46   ;;  %v1011_v50 = vmul.f32 %v5113_v58, %v933_v49  ;;  %v844_v51 = vpack.c.bf16 %v823_v47, %v822_v45  ;;  %v1255_v53 = vunpack.c.l.b16 %v5150_v48 }
 0x15d   : > { %v705_v55 = vpop.f32.mrf.mxu0 }
 0x15e   : > { %972 = vmatmul.bf16.gmra.mxu1 %v844_v51  ;;  %v1285_v56 = vpack.c.b16 %v1255_v53, %v1254_v52  ;;  %v1047_v57 = vadd.f32 %v5119_v63, %v1011_v50  ;;  %v756_v60 = vmul.f32 %v5036_v26, %v705_v55  ;;  %v457_v50 = vld [vmem:[%s4998_s14 + $0x20] sm:$0xff]  }
 0x15f   : > { %v1083_v54 = vunpack.c.l.bf16 %v457_v50 }
 0x160   : > { %1377 = vmatmul.bf16.gmra.mxu2 %v1285_v56  ;;  %v1111_v62 = vadd.f32 %v1079_v59, %v1047_v57  ;;  %v792_v3 = vadd.f32 %v5042_v28, %v756_v60 }
 0x162   : > { %v5164_v8 = vpack.c.bf16 %v1111_v62, %v1111_v62  ;;  %v824_v9 = vmax.f32 %v792_v3, 0.0 }
 0x163   : > { %v935_v61 = vpop.f32.mrf.mxu1 }
 0x164   : > { %v1012_v0 = vmul.f32 %v5113_v58, %v935_v61  ;;  %v1256_v17 = vunpack.c.l.b16 %v5164_v8  ;;  %v1084_v61 = vunpack.c.h.bf16 %v457_v50  ;;  %v461_v50 = vld [vmem:[%s4998_s14 + $0x30] sm:$0xff]  }
 0x165   : > { %v707_v2 = vpop.f32.mrf.mxu0 }
 0x166   : > { %v1048_v4 = vadd.f32 %v5119_v63, %v1012_v0  ;;  %v757_v5 = vmul.f32 %v5036_v26, %v707_v2 }
 0x168   : > { %v1112_v6 = vadd.f32 %v1080_v1, %v1048_v4  ;;  %v793_v7 = vadd.f32 %v5042_v28, %v757_v5 }
 0x16a   : > { %v4635_v10 = vpack.c.bf16 %v1112_v6, %v1111_v62  ;;  %v825_v11 = vmax.f32 %v793_v7, 0.0  ;;  %v5166_v12 = vpack.c.bf16 %v1112_v6, %v1112_v6 }
 0x16b   : > { %v938_v13 = vpop.f32.mrf.mxu1 }
 0x16c   : > { %4783 = vst [vmem:[%s5134_s25 + $0x10] sm:$0xff] %v4635_v10   ;;  %v1013_v14 = vmul.f32 %v5113_v58, %v938_v13  ;;  %v845_v15 = vpack.c.bf16 %v825_v11, %v824_v9  ;;  %v1257_v18 = vunpack.c.l.b16 %v5166_v12 }
 0x16d   : > { %v710_v21 = vpop.f32.mrf.mxu0 }
 0x16e   : > { %977 = vmatmul.bf16.gmra.mxu1 %v845_v15  ;;  %v1286_v22 = vpack.c.b16 %v1257_v18, %v1256_v17  ;;  %v1049_v23 = vadd.f32 %v5119_v63, %v1013_v14  ;;  %v758_v25 = vmul.f32 %v5036_v26, %v710_v21  ;;  %v459_v17 = vld [vmem:[%s4998_s14 + $0x28] sm:$0xff]  }
 0x170   : > { %1382 = vmatmul.bf16.gmra.mxu2 %v1286_v22  ;;  %v1113_v29 = vadd.f32 %v1081_v24, %v1049_v23  ;;  %v794_v33 = vadd.f32 %v5042_v28, %v758_v25  ;;  %v1085_v22 = vunpack.c.l.bf16 %v459_v17 }
 0x172   : > { %v5180_v38 = vpack.c.bf16 %v1113_v29, %v1113_v29  ;;  %v826_v39 = vmax.f32 %v794_v33, 0.0 }
 0x173   : > { %v940_v27 = vpop.f32.mrf.mxu1 }
 0x174   : > { %v1014_v30 = vmul.f32 %v5113_v58, %v940_v27  ;;  %v1258_v47 = vunpack.c.l.b16 %v5180_v38 }
 0x175   : > { %v712_v32 = vpop.f32.mrf.mxu0 }
 0x176   : > { %v1050_v34 = vadd.f32 %v5119_v63, %v1014_v30  ;;  %v759_v35 = vmul.f32 %v5036_v26, %v712_v32  ;;  %v1086_v30 = vunpack.c.h.bf16 %v459_v17 }
 0x178   : > { %v1114_v36 = vadd.f32 %v1082_v31, %v1050_v34  ;;  %v795_v37 = vadd.f32 %v5042_v28, %v759_v35 }
 0x17a   : > { %v4640_v40 = vpack.c.bf16 %v1114_v36, %v1113_v29  ;;  %v827_v41 = vmax.f32 %v795_v37, 0.0  ;;  %v5182_v42 = vpack.c.bf16 %v1114_v36, %v1114_v36 }
 0x17b   : > { %v943_v43 = vpop.f32.mrf.mxu1 }
 0x17c   : > { %4784 = vst [vmem:[%s5134_s25 + $0x18] sm:$0xff] %v4640_v40   ;;  %v1015_v45 = vmul.f32 %v5113_v58, %v943_v43  ;;  %v846_v46 = vpack.c.bf16 %v827_v41, %v826_v39  ;;  %v1259_v49 = vunpack.c.l.b16 %v5182_v42 }
 0x17d   : > { %v715_v51 = vpop.f32.mrf.mxu0 }
 0x17e   : > { %982 = vmatmul.bf16.gmra.mxu1 %v846_v46  ;;  %v1287_v52 = vpack.c.b16 %v1259_v49, %v1258_v47  ;;  %v1051_v53 = vadd.f32 %v5119_v63, %v1015_v45  ;;  %v760_v55 = vmul.f32 %v5036_v26, %v715_v51 }
 0x180   : > { %1387 = vmatmul.bf16.gmra.mxu2 %v1287_v52  ;;  %v1115_v57 = vadd.f32 %v1083_v54, %v1051_v53  ;;  %v796_v59 = vadd.f32 %v5042_v28, %v760_v55  ;;  %v1087_v54 = vunpack.c.l.bf16 %v461_v50 }
 0x182   : > { %v828_v2 = vmax.f32 %v796_v59, 0.0  ;;  %v5196_v5 = vpack.c.bf16 %v1115_v57, %v1115_v57 }
 0x183   : > { %v945_v56 = vpop.f32.mrf.mxu1 }
 0x184   : > { %v1016_v60 = vmul.f32 %v5113_v58, %v945_v56  ;;  %v1260_v14 = vunpack.c.l.b16 %v5196_v5 }
 0x185   : > { %v717_v62 = vpop.f32.mrf.mxu0 }
 0x186   : > { %v1052_v0 = vadd.f32 %v5119_v63, %v1016_v60  ;;  %v761_v1 = vmul.f32 %v5036_v26, %v717_v62  ;;  %v1088_v62 = vunpack.c.h.bf16 %v461_v50  ;;  %v465_v50 = vld [vmem:[%s4998_s14 + $0x40] sm:$0xff]  }
 0x188   : > { %v1116_v3 = vadd.f32 %v1084_v61, %v1052_v0  ;;  %v797_v4 = vadd.f32 %v5042_v28, %v761_v1 }
 0x18a   : > { %v4645_v6 = vpack.c.bf16 %v1116_v3, %v1115_v57  ;;  %v829_v7 = vmax.f32 %v797_v4, 0.0  ;;  %v5198_v9 = vpack.c.bf16 %v1116_v3, %v1116_v3  ;;  %v4492_v57 = vld [vmem:[%s6270_s4 + $0x78] sm:$0xff]  ;;  %v4491_v3 = vld [vmem:[%s6270_s4 + $0x70] sm:$0xff] }
 0x18b   : > { %v948_v10 = vpop.f32.mrf.mxu1  ;;  %1640 = vmatpush.bf16.msra.mxu3 %v4492_v57 }
 0x18c   : > { %4785 = vst [vmem:[%s5134_s25 + $0x20] sm:$0xff] %v4645_v6   ;;  %v1017_v11 = vmul.f32 %v5113_v58, %v948_v10  ;;  %v847_v13 = vpack.c.bf16 %v829_v7, %v828_v2  ;;  %v1261_v15 = vunpack.c.l.b16 %v5198_v9 }
 0x18d   : > { %v720_v18 = vpop.f32.mrf.mxu0 }
 0x18e   : > { %987 = vmatmul.bf16.gmra.mxu1 %v847_v13  ;;  %v1288_v19 = vpack.c.b16 %v1261_v15, %v1260_v14  ;;  %v1053_v21 = vadd.f32 %v5119_v63, %v1017_v11  ;;  %v762_v23 = vmul.f32 %v5036_v26, %v720_v18 }
 0x18f   : > { %1641 = vmatpush.bf16.msra.mxu3 %v4491_v3  ;;  %v467_v3 = vld [vmem:[%s4998_s14 + $0x48] sm:$0xff]  }
 0x190   : > { %1392 = vmatmul.bf16.gmra.mxu2 %v1288_v19  ;;  %v1117_v25 = vadd.f32 %v1085_v22, %v1053_v21  ;;  %v798_v27 = vadd.f32 %v5042_v28, %v762_v23  ;;  %v463_v21 = vld [vmem:[%s4998_s14 + $0x38] sm:$0xff]   ;;  %v4489_v23 = vld [vmem:[%s6270_s4 + $0x60] sm:$0xff] }
 0x192   : > { %v830_v34 = vmax.f32 %v798_v27, 0.0  ;;  %v5212_v37 = vpack.c.bf16 %v1117_v25, %v1117_v25 }
 0x193   : > { %v950_v24 = vpop.f32.mrf.mxu1 }
 0x194   : > { %v1018_v29 = vmul.f32 %v5113_v58, %v950_v24  ;;  %v1262_v47 = vunpack.c.l.b16 %v5212_v37 }
 0x195   : > { %v722_v31 = vpop.f32.mrf.mxu0 }
 0x196   : > { %v1054_v32 = vadd.f32 %v5119_v63, %v1018_v29  ;;  %v763_v33 = vmul.f32 %v5036_v26, %v722_v31  ;;  %v4488_v29 = vld [vmem:[%s6270_s4 + $0x58] sm:$0xff] }
 0x198   : > { %v1118_v35 = vadd.f32 %v1086_v30, %v1054_v32  ;;  %v799_v36 = vadd.f32 %v5042_v28, %v763_v33  ;;  %v1090_v32 = vunpack.c.h.bf16 %v463_v21 }
 0x19a   : > { %v4650_v39 = vpack.c.bf16 %v1118_v35, %v1117_v25  ;;  %v831_v40 = vmax.f32 %v799_v36, 0.0  ;;  %v5214_v41 = vpack.c.bf16 %v1118_v35, %v1118_v35  ;;  %v1089_v25 = vunpack.c.l.bf16 %v463_v21  ;;  %v5290_v21 = vld [vmem:[%s6268_s2 + $0x1] ss:$0 sm:$0xff] }
 0x19b   : > { %v953_v43 = vpop.f32.mrf.mxu1 }
 0x19c   : > { %4786 = vst [vmem:[%s5134_s25 + $0x28] sm:$0xff] %v4650_v39   ;;  %v1019_v45 = vmul.f32 %v5113_v58, %v953_v43  ;;  %v848_v46 = vpack.c.bf16 %v831_v40, %v830_v34  ;;  %v1263_v49 = vunpack.c.l.b16 %v5214_v41  ;;  %v4487_v34 = vld [vmem:[%s6270_s4 + $0x50] sm:$0xff] }
 0x19d   : > { %v725_v51 = vpop.f32.mrf.mxu0 }
 0x19e   : > { %992 = vmatmul.bf16.gmra.mxu1 %v848_v46  ;;  %v1289_v52 = vpack.c.b16 %v1263_v49, %v1262_v47  ;;  %v1055_v53 = vadd.f32 %v5119_v63, %v1019_v45  ;;  %v764_v55 = vmul.f32 %v5036_v26, %v725_v51  ;;  %v4486_v45 = vld [vmem:[%s6270_s4 + $0x48] sm:$0xff] }
 0x1a0   : > { %1397 = vmatmul.bf16.gmra.mxu2 %v1289_v52  ;;  %v1119_v59 = vadd.f32 %v1087_v54, %v1055_v53  ;;  %v800_v60 = vadd.f32 %v5042_v28, %v764_v55  ;;  %v4485_v52 = vld [vmem:[%s6270_s4 + $0x40] sm:$0xff]  ;;  %v1091_v54 = vunpack.c.l.bf16 %v465_v50 }
 0x1a2   : > { %v832_v4 = vmax.f32 %v800_v60, 0.0  ;;  %v5234_v10 = vpack.c.bf16 %v1119_v59, %v1119_v59 }
 0x1a3   : > { %v955_v56 = vpop.f32.mrf.mxu1 }
 0x1a4   : > { %v1020_v61 = vmul.f32 %v5113_v58, %v955_v56  ;;  %v1264_v19 = vunpack.c.l.b16 %v5234_v10 }
 0x1a5   : > { %v727_v0 = vpop.f32.mrf.mxu0 }
 0x1a6   : > { %v1056_v1 = vadd.f32 %v5119_v63, %v1020_v61  ;;  %v765_v2 = vmul.f32 %v5036_v26, %v727_v0  ;;  %v4490_v26 = vld [vmem:[%s6270_s4 + $0x68] sm:$0xff] }
 0x1a7   : > { %1642 = vmatpush.bf16.msra.mxu3 %v4490_v26 }
 0x1a8   : > { %v1120_v6 = vadd.f32 %v1088_v62, %v1056_v1  ;;  %v801_v7 = vadd.f32 %v5042_v28, %v765_v2 }
 0x1aa   : > { %v4655_v11 = vpack.c.bf16 %v1120_v6, %v1119_v59  ;;  %v833_v13 = vmax.f32 %v801_v7, 0.0  ;;  %v5236_v14 = vpack.c.bf16 %v1120_v6, %v1120_v6  ;;  %v1092_v59 = vunpack.c.h.bf16 %v465_v50 }
 0x1ab   : > { %v958_v15 = vpop.f32.mrf.mxu1  ;;  %1643 = vmatpush.bf16.msra.mxu3 %v4489_v23 }
 0x1ac   : > { %4787 = vst [vmem:[%s5134_s25 + $0x30] sm:$0xff] %v4655_v11   ;;  %v1021_v17 = vmul.f32 %v5113_v58, %v958_v15  ;;  %v849_v18 = vpack.c.bf16 %v833_v13, %v832_v4  ;;  %v1265_v28 = vunpack.c.l.b16 %v5236_v14  ;;  %v1093_v15 = vunpack.c.l.bf16 %v467_v3 }
 0x1ae   : > { %997 = vmatmul.bf16.gmra.mxu1 %v849_v18  ;;  %v1290_v22 = vpack.c.b16 %v1265_v28, %v1264_v19  ;;  %v1057_v24 = vadd.f32 %v5119_v63, %v1021_v17  ;;  %v1094_v28 = vunpack.c.h.bf16 %v467_v3 }
 0x1af   : > { %1644 = vmatpush.bf16.msra.mxu3 %v4488_v29 }
 0x1b0   : > { %1402 = vmatmul.bf16.gmra.mxu2 %v1290_v22  ;;  %v1121_v30 = vadd.f32 %v1089_v25, %v1057_v24 }
 0x1b2   : > { %v5258_v36 = vpack.c.bf16 %v1121_v30, %v1121_v30 }
 0x1b3   : > { %v960_v27 = vpop.f32.mrf.mxu1  ;;  %1645 = vmatpush.bf16.msra.mxu3 %v4487_v34 }
 0x1b4   : > { %v1022_v31 = vmul.f32 %v5113_v58, %v960_v27  ;;  %v1266_v47 = vunpack.c.l.b16 %v5258_v36  ;;  %v5299_v27 = vld [vmem:[%s6269_s3 + $0x1] ss:$0 sm:$0xff] }
 0x1b6   : > { %v1058_v33 = vadd.f32 %v5119_v63, %v1022_v31 }
 0x1b7   : > { %1646 = vmatpush.bf16.msra.mxu3 %v4486_v45 }
 0x1b8   : > { %v1122_v35 = vadd.f32 %v1090_v32, %v1058_v33 }
 0x1ba   : > { %v4660_v39 = vpack.c.bf16 %v1122_v35, %v1121_v30  ;;  %v5260_v40 = vpack.c.bf16 %v1122_v35, %v1122_v35  ;;  %v469_v35 = vld [vmem:[%s4998_s14 + $0x50] sm:$0xff]  }
 0x1bb   : > { %v963_v43 = vpop.f32.mrf.mxu1  ;;  %1647 = vmatpush.bf16.msra.mxu3 %v4485_v52  ;;  %v1095_v50 = vunpack.c.l.bf16 %v469_v35 }
 0x1bc   : > { %4788 = vst [vmem:[%s5134_s25 + $0x38] sm:$0xff] %v4660_v39   ;;  %v1023_v46 = vmul.f32 %v5113_v58, %v963_v43  ;;  %v1267_v49 = vunpack.c.l.b16 %v5260_v40 }
 0x1be   : > { %v1291_v51 = vpack.c.b16 %v1267_v49, %v1266_v47  ;;  %v1059_v53 = vadd.f32 %v5119_v63, %v1023_v46 }
 0x1c0   : > { %1407 = vmatmul.bf16.gmra.mxu2 %v1291_v51  ;;  %v1123_v56 = vadd.f32 %v1091_v54, %v1059_v53 }
 0x1c2   : > { %v5276_v62 = vpack.c.bf16 %v1123_v56, %v1123_v56 }
 0x1c3   : > { %v965_v55 = vpop.f32.mrf.mxu1 }
 0x1c4   : > { %v1024_v57 = vmul.f32 %v5113_v58, %v965_v55  ;;  %v1268_v6 = vunpack.c.l.b16 %v5276_v62 }
 0x1c6   : > { %v1060_v60 = vadd.f32 %v5119_v63, %v1024_v57 }
 0x1c8   : > { %v1124_v61 = vadd.f32 %v1092_v59, %v1060_v60  ;;  %v1096_v59 = vunpack.c.h.bf16 %v469_v35 }
 0x1ca   : > { %v4665_v0 = vpack.c.bf16 %v1124_v61, %v1123_v56  ;;  %v5278_v1 = vpack.c.bf16 %v1124_v61, %v1124_v61 }
 0x1cb   : > { %v968_v2 = vpop.f32.mrf.mxu1 }
 0x1cc   : > { %4789 = vst [vmem:[%s5134_s25 + $0x40] sm:$0xff] %v4665_v0   ;;  %v1025_v4 = vmul.f32 %v5113_v58, %v968_v2  ;;  %v1269_v7 = vunpack.c.l.b16 %v5278_v1 }
 0x1ce   : > { %v1292_v11 = vpack.c.b16 %v1269_v7, %v1268_v6  ;;  %v1061_v13 = vadd.f32 %v5119_v63, %v1025_v4 }
 0x1d0   : > { %1412 = vmatmul.bf16.gmra.mxu2 %v1292_v11  ;;  %v1125_v26 = vadd.f32 %v1093_v15, %v1061_v13  ;;  %v471_v15 = vld [vmem:[%s4998_s14 + $0x58] sm:$0xff]  }
 0x1d2   : > { %v5293_v23 = vpack.c.bf16 %v1125_v26, %v1125_v26 }
 0x1d3   : > { %v970_v17 = vpop.f32.mrf.mxu1  ;;  %v1373_v18 = vpop.f32.mrf.mxu2 }
 0x1d4   : > { %v1026_v19 = vmul.f32 %v5113_v58, %v970_v17  ;;  %v1458_v25 = vmul.f32 %v5290_v21, %v1373_v18  ;;  %v1270_v33 = vunpack.c.l.b16 %v5293_v23 }
 0x1d6   : > { %v1062_v22 = vadd.f32 %v5119_v63, %v1026_v19  ;;  %v1495_v34 = vadd.f32 %v5299_v27, %v1458_v25 }
 0x1d8   : > { %v1126_v24 = vadd.f32 %v1094_v28, %v1062_v22  ;;  %v1527_v51 = vmax.f32 %v1495_v34, 0.0 }
 0x1da   : > { %v4670_v29 = vpack.c.bf16 %v1126_v24, %v1125_v26  ;;  %v5301_v30 = vpack.c.bf16 %v1126_v24, %v1126_v24  ;;  %v1097_v24 = vunpack.c.l.bf16 %v471_v15 }
 0x1db   : > { %v973_v31 = vpop.f32.mrf.mxu1  ;;  %v1375_v32 = vpop.f32.mrf.mxu2 }
 0x1dc   : > { %4790 = vst [vmem:[%s5134_s25 + $0x48] sm:$0xff] %v4670_v29   ;;  %v1027_v39 = vmul.f32 %v5113_v58, %v973_v31  ;;  %v1459_v43 = vmul.f32 %v5290_v21, %v1375_v32  ;;  %v1271_v45 = vunpack.c.l.b16 %v5301_v30 }
 0x1de   : > { %v1496_v46 = vadd.f32 %v5299_v27, %v1459_v43  ;;  %v1293_v47 = vpack.c.b16 %v1271_v45, %v1270_v33  ;;  %v1063_v49 = vadd.f32 %v5119_v63, %v1027_v39  ;;  %v1098_v39 = vunpack.c.h.bf16 %v471_v15 }
 0x1e0   : > { %1417 = vmatmul.bf16.gmra.mxu2 %v1293_v47  ;;  %v1528_v52 = vmax.f32 %v1496_v46, 0.0  ;;  %v1127_v54 = vadd.f32 %v1095_v50, %v1063_v49 }
 0x1e2   : > { %v1559_v53 = vpack.c.bf16 %v1528_v52, %v1527_v51  ;;  %v5314_v61 = vpack.c.bf16 %v1127_v54, %v1127_v54 }
 0x1e3   : > { %v975_v55 = vpop.f32.mrf.mxu1  ;;  %v1378_v56 = vpop.f32.mrf.mxu2 }
 0x1e4   : > { %v1028_v57 = vmul.f32 %v5113_v58, %v975_v55  ;;  %1648 = vmatmul.bf16.vlgmr.msra.gmra.mxu3 %v1559_v53  ;;  %v1460_v2 = vmul.f32 %v5290_v21, %v1378_v56  ;;  %v1272_v11 = vunpack.c.l.b16 %v5314_v61  ;;  %v473_v55 = vld [vmem:[%s4998_s14 + $0x60] sm:$0xff]  }
 0x1e6   : > { %v1064_v60 = vadd.f32 %v5119_v63, %v1028_v57  ;;  %v1497_v13 = vadd.f32 %v5299_v27, %v1460_v2 }
 0x1e8   : > { %v1128_v0 = vadd.f32 %v1096_v59, %v1064_v60  ;;  %v1529_v25 = vmax.f32 %v1497_v13, 0.0 }
 0x1ea   : > { %v4675_v3 = vpack.c.bf16 %v1128_v0, %v1127_v54  ;;  %v5317_v4 = vpack.c.bf16 %v1128_v0, %v1128_v0 }
 0x1eb   : > { %v978_v6 = vpop.f32.mrf.mxu1  ;;  %v1380_v7 = vpop.f32.mrf.mxu2 }
 0x1ec   : > { %4791 = vst [vmem:[%s5134_s25 + $0x50] sm:$0xff] %v4675_v3   ;;  %v1029_v26 = vmul.f32 %v5113_v58, %v978_v6  ;;  %v1461_v17 = vmul.f32 %v5290_v21, %v1380_v7  ;;  %v1273_v18 = vunpack.c.l.b16 %v5317_v4  ;;  %v1099_v3 = vunpack.c.l.bf16 %v473_v55 }
 0x1ee   : > { %v1498_v19 = vadd.f32 %v5299_v27, %v1461_v17  ;;  %v1294_v28 = vpack.c.b16 %v1273_v18, %v1272_v11  ;;  %v1065_v22 = vadd.f32 %v5119_v63, %v1029_v26  ;;  %v1100_v18 = vunpack.c.h.bf16 %v473_v55 }
 0x1f0   : > { %1422 = vmatmul.bf16.gmra.mxu2 %v1294_v28  ;;  %v1530_v29 = vmax.f32 %v1498_v19, 0.0  ;;  %v1129_v32 = vadd.f32 %v1097_v24, %v1065_v22 }
 0x1f2   : > { %v1560_v31 = vpack.c.bf16 %v1530_v29, %v1529_v25  ;;  %v5330_v45 = vpack.c.bf16 %v1129_v32, %v1129_v32 }
 0x1f3   : > { %v980_v33 = vpop.f32.mrf.mxu1  ;;  %v1383_v34 = vpop.f32.mrf.mxu2 }
 0x1f4   : > { %v1030_v35 = vmul.f32 %v5113_v58, %v980_v33  ;;  %1653 = vmatmul.bf16.gmra.mxu3 %v1560_v31  ;;  %v1462_v47 = vmul.f32 %v5290_v21, %v1383_v34  ;;  %v1274_v53 = vunpack.c.l.b16 %v5330_v45  ;;  %v475_v31 = vld [vmem:[%s4998_s14 + $0x68] sm:$0xff]  }
 0x1f6   : > { %v1066_v43 = vadd.f32 %v5119_v63, %v1030_v35  ;;  %v1499_v54 = vadd.f32 %v5299_v27, %v1462_v47 }
 0x1f8   : > { %v1130_v46 = vadd.f32 %v1098_v39, %v1066_v43  ;;  %v1531_v6 = vmax.f32 %v1499_v54, 0.0 }
 0x1fa   : > { %v4680_v49 = vpack.c.bf16 %v1130_v46, %v1129_v32  ;;  %v5333_v50 = vpack.c.bf16 %v1130_v46, %v1130_v46 }
 0x1fb   : > { %v983_v51 = vpop.f32.mrf.mxu1  ;;  %v1385_v52 = vpop.f32.mrf.mxu2 }
 0x1fc   : > { %4792 = vst [vmem:[%s5134_s25 + $0x58] sm:$0xff] %v4680_v49   ;;  %v1031_v56 = vmul.f32 %v5113_v58, %v983_v51  ;;  %v1463_v57 = vmul.f32 %v5290_v21, %v1385_v52  ;;  %v1275_v59 = vunpack.c.l.b16 %v5333_v50  ;;  %v1101_v49 = vunpack.c.l.bf16 %v475_v31 }
 0x1fe   : > { %v1500_v60 = vadd.f32 %v5299_v27, %v1463_v57  ;;  %v1295_v0 = vpack.c.b16 %v1275_v59, %v1274_v53  ;;  %v1067_v2 = vadd.f32 %v5119_v63, %v1031_v56 }
 0x200   : > { %1427 = vmatmul.bf16.gmra.mxu2 %v1295_v0  ;;  %v1532_v7 = vmax.f32 %v1500_v60, 0.0  ;;  %v1131_v13 = vadd.f32 %v1099_v3, %v1067_v2  ;;  %v1102_v0 = vunpack.c.h.bf16 %v475_v31 }
 0x202   : > { %v1561_v11 = vpack.c.bf16 %v1532_v7, %v1531_v6  ;;  %v5346_v28 = vpack.c.bf16 %v1131_v13, %v1131_v13 }
 0x203   : > { %v985_v15 = vpop.f32.mrf.mxu1  ;;  %v1388_v26 = vpop.f32.mrf.mxu2 }
 0x204   : > { %v1032_v17 = vmul.f32 %v5113_v58, %v985_v15  ;;  %1658 = vmatmul.bf16.gmra.mxu3 %v1561_v11  ;;  %v1464_v24 = vmul.f32 %v5290_v21, %v1388_v26  ;;  %v1276_v34 = vunpack.c.l.b16 %v5346_v28  ;;  %v477_v26 = vld [vmem:[%s4998_s14 + $0x70] sm:$0xff]  }
 0x206   : > { %v1068_v19 = vadd.f32 %v5119_v63, %v1032_v17  ;;  %v1501_v35 = vadd.f32 %v5299_v27, %v1464_v24 }
 0x208   : > { %v1132_v22 = vadd.f32 %v1100_v18, %v1068_v19  ;;  %v1533_v53 = vmax.f32 %v1501_v35, 0.0 }
 0x20a   : > { %v5349_v25 = vpack.c.bf16 %v1132_v22, %v1132_v22  ;;  %v4685_v29 = vpack.c.bf16 %v1132_v22, %v1131_v13 }
 0x20b   : > { %v988_v32 = vpop.f32.mrf.mxu1  ;;  %v1390_v33 = vpop.f32.mrf.mxu2 }
 0x20c   : > { %4793 = vst [vmem:[%s5134_s25 + $0x60] sm:$0xff] %v4685_v29   ;;  %v1033_v39 = vmul.f32 %v5113_v58, %v988_v32  ;;  %v1465_v43 = vmul.f32 %v5290_v21, %v1390_v33  ;;  %v1277_v46 = vunpack.c.l.b16 %v5349_v25  ;;  %v1103_v32 = vunpack.c.l.bf16 %v477_v26 }
 0x20e   : > { %v1069_v47 = vadd.f32 %v5119_v63, %v1033_v39  ;;  %v1502_v51 = vadd.f32 %v5299_v27, %v1465_v43  ;;  %v1296_v52 = vpack.c.b16 %v1277_v46, %v1276_v34 }
 0x210   : > { %1432 = vmatmul.bf16.gmra.mxu2 %v1296_v52  ;;  %v1534_v54 = vmax.f32 %v1502_v51, 0.0  ;;  %v1133_v55 = vadd.f32 %v1101_v49, %v1069_v47  ;;  %v1104_v52 = vunpack.c.h.bf16 %v477_v26  ;;  %v479_v26 = vld [vmem:[%s4998_s14 + $0x78] sm:$0xff]  }
 0x212   : > { %v1562_v56 = vpack.c.bf16 %v1534_v54, %v1533_v53  ;;  %v5361_v2 = vpack.c.bf16 %v1133_v55, %v1133_v55 }
 0x213   : > { %v990_v57 = vpop.f32.mrf.mxu1  ;;  %v1393_v59 = vpop.f32.mrf.mxu2 }
 0x214   : > { %v1034_v60 = vmul.f32 %v5113_v58, %v990_v57  ;;  %1663 = vmatmul.bf16.gmra.mxu3 %v1562_v56  ;;  %v1466_v7 = vmul.f32 %v5290_v21, %v1393_v59  ;;  %v1278_v15 = vunpack.c.l.b16 %v5361_v2  ;;  %v4162_v57 = vld [vmem:[%s6273_s7 + $0x1c8] sm:$0xf] }
 0x215   : > { %v4554_v59 = vld [vmem:[%s6273_s7 + $0x1e4] sm:$0xf0] }
 0x216   : > { %v1070_v3 = vadd.f32 %v5119_v63, %v1034_v60  ;;  %v1503_v19 = vadd.f32 %v5299_v27, %v1466_v7  ;;  %v4163_v60 = vor.u32 %v4554_v59, %v4162_v57 }
 0x218   : > { %v1134_v6 = vadd.f32 %v1102_v0, %v1070_v3  ;;  %v1535_v35 = vmax.f32 %v1503_v19, 0.0  ;;  %v4550_v0 = vld [vmem:[%s6273_s7 + $0x1cc] sm:$0xf]  ;;  %2510 = vmatpush.bf16.msrb.mxu2 %v4163_v60  ;;  %v1106_v60 = vunpack.c.h.bf16 %v479_v26 }
 0x219   : > { %v4164_v3 = vld [vmem:[%s6273_s7 + $0x1e8] sm:$0xf0] }
 0x21a   : > { %v5365_v11 = vpack.c.bf16 %v1134_v6, %v1134_v6  ;;  %v4690_v13 = vpack.c.bf16 %v1134_v6, %v1133_v55 }
 0x21b   : > { %v993_v17 = vpop.f32.mrf.mxu1  ;;  %v1395_v18 = vpop.f32.mrf.mxu2 }
 0x21c   : > { %4794 = vst [vmem:[%s5134_s25 + $0x68] sm:$0xff] %v4690_v13   ;;  %v1035_v22 = vmul.f32 %v5113_v58, %v993_v17  ;;  %v1467_v24 = vmul.f32 %v5290_v21, %v1395_v18  ;;  %v1279_v29 = vunpack.c.l.b16 %v5365_v11 }
 0x21e   : > { %v1071_v31 = vadd.f32 %v5119_v63, %v1035_v22  ;;  %v1504_v33 = vadd.f32 %v5299_v27, %v1467_v24  ;;  %v1297_v34 = vpack.c.b16 %v1279_v29, %v1278_v15  ;;  %v4167_v15 = vor.u32 %v4550_v0, %v4164_v3 }
 0x220   : > { %1437 = vmatmul.bf16.gmra.mxu2 %v1297_v34  ;;  %v1536_v39 = vmax.f32 %v1504_v33, 0.0  ;;  %v1135_v43 = vadd.f32 %v1103_v32, %v1071_v31  ;;  %2523 = vmatpush.bf16.msrb.mxu3 %v4167_v15  ;;  %v1105_v32 = vunpack.c.l.bf16 %v479_v26 }
 0x222   : > { %v1563_v46 = vpack.c.bf16 %v1536_v39, %v1535_v35  ;;  %v5377_v53 = vpack.c.bf16 %v1135_v43, %v1135_v43  ;;  %v4154_v35 = vld [vmem:[%s6273_s7 + $0x1c0] sm:$0xf] }
 0x223   : > { %v995_v47 = vpop.f32.mrf.mxu1  ;;  %v1398_v49 = vpop.f32.mrf.mxu2  ;;  %v4553_v39 = vld [vmem:[%s6273_s7 + $0x1dc] sm:$0xf0] }
 0x224   : > { %v1036_v51 = vmul.f32 %v5113_v58, %v995_v47  ;;  %1668 = vmatmul.bf16.gmra.mxu3 %v1563_v46  ;;  %v1468_v56 = vmul.f32 %v5290_v21, %v1398_v49  ;;  %v1280_v13 = vunpack.c.l.b16 %v5377_v53  ;;  %v4155_v46 = vor.u32 %v4553_v39, %v4154_v35  ;;  %v4156_v47 = vld [vmem:[%s6273_s7 + $0x1e0] sm:$0xf0]  ;;  %v4130_v35 = vld [vmem:[%s6273_s7 + $0x188] sm:$0xf] }
 0x225   : > { %v4546_v39 = vld [vmem:[%s6273_s7 + $0x1a4] sm:$0xf0] }
 0x226   : > { %v1072_v54 = vadd.f32 %v5119_v63, %v1036_v51  ;;  %v1505_v19 = vadd.f32 %v5299_v27, %v1468_v56  ;;  %2484 = vmatpush.bf16.msrb.mxu0 %v4155_v46  ;;  %v4542_v46 = vld [vmem:[%s6273_s7 + $0x18c] sm:$0xf] }
 0x228   : > { %v1136_v55 = vadd.f32 %v1104_v52, %v1072_v54  ;;  %v1537_v49 = vmax.f32 %v1505_v19, 0.0 }
 0x22a   : > { %v5393_v6 = vpack.c.bf16 %v1136_v55, %v1136_v55  ;;  %v4695_v7 = vpack.c.bf16 %v1136_v55, %v1135_v43  ;;  %v4549_v43 = vld [vmem:[%s6273_s7 + $0x1c4] sm:$0xf] }
 0x22b   : > { %v998_v17 = vpop.f32.mrf.mxu1  ;;  %v1400_v18 = vpop.f32.mrf.mxu2  ;;  %v4159_v52 = vor.u32 %v4549_v43, %v4156_v47  ;;  %v4131_v43 = vor.u32 %v4546_v39, %v4130_v35  ;;  %v4132_v47 = vld [vmem:[%s6273_s7 + $0x1a8] sm:$0xf0] }
 0x22c   : > { %4795 = vst [vmem:[%s5134_s25 + $0x70] sm:$0xff] %v4695_v7   ;;  %v1037_v22 = vmul.f32 %v5113_v58, %v998_v17  ;;  %v1469_v24 = vmul.f32 %v5290_v21, %v1400_v18  ;;  %v1281_v29 = vunpack.c.l.b16 %v5393_v6 }
 0x22d   : > { %2497 = vmatpush.bf16.msrb.mxu1 %v4159_v52  ;;  %2511 = vmatpush.bf16.msrb.mxu2 %v4131_v43 }
 0x22e   : > { %v1073_v31 = vadd.f32 %v5119_v63, %v1037_v22  ;;  %v1506_v33 = vadd.f32 %v5299_v27, %v1469_v24  ;;  %v1298_v34 = vpack.c.b16 %v1281_v29, %v1280_v13 }
 0x230   : > { %1442 = vmatmul.bf16.gmra.mxu2 %v1298_v34  ;;  %v1538_v51 = vmax.f32 %v1506_v33, 0.0  ;;  %v1137_v54 = vadd.f32 %v1105_v32, %v1073_v31 }
 0x232   : > { %v1564_v55 = vpack.c.bf16 %v1538_v51, %v1537_v49  ;;  %v5417_v0 = vpack.c.bf16 %v1137_v54, %v1137_v54  ;;  %v4135_v49 = vor.u32 %v4542_v46, %v4132_v47  ;;  %v5471_v46 = vld [vmem:[%s6272_s6 + $0x1] ss:$0 sm:$0xff]  ;;  %v4098_v47 = vld [vmem:[%s6273_s7 + $0x148] sm:$0xf] }
 0x233   : > { %v1000_v56 = vpop.f32.mrf.mxu1  ;;  %v1403_v57 = vpop.f32.mrf.mxu2 }
 0x234   : > { %v1038_v59 = vmul.f32 %v5113_v58, %v1000_v56  ;;  %1673 = vmatmul.bf16.gmra.mxu3 %v1564_v55  ;;  %v1470_v13 = vmul.f32 %v5290_v21, %v1403_v57  ;;  %v1282_v18 = vunpack.c.l.b16 %v5417_v0 }
 0x235   : > { %2524 = vmatpush.bf16.msrb.mxu3 %v4135_v49  ;;  %v4538_v49 = vld [vmem:[%s6273_s7 + $0x164] sm:$0xf0] }
 0x236   : > { %v1074_v3 = vadd.f32 %v5119_v63, %v1038_v59  ;;  %v1507_v22 = vadd.f32 %v5299_v27, %v1470_v13  ;;  %v4122_v59 = vld [vmem:[%s6273_s7 + $0x180] sm:$0xf] }
 0x238   : > { %v1138_v7 = vadd.f32 %v1106_v60, %v1074_v3  ;;  %v1539_v63 = vmax.f32 %v1507_v22, 0.0  ;;  %v4545_v60 = vld [vmem:[%s6273_s7 + $0x19c] sm:$0xf0] }
 0x239   : > { %v4123_v3 = vor.u32 %v4545_v60, %v4122_v59 }
 0x23a   : > { %v5421_v15 = vpack.c.bf16 %v1138_v7, %v1138_v7  ;;  %v4700_v17 = vpack.c.bf16 %v1138_v7, %v1137_v54 }
 0x23b   : > { %v1405_v19 = vpop.f32.mrf.mxu2  ;;  %2485 = vmatpush.bf16.msrb.mxu0 %v4123_v3  ;;  %v1803_v3 = vunpack.c.l.bf16 %v5130_v16  ;;  %v4537_v16 = vld [vmem:[%s6273_s7 + $0x15c] sm:$0xf0] }
 0x23c   : > { %4796 = vst [vmem:[%s5134_s25 + $0x78] sm:$0xff] %v4700_v17   ;;  %v1471_v58 = vmul.f32 %v5290_v21, %v1405_v19  ;;  %v1283_v26 = vunpack.c.l.b16 %v5421_v15  ;;  %v4124_v19 = vld [vmem:[%s6273_s7 + $0x1a0] sm:$0xf0] }
 0x23e   : > { %v1508_v24 = vadd.f32 %v5299_v27, %v1471_v58  ;;  %v1299_v29 = vpack.c.b16 %v1283_v26, %v1282_v18  ;;  %v4541_v18 = vld [vmem:[%s6273_s7 + $0x184] sm:$0xf] }
 0x23f   : > { %v4127_v58 = vor.u32 %v4541_v18, %v4124_v19 }
 0x240   : > { %1447 = vmatmul.bf16.gmra.mxu2 %v1299_v29  ;;  %v1540_v31 = vmax.f32 %v1508_v24, 0.0 }
 0x241   : > { %2498 = vmatpush.bf16.msrb.mxu1 %v4127_v58  ;;  %v1804_v58 = vunpack.c.l.bf16 %v5132_v20 }
 0x242   : > { %v1565_v32 = vpack.c.bf16 %v1540_v31, %v1539_v63 }
 0x243   : > { %v1408_v33 = vpop.f32.mrf.mxu2 }
 0x244   : > { %1678 = vmatmul.bf16.gmra.mxu3 %v1565_v32  ;;  %v1472_v34 = vmul.f32 %v5290_v21, %v1408_v33 }
 0x246   : > { %v1509_v52 = vadd.f32 %v5299_v27, %v1472_v34  ;;  %v5464_v34 = vld [vmem:[%s6271_s5 + $0x1] ss:$0 sm:$0xff] }
 0x248   : > { %v1541_v56 = vmax.f32 %v1509_v52, 0.0 }
 0x24b   : > { %v1410_v51 = vpop.f32.mrf.mxu2 }
 0x24c   : > { %v1473_v54 = vmul.f32 %v5290_v21, %v1410_v51  ;;  %v4534_v51 = vld [vmem:[%s6273_s7 + $0x14c] sm:$0xf] }
 0x24e   : > { %v1510_v55 = vadd.f32 %v5299_v27, %v1473_v54  ;;  %v4099_v54 = vor.u32 %v4538_v49, %v4098_v47 }
 0x250   : > { %v1542_v57 = vmax.f32 %v1510_v55, 0.0  ;;  %v4100_v55 = vld [vmem:[%s6273_s7 + $0x168] sm:$0xf0]  ;;  %2512 = vmatpush.bf16.msrb.mxu2 %v4099_v54 }
 0x251   : > { %v4103_v60 = vor.u32 %v4534_v51, %v4100_v55  ;;  %v1805_v55 = vunpack.c.l.bf16 %v5148_v44 }
 0x252   : > { %v1566_v7 = vpack.c.bf16 %v1542_v57, %v1541_v56 }
 0x253   : > { %v1413_v13 = vpop.f32.mrf.mxu2  ;;  %2525 = vmatpush.bf16.msrb.mxu3 %v4103_v60 }
 0x254   : > { %1683 = vmatmul.bf16.gmra.mxu3 %v1566_v7  ;;  %v1474_v17 = vmul.f32 %v5290_v21, %v1413_v13 }
 0x256   : > { %v1511_v26 = vadd.f32 %v5299_v27, %v1474_v17 }
 0x258   : > { %v1543_v63 = vmax.f32 %v1511_v26, 0.0 }
 0x25b   : > { %v1415_v22 = vpop.f32.mrf.mxu2 }
 0x25c   : > { %v1475_v24 = vmul.f32 %v5290_v21, %v1415_v22 }
 0x25e   : > { %v1512_v29 = vadd.f32 %v5299_v27, %v1475_v24 }
 0x260   : > { %v1544_v31 = vmax.f32 %v1512_v29, 0.0  ;;  %v4090_v29 = vld [vmem:[%s6273_s7 + $0x140] sm:$0xf] }
 0x262   : > { %v1567_v32 = vpack.c.bf16 %v1544_v31, %v1543_v63  ;;  %v4091_v31 = vor.u32 %v4537_v16, %v4090_v29 }
 0x263   : > { %v1418_v33 = vpop.f32.mrf.mxu2 }
 0x264   : > { %1688 = vmatmul.bf16.gmra.mxu3 %v1567_v32  ;;  %v1476_v39 = vmul.f32 %v5290_v21, %v1418_v33  ;;  %2486 = vmatpush.bf16.msrb.mxu0 %v4091_v31 }
 0x266   : > { %v1513_v56 = vadd.f32 %v5299_v27, %v1476_v39 }
 0x267   : > { %v1649_v35 = vpop.f32.mrf.mxu3 }
 0x268   : > { %v1734_v43 = vmul.f32 %v5464_v34, %v1649_v35  ;;  %v1545_v17 = vmax.f32 %v1513_v56, 0.0  ;;  %v4533_v56 = vld [vmem:[%s6273_s7 + $0x144] sm:$0xf] }
 0x26a   : > { %v1771_v57 = vadd.f32 %v5471_v46, %v1734_v43 }
 0x26b   : > { %v1420_v52 = vpop.f32.mrf.mxu2 }
 0x26c   : > { %v1477_v59 = vmul.f32 %v5290_v21, %v1420_v52  ;;  %v1835_v18 = vadd.f32 %v1803_v3, %v1771_v57  ;;  %v4092_v57 = vld [vmem:[%s6273_s7 + $0x160] sm:$0xf0] }
 0x26d   : > { %v4095_v60 = vor.u32 %v4533_v56, %v4092_v57 }
 0x26e   : > { %v1514_v7 = vadd.f32 %v5299_v27, %v1477_v59  ;;  %v1867_v32 = vpack.c.bf16 %v1835_v18, %v1835_v18 }
 0x26f   : > { %v1651_v13 = vpop.f32.mrf.mxu3  ;;  %2499 = vmatpush.bf16.msrb.mxu1 %v4095_v60 }
 0x270   : > { %v1546_v19 = vmax.f32 %v1514_v7, 0.0  ;;  %v1735_v22 = vmul.f32 %v5464_v34, %v1651_v13  ;;  %v1932_v43 = vunpack.c.l.bf16 %v1867_v32 }
 0x272   : > { %v1772_v26 = vadd.f32 %v5471_v46, %v1735_v22  ;;  %v1568_v24 = vpack.c.bf16 %v1546_v19, %v1545_v17 }
 0x273   : > { %v1423_v63 = vpop.f32.mrf.mxu2 }
 0x274   : > { %v1836_v33 = vadd.f32 %v1804_v58, %v1772_v26  ;;  %1693 = vmatmul.bf16.gmra.mxu3 %v1568_v24  ;;  %v1478_v49 = vmul.f32 %v5290_v21, %v1423_v63  ;;  %v1806_v24 = vunpack.c.l.bf16 %v5150_v48  ;;  %v1807_v48 = vunpack.c.l.bf16 %v5164_v8 }
 0x276   : > { %v1868_v35 = vpack.c.bf16 %v1836_v33, %v1836_v33  ;;  %v4705_v39 = vpack.c.bf16 %v1836_v33, %v1835_v18  ;;  %v1515_v3 = vadd.f32 %v5299_v27, %v1478_v49 }
 0x277   : > { %v1654_v20 = vpop.f32.mrf.mxu3 }
 0x278   : > { %4797 = vst [vmem:[%s5134_s25 + $0x80] sm:$0xff] %v4705_v39   ;;  %v1933_v47 = vunpack.c.l.bf16 %v1868_v35  ;;  %v1736_v51 = vmul.f32 %v5464_v34, %v1654_v20  ;;  %v1547_v19 = vmax.f32 %v1515_v3, 0.0 }
 0x27a   : > { %v2061_v52 = vadd.f32 %v1933_v47, %v1932_v43  ;;  %v1773_v54 = vadd.f32 %v5471_v46, %v1736_v51 }
 0x27b   : > { %v1425_v59 = vpop.f32.mrf.mxu2 }
 0x27c   : > { %v1837_v7 = vadd.f32 %v1805_v55, %v1773_v54  ;;  %v1479_v13 = vmul.f32 %v5290_v21, %v1425_v59  ;;  %v4530_v54 = vld [vmem:[%s6273_s7 + $0x124] sm:$0xf0]  ;;  %v4526_v55 = vld [vmem:[%s6273_s7 + $0x10c] sm:$0xf] }
 0x27d   : > { %v4068_v59 = vld [vmem:[%s6273_s7 + $0x128] sm:$0xf0] }
 0x27e   : > { %v1869_v17 = vpack.c.bf16 %v1837_v7, %v1837_v7  ;;  %v1516_v18 = vadd.f32 %v5299_v27, %v1479_v13 }
 0x27f   : > { %v1656_v44 = vpop.f32.mrf.mxu3 }
 0x280   : > { %v1934_v22 = vunpack.c.l.bf16 %v1869_v17  ;;  %v1548_v58 = vmax.f32 %v1516_v18, 0.0  ;;  %v1737_v26 = vmul.f32 %v5464_v34, %v1656_v44 }
 0x282   : > { %v2062_v29 = vadd.f32 %v2061_v52, %v1934_v22  ;;  %v1774_v16 = vadd.f32 %v5471_v46, %v1737_v26  ;;  %v1569_v63 = vpack.c.bf16 %v1548_v58, %v1547_v19  ;;  %v4066_v52 = vld [vmem:[%s6273_s7 + $0x108] sm:$0xf]  ;;  %v1808_v26 = vunpack.c.l.bf16 %v5166_v12 }
 0x283   : > { %v1428_v31 = vpop.f32.mrf.mxu2  ;;  %v4067_v57 = vor.u32 %v4530_v54, %v4066_v52  ;;  %v1809_v52 = vunpack.c.l.bf16 %v5180_v38  ;;  %v4525_v54 = vld [vmem:[%s6273_s7 + $0x104] sm:$0xf] }
 0x284   : > { %v1838_v32 = vadd.f32 %v1806_v24, %v1774_v16  ;;  %1698 = vmatmul.bf16.gmra.mxu3 %v1569_v63  ;;  %v1480_v43 = vmul.f32 %v5290_v21, %v1428_v31  ;;  %v4058_v63 = vld [vmem:[%s6273_s7 + $0x100] sm:$0xf] }
 0x285   : > { %2513 = vmatpush.bf16.msrb.mxu2 %v4067_v57  ;;  %v4529_v31 = vld [vmem:[%s6273_s7 + $0x11c] sm:$0xf0] }
 0x286   : > { %v1870_v33 = vpack.c.bf16 %v1838_v32, %v1838_v32  ;;  %v4710_v35 = vpack.c.bf16 %v1838_v32, %v1837_v7  ;;  %v1517_v8 = vadd.f32 %v5299_v27, %v1480_v43  ;;  %v4071_v7 = vor.u32 %v4526_v55, %v4068_v59  ;;  %v4060_v55 = vld [vmem:[%s6273_s7 + $0x120] sm:$0xf0] }
 0x287   : > { %v1659_v39 = vpop.f32.mrf.mxu3  ;;  %v4063_v57 = vor.u32 %v4525_v54, %v4060_v55 }
 0x288   : > { %4798 = vst [vmem:[%s5134_s25 + $0x88] sm:$0xff] %v4710_v35   ;;  %v1935_v20 = vunpack.c.l.bf16 %v1870_v33  ;;  %v1738_v47 = vmul.f32 %v5464_v34, %v1659_v39  ;;  %2526 = vmatpush.bf16.msrb.mxu3 %v4071_v7  ;;  %v1549_v44 = vmax.f32 %v1517_v8, 0.0  ;;  %v4059_v33 = vor.u32 %v4529_v31, %v4058_v63 }
 0x289   : > { %2500 = vmatpush.bf16.msrb.mxu1 %v4063_v57 }
 0x28a   : > { %v2063_v49 = vadd.f32 %v2062_v29, %v1935_v20  ;;  %v1775_v51 = vadd.f32 %v5471_v46, %v1738_v47  ;;  %2487 = vmatpush.bf16.msrb.mxu0 %v4059_v33 }
 0x28b   : > { %v1430_v56 = vpop.f32.mrf.mxu2 }
 0x28c   : > { %v1839_v60 = vadd.f32 %v1807_v48, %v1775_v51  ;;  %v1481_v3 = vmul.f32 %v5290_v21, %v1430_v56 }
 0x28e   : > { %v1871_v13 = vpack.c.bf16 %v1839_v60, %v1839_v60  ;;  %v1518_v17 = vadd.f32 %v5299_v27, %v1481_v3 }
 0x28f   : > { %v1661_v18 = vpop.f32.mrf.mxu3 }
 0x290   : > { %v1936_v19 = vunpack.c.l.bf16 %v1871_v13  ;;  %v1550_v22 = vmax.f32 %v1518_v17, 0.0  ;;  %v1739_v58 = vmul.f32 %v5464_v34, %v1661_v18 }
 0x292   : > { %v2064_v24 = vadd.f32 %v2063_v49, %v1936_v19  ;;  %v1776_v29 = vadd.f32 %v5471_v46, %v1739_v58  ;;  %v1570_v16 = vpack.c.bf16 %v1550_v22, %v1549_v44  ;;  %v1810_v19 = vunpack.c.l.bf16 %v5182_v42 }
 0x293   : > { %v1433_v32 = vpop.f32.mrf.mxu2 }
 0x294   : > { %v1840_v35 = vadd.f32 %v1808_v26, %v1776_v29  ;;  %1703 = vmatmul.bf16.gmra.mxu3 %v1570_v16  ;;  %v1482_v47 = vmul.f32 %v5290_v21, %v1433_v32 }
 0x296   : > { %v1872_v39 = vpack.c.bf16 %v1840_v35, %v1840_v35  ;;  %v4715_v20 = vpack.c.bf16 %v1840_v35, %v1839_v60  ;;  %v1519_v59 = vadd.f32 %v5299_v27, %v1482_v47  ;;  %v4522_v47 = vld [vmem:[%s6273_s7 + $0xe4] sm:$0xf0] }
 0x297   : > { %v1664_v12 = vpop.f32.mrf.mxu3 }
 0x298   : > { %4799 = vst [vmem:[%s5134_s25 + $0x90] sm:$0xff] %v4715_v20   ;;  %v1937_v43 = vunpack.c.l.bf16 %v1872_v39  ;;  %v1740_v49 = vmul.f32 %v5464_v34, %v1664_v12  ;;  %v1551_v13 = vmax.f32 %v1519_v59, 0.0  ;;  %v1811_v12 = vunpack.c.l.bf16 %v5196_v5 }
 0x29a   : > { %v2065_v51 = vadd.f32 %v2064_v24, %v1937_v43  ;;  %v1777_v48 = vadd.f32 %v5471_v46, %v1740_v49  ;;  %v4034_v43 = vld [vmem:[%s6273_s7 + $0xc8] sm:$0xf]  ;;  %v4518_v49 = vld [vmem:[%s6273_s7 + $0xcc] sm:$0xf] }
 0x29b   : > { %v1435_v56 = vpop.f32.mrf.mxu2 }
 0x29c   : > { %v1841_v8 = vadd.f32 %v1809_v52, %v1777_v48  ;;  %v1483_v60 = vmul.f32 %v5290_v21, %v1435_v56  ;;  %v4035_v48 = vor.u32 %v4522_v47, %v4034_v43  ;;  %v4036_v52 = vld [vmem:[%s6273_s7 + $0xe8] sm:$0xf0] }
 0x29d   : > { %v4039_v55 = vor.u32 %v4518_v49, %v4036_v52 }
 0x29e   : > { %v1873_v3 = vpack.c.bf16 %v1841_v8, %v1841_v8  ;;  %v1520_v7 = vadd.f32 %v5299_v27, %v1483_v60  ;;  %2514 = vmatpush.bf16.msrb.mxu2 %v4035_v48 }
 0x29f   : > { %v1666_v38 = vpop.f32.mrf.mxu3  ;;  %2527 = vmatpush.bf16.msrb.mxu3 %v4039_v55 }
 0x2a0   : > { %v1938_v17 = vunpack.c.l.bf16 %v1873_v3  ;;  %v1552_v18 = vmax.f32 %v1520_v7, 0.0  ;;  %v1741_v44 = vmul.f32 %v5464_v34, %v1666_v38  ;;  %v1812_v38 = vunpack.c.l.bf16 %v5198_v9 }
 0x2a2   : > { %v2066_v22 = vadd.f32 %v2065_v51, %v1938_v17  ;;  %v1778_v58 = vadd.f32 %v5471_v46, %v1741_v44  ;;  %v1571_v26 = vpack.c.bf16 %v1552_v18, %v1551_v13  ;;  %v4026_v44 = vld [vmem:[%s6273_s7 + $0xc0] sm:$0xf] }
 0x2a3   : > { %v1438_v24 = vpop.f32.mrf.mxu2 }
 0x2a4   : > { %v1842_v29 = vadd.f32 %v1810_v19, %v1778_v58  ;;  %1708 = vmatmul.bf16.gmra.mxu3 %v1571_v26  ;;  %v1484_v31 = vmul.f32 %v5290_v21, %v1438_v24  ;;  %v4521_v19 = vld [vmem:[%s6273_s7 + $0xdc] sm:$0xf0] }
 0x2a5   : > { %v4027_v58 = vor.u32 %v4521_v19, %v4026_v44 }
 0x2a6   : > { %v1874_v16 = vpack.c.bf16 %v1842_v29, %v1842_v29  ;;  %v4720_v63 = vpack.c.bf16 %v1842_v29, %v1841_v8  ;;  %v1521_v20 = vadd.f32 %v5299_v27, %v1484_v31 }
 0x2a7   : > { %v1669_v32 = vpop.f32.mrf.mxu3  ;;  %2488 = vmatpush.bf16.msrb.mxu0 %v4027_v58  ;;  %v1815_v58 = vunpack.c.l.bf16 %v5234_v10 }
 0x2a8   : > { %4800 = vst [vmem:[%s5134_s25 + $0x98] sm:$0xff] %v4720_v63   ;;  %v1939_v33 = vunpack.c.l.bf16 %v1874_v16  ;;  %v1742_v35 = vmul.f32 %v5464_v34, %v1669_v32  ;;  %v1553_v56 = vmax.f32 %v1521_v20, 0.0  ;;  %v4517_v20 = vld [vmem:[%s6273_s7 + $0xc4] sm:$0xf] }
 0x2aa   : > { %v2067_v39 = vadd.f32 %v2066_v22, %v1939_v33  ;;  %v1779_v42 = vadd.f32 %v5471_v46, %v1742_v35 }
 0x2ab   : > { %v1440_v51 = vpop.f32.mrf.mxu2 }
 0x2ac   : > { %v1843_v54 = vadd.f32 %v1811_v12, %v1779_v42  ;;  %v1485_v5 = vmul.f32 %v5290_v21, %v1440_v51  ;;  %v4028_v42 = vld [vmem:[%s6273_s7 + $0xe0] sm:$0xf0] }
 0x2ad   : > { %v4031_v43 = vor.u32 %v4517_v20, %v4028_v42 }
 0x2ae   : > { %v1875_v57 = vpack.c.bf16 %v1843_v54, %v1843_v54  ;;  %v1522_v59 = vadd.f32 %v5299_v27, %v1485_v5 }
 0x2af   : > { %v1671_v8 = vpop.f32.mrf.mxu3  ;;  %2501 = vmatpush.bf16.msrb.mxu1 %v4031_v43 }
 0x2b0   : > { %v1940_v60 = vunpack.c.l.bf16 %v1875_v57  ;;  %v1554_v3 = vmax.f32 %v1522_v59, 0.0  ;;  %v1743_v7 = vmul.f32 %v5464_v34, %v1671_v8 }
 0x2b2   : > { %v2068_v13 = vadd.f32 %v2067_v39, %v1940_v60  ;;  %v1780_v17 = vadd.f32 %v5471_v46, %v1743_v7  ;;  %v1572_v18 = vpack.c.bf16 %v1554_v3, %v1553_v56  ;;  %v1813_v39 = vunpack.c.l.bf16 %v5212_v37 }
 0x2b3   : > { %v1443_v22 = vpop.f32.mrf.mxu2  ;;  %v1814_v56 = vunpack.c.l.bf16 %v5214_v41 }
 0x2b4   : > { %v1844_v26 = vadd.f32 %v1812_v38, %v1780_v17  ;;  %1713 = vmatmul.bf16.gmra.mxu3 %v1572_v18  ;;  %v1486_v9 = vmul.f32 %v5290_v21, %v1443_v22 }
 0x2b6   : > { %v1876_v24 = vpack.c.bf16 %v1844_v26, %v1844_v26  ;;  %v4725_v29 = vpack.c.bf16 %v1844_v26, %v1843_v54  ;;  %v1523_v33 = vadd.f32 %v5299_v27, %v1486_v9  ;;  %v4002_v26 = vld [vmem:[%s6273_s7 + $0x88] sm:$0xf] }
 0x2b7   : > { %v1674_v16 = vpop.f32.mrf.mxu3 }
 0x2b8   : > { %4801 = vst [vmem:[%s5134_s25 + $0xa0] sm:$0xff] %v4725_v29   ;;  %v1941_v63 = vunpack.c.l.bf16 %v1876_v24  ;;  %v1744_v31 = vmul.f32 %v5464_v34, %v1674_v16  ;;  %v1555_v51 = vmax.f32 %v1523_v33, 0.0  ;;  %v4514_v24 = vld [vmem:[%s6273_s7 + $0xa4] sm:$0xf0]  ;;  %v4510_v29 = vld [vmem:[%s6273_s7 + $0x8c] sm:$0xf] }
 0x2b9   : > { %v4003_v16 = vor.u32 %v4514_v24, %v4002_v26 }
 0x2ba   : > { %v2069_v32 = vadd.f32 %v2068_v13, %v1941_v63  ;;  %v1781_v35 = vadd.f32 %v5471_v46, %v1744_v31  ;;  %v4004_v63 = vld [vmem:[%s6273_s7 + $0xa8] sm:$0xf0] }
 0x2bb   : > { %v1445_v12 = vpop.f32.mrf.mxu2  ;;  %2515 = vmatpush.bf16.msrb.mxu2 %v4003_v16 }
 0x2bc   : > { %v1845_v47 = vadd.f32 %v1813_v39, %v1781_v35  ;;  %v1487_v49 = vmul.f32 %v5290_v21, %v1445_v12 }
 0x2be   : > { %v1877_v48 = vpack.c.bf16 %v1845_v47, %v1845_v47  ;;  %v1524_v52 = vadd.f32 %v5299_v27, %v1487_v49 }
 0x2bf   : > { %v1676_v37 = vpop.f32.mrf.mxu3 }
 0x2c0   : > { %v1942_v54 = vunpack.c.l.bf16 %v1877_v48  ;;  %v1556_v5 = vmax.f32 %v1524_v52, 0.0  ;;  %v1745_v55 = vmul.f32 %v5464_v34, %v1676_v37 }
 0x2c2   : > { %v2070_v57 = vadd.f32 %v2069_v32, %v1942_v54  ;;  %v1782_v59 = vadd.f32 %v5471_v46, %v1745_v55  ;;  %v1573_v8 = vpack.c.bf16 %v1556_v5, %v1555_v51  ;;  %v4007_v32 = vor.u32 %v4510_v29, %v4004_v63 }
 0x2c3   : > { %v1448_v60 = vpop.f32.mrf.mxu2 }
 0x2c4   : > { %v1846_v3 = vadd.f32 %v1814_v56, %v1782_v59  ;;  %1718 = vmatmul.bf16.gmra.mxu3 %v1573_v8  ;;  %v1488_v13 = vmul.f32 %v5290_v21, %v1448_v60  ;;  %v1817_v8 = vunpack.c.l.bf16 %v5258_v36  ;;  %v4509_v60 = vld [vmem:[%s6273_s7 + $0x84] sm:$0xf] }
 0x2c5   : > { %2528 = vmatpush.bf16.msrb.mxu3 %v4007_v32  ;;  %v4502_v32 = vld [vmem:[%s6273_s7 + $0x4c] sm:$0xf] }
 0x2c6   : > { %v1878_v7 = vpack.c.bf16 %v1846_v3, %v1846_v3  ;;  %v4730_v38 = vpack.c.bf16 %v1846_v3, %v1845_v47  ;;  %v1525_v22 = vadd.f32 %v5299_v27, %v1488_v13  ;;  %v1816_v47 = vunpack.c.l.bf16 %v5236_v14  ;;  %v3996_v3 = vld [vmem:[%s6273_s7 + $0xa0] sm:$0xf0] }
 0x2c7   : > { %v1679_v17 = vpop.f32.mrf.mxu3 }
 0x2c8   : > { %4802 = vst [vmem:[%s5134_s25 + $0xa8] sm:$0xff] %v4730_v38   ;;  %v1943_v18 = vunpack.c.l.bf16 %v1878_v7  ;;  %v1746_v44 = vmul.f32 %v5464_v34, %v1679_v17  ;;  %v1557_v33 = vmax.f32 %v1525_v22, 0.0  ;;  %v3999_v7 = vor.u32 %v4509_v60, %v3996_v3 }
 0x2ca   : > { %v2071_v19 = vadd.f32 %v2070_v57, %v1943_v18  ;;  %v1783_v41 = vadd.f32 %v5471_v46, %v1746_v44  ;;  %2502 = vmatpush.bf16.msrb.mxu1 %v3999_v7 }
 0x2cb   : > { %v1450_v9 = vpop.f32.mrf.mxu2 }
 0x2cc   : > { %v1847_v31 = vadd.f32 %v1815_v58, %v1783_v41  ;;  %v1489_v10 = vmul.f32 %v5290_v21, %v1450_v9  ;;  %v3994_v21 = vld [vmem:[%s6273_s7 + $0x80] sm:$0xf] }
 0x2ce   : > { %v1879_v35 = vpack.c.bf16 %v1847_v31, %v1847_v31  ;;  %v1526_v39 = vadd.f32 %v5299_v27, %v1489_v10  ;;  %v4513_v27 = vld [vmem:[%s6273_s7 + $0x9c] sm:$0xf0]  ;;  %v4506_v10 = vld [vmem:[%s6273_s7 + $0x64] sm:$0xf0] }
 0x2cf   : > { %v1681_v20 = vpop.f32.mrf.mxu3  ;;  %v3995_v52 = vor.u32 %v4513_v27, %v3994_v21  ;;  %v4505_v21 = vld [vmem:[%s6273_s7 + $0x5c] sm:$0xf0] }
 0x2d0   : > { %v1944_v42 = vunpack.c.l.bf16 %v1879_v35  ;;  %v1558_v12 = vmax.f32 %v1526_v39, 0.0  ;;  %v1747_v43 = vmul.f32 %v5464_v34, %v1681_v20  ;;  %v3972_v35 = vld [vmem:[%s6273_s7 + $0x68] sm:$0xf0] }
 0x2d1   : > { %2489 = vmatpush.bf16.msrb.mxu0 %v3995_v52  ;;  %v3975_v20 = vor.u32 %v4502_v32, %v3972_v35 }
 0x2d2   : > { %v2072_v49 = vadd.f32 %v2071_v19, %v1944_v42  ;;  %v1784_v51 = vadd.f32 %v5471_v46, %v1747_v43  ;;  %v1574_v48 = vpack.c.bf16 %v1558_v12, %v1557_v33  ;;  %v1818_v19 = vunpack.c.l.bf16 %v5260_v40  ;;  %v3970_v40 = vld [vmem:[%s6273_s7 + $0x48] sm:$0xf] }
 0x2d3   : > { %v3971_v33 = vor.u32 %v4506_v10, %v3970_v40  ;;  %2529 = vmatpush.bf16.msrb.mxu3 %v3975_v20  ;;  %v3940_v40 = vld [vmem:[%s6273_s7 + $0x28] sm:$0xf0] }
 0x2d4   : > { %v1848_v37 = vadd.f32 %v1816_v47, %v1784_v51  ;;  %1723 = vmatmul.bf16.gmra.mxu3 %v1574_v48  ;;  %v1820_v51 = vunpack.c.l.bf16 %v5278_v1  ;;  %v3962_v48 = vld [vmem:[%s6273_s7 + $0x40] sm:$0xf] }
 0x2d5   : > { %2516 = vmatpush.bf16.msrb.mxu2 %v3971_v33  ;;  %v3963_v27 = vor.u32 %v4505_v21, %v3962_v48  ;;  %v4555_v48 = vld [vmem:[%s6273_s7 + $0x1ec] sm:$0xf0] }
 0x2d6   : > { %v1880_v54 = vpack.c.bf16 %v1848_v37, %v1848_v37  ;;  %v4735_v5 = vpack.c.bf16 %v1848_v37, %v1847_v31  ;;  %v1819_v31 = vunpack.c.l.bf16 %v5276_v62 }
 0x2d7   : > { %v1684_v55 = vpop.f32.mrf.mxu3  ;;  %2490 = vmatpush.bf16.msrb.mxu0 %v3963_v27 }
 0x2d8   : > { %4803 = vst [vmem:[%s5134_s25 + $0xb0] sm:$0xff] %v4735_v5   ;;  %v1945_v14 = vunpack.c.l.bf16 %v1880_v54  ;;  %v1748_v56 = vmul.f32 %v5464_v34, %v1684_v55 }
 0x2da   : > { %v2073_v57 = vadd.f32 %v2072_v49, %v1945_v14  ;;  %v1785_v59 = vadd.f32 %v5471_v46, %v1748_v56 }
 0x2dc   : > { %v1849_v38 = vadd.f32 %v1817_v8, %v1785_v59  ;;  %v4501_v59 = vld [vmem:[%s6273_s7 + $0x44] sm:$0xf] }
 0x2dd   : > { %v3964_v8 = vld [vmem:[%s6273_s7 + $0x60] sm:$0xf0] }
 0x2de   : > { %v1881_v13 = vpack.c.bf16 %v1849_v38, %v1849_v38  ;;  %v3967_v60 = vor.u32 %v4501_v59, %v3964_v8 }
 0x2df   : > { %v1686_v17 = vpop.f32.mrf.mxu3 }
 0x2e0   : > { %v1946_v18 = vunpack.c.l.bf16 %v1881_v13  ;;  %v1749_v44 = vmul.f32 %v5464_v34, %v1686_v17  ;;  %2503 = vmatpush.bf16.msrb.mxu1 %v3967_v60 }
 0x2e2   : > { %v2074_v36 = vadd.f32 %v2073_v57, %v1946_v18  ;;  %v1786_v22 = vadd.f32 %v5471_v46, %v1749_v44  ;;  %v1821_v57 = vunpack.c.l.bf16 %v5293_v23  ;;  %v1822_v44 = vunpack.c.l.bf16 %v5301_v30  ;;  %v4498_v30 = vld [vmem:[%s6273_s7 + $0x24] sm:$0xf0] }
 0x2e4   : > { %v1850_v41 = vadd.f32 %v1818_v19, %v1786_v22 }
 0x2e6   : > { %v1882_v58 = vpack.c.bf16 %v1850_v41, %v1850_v41  ;;  %v4740_v26 = vpack.c.bf16 %v1850_v41, %v1849_v38 }
 0x2e7   : > { %v1689_v24 = vpop.f32.mrf.mxu3 }
 0x2e8   : > { %4804 = vst [vmem:[%s5134_s25 + $0xb8] sm:$0xff] %v4740_v26   ;;  %v1947_v29 = vunpack.c.l.bf16 %v1882_v58  ;;  %v1750_v9 = vmul.f32 %v5464_v34, %v1689_v24 }
 0x2ea   : > { %v2075_v16 = vadd.f32 %v2074_v36, %v1947_v29  ;;  %v1787_v63 = vadd.f32 %v5471_v46, %v1750_v9  ;;  %v1823_v9 = vunpack.c.l.bf16 %v5314_v61 }
 0x2ec   : > { %v1851_v39 = vadd.f32 %v1819_v31, %v1787_v63  ;;  %v4494_v63 = vld [vmem:[%s6273_s7 + $0xc] sm:$0xf] }
 0x2ed   : > { %v3943_v32 = vor.u32 %v4494_v63, %v3940_v40  ;;  %v4535_v63 = vld [vmem:[%s6273_s7 + $0x154] sm:$0xf] }
 0x2ee   : > { %v1883_v62 = vpack.c.bf16 %v1851_v39, %v1851_v39 }
 0x2ef   : > { %v1691_v42 = vpop.f32.mrf.mxu3  ;;  %2530 = vmatpush.bf16.msrb.mxu3 %v3943_v32  ;;  %v4114_v32 = vld [vmem:[%s6273_s7 + $0x158] sm:$0xf] }
 0x2f0   : > { %v1948_v12 = vunpack.c.l.bf16 %v1883_v62  ;;  %v1751_v43 = vmul.f32 %v5464_v34, %v1691_v42  ;;  %v1824_v42 = vunpack.c.l.bf16 %v5317_v4  ;;  %v4170_v4 = vld [vmem:[%s6273_s7 + $0x1d0] sm:$0xf] }
 0x2f2   : > { %v2076_v47 = vadd.f32 %v2075_v16, %v1948_v12  ;;  %v1788_v49 = vadd.f32 %v5471_v46, %v1751_v43  ;;  %v3938_v16 = vld [vmem:[%s6273_s7 + $0x8] sm:$0xf]  ;;  %v3930_v12 = vld [vmem:[%s6273_s7] sm:$0xf] }
 0x2f3   : > { %v3939_v31 = vor.u32 %v4498_v30, %v3938_v16  ;;  %v4497_v43 = vld [vmem:[%s6273_s7 + $0x1c] sm:$0xf0]  ;;  %v4106_v16 = vld [vmem:[%s6273_s7 + $0x150] sm:$0xf] }
 0x2f4   : > { %v1852_v52 = vadd.f32 %v1820_v51, %v1788_v49  ;;  %v3931_v49 = vor.u32 %v4497_v43, %v3930_v12  ;;  %v3932_v51 = vld [vmem:[%s6273_s7 + $0x20] sm:$0xf0]  ;;  %v4539_v30 = vld [vmem:[%s6273_s7 + $0x16c] sm:$0xf0] }
 0x2f5   : > { %2517 = vmatpush.bf16.msrb.mxu2 %v3939_v31  ;;  %v4107_v40 = vor.u32 %v4539_v30, %v4106_v16  ;;  %v4074_v43 = vld [vmem:[%s6273_s7 + $0x110] sm:$0xf]  ;;  %v4511_v30 = vld [vmem:[%s6273_s7 + $0x94] sm:$0xf] }
 0x2f6   : > { %v1884_v37 = vpack.c.bf16 %v1852_v52, %v1852_v52  ;;  %v4745_v54 = vpack.c.bf16 %v1852_v52, %v1851_v39  ;;  %v4171_v52 = vor.u32 %v4555_v48, %v4170_v4  ;;  %2491 = vmatpush.bf16.msrb.mxu0 %v3931_v49  ;;  %v4527_v49 = vld [vmem:[%s6273_s7 + $0x114] sm:$0xf] }
 0x2f7   : > { %v1694_v5 = vpop.f32.mrf.mxu3 }
 0x2f8   : > { %4805 = vst [vmem:[%s5134_s25 + $0xc0] sm:$0xff] %v4745_v54   ;;  %v1949_v55 = vunpack.c.l.bf16 %v1884_v37  ;;  %v1752_v14 = vmul.f32 %v5464_v34, %v1694_v5  ;;  %v4551_v37 = vld [vmem:[%s6273_s7 + $0x1d4] sm:$0xf]  ;;  %v4178_v5 = vld [vmem:[%s6273_s7 + $0x1d8] sm:$0xf] }
 0x2f9   : > { %v4172_v54 = vld [vmem:[%s6273_s7 + $0x1f0] sm:$0xf0] }
 0x2fa   : > { %v2077_v56 = vadd.f32 %v2076_v47, %v1949_v55  ;;  %v1789_v1 = vadd.f32 %v5471_v46, %v1752_v14  ;;  %v4493_v47 = vld [vmem:[%s6273_s7 + $0x4] sm:$0xf]  ;;  %v4175_v55 = vor.u32 %v4551_v37, %v4172_v54  ;;  %v4556_v14 = vld [vmem:[%s6273_s7 + $0x1f4] sm:$0xf0]  ;;  %2536 = vmatpush.bf16.msra.mxu0 %v4171_v52 }
 0x2fb   : > { %v3935_v27 = vor.u32 %v4493_v47, %v3932_v51  ;;  %v4179_v8 = vor.u32 %v4556_v14, %v4178_v5  ;;  %v4531_v47 = vld [vmem:[%s6273_s7 + $0x12c] sm:$0xf0]  ;;  %v4532_v52 = vld [vmem:[%s6273_s7 + $0x134] sm:$0xf0]  ;;  %v4528_v5 = vld [vmem:[%s6273_s7 + $0x11c] sm:$0xf] }
 0x2fc   : > { %v1853_v3 = vadd.f32 %v1821_v57, %v1789_v1  ;;  %v4180_v1 = vld [vmem:[%s6273_s7 + $0x1f8] sm:$0xf0]  ;;  %v4075_v48 = vor.u32 %v4531_v47, %v4074_v43  ;;  %v4503_v43 = vld [vmem:[%s6273_s7 + $0x54] sm:$0xf] }
 0x2fd   : > { %2504 = vmatpush.bf16.msrb.mxu1 %v3935_v27  ;;  %2562 = vmatpush.bf16.msra.mxu2 %v4179_v8  ;;  %v4082_v27 = vld [vmem:[%s6273_s7 + $0x118] sm:$0xf] }
 0x2fe   : > { %v1885_v7 = vpack.c.bf16 %v1853_v3, %v1853_v3  ;;  %v4083_v54 = vor.u32 %v4532_v52, %v4082_v27  ;;  %v4504_v52 = vld [vmem:[%s6273_s7 + $0x5c] sm:$0xf] }
 0x2ff   : > { %v1696_v38 = vpop.f32.mrf.mxu3 }
 0x300   : > { %v1950_v13 = vunpack.c.l.bf16 %v1885_v7  ;;  %v1753_v17 = vmul.f32 %v5464_v34, %v1696_v38  ;;  %v4138_v7 = vld [vmem:[%s6273_s7 + $0x190] sm:$0xf] }
 0x301   : > { %2549 = vmatpush.bf16.msra.mxu1 %v4175_v55  ;;  %v4547_v38 = vld [vmem:[%s6273_s7 + $0x1ac] sm:$0xf0]  ;;  %v4084_v55 = vld [vmem:[%s6273_s7 + $0x138] sm:$0xf0] }
 0x302   : > { %v2078_v18 = vadd.f32 %v2077_v56, %v1950_v13  ;;  %v1790_v23 = vadd.f32 %v5471_v46, %v1753_v17  ;;  %v4552_v56 = vld [vmem:[%s6273_s7 + $0x1dc] sm:$0xf]  ;;  %v4543_v13 = vld [vmem:[%s6273_s7 + $0x194] sm:$0xf] }
 0x304   : > { %v1854_v19 = vadd.f32 %v1822_v44, %v1790_v23  ;;  %v4139_v23 = vor.u32 %v4547_v38, %v4138_v7  ;;  %v4140_v44 = vld [vmem:[%s6273_s7 + $0x1b0] sm:$0xf0] }
 0x305   : > { %v4519_v7 = vld [vmem:[%s6273_s7 + $0xd4] sm:$0xf] }
 0x306   : > { %v1886_v36 = vpack.c.bf16 %v1854_v19, %v1854_v19  ;;  %v4750_v22 = vpack.c.bf16 %v1854_v19, %v1853_v3  ;;  %v4183_v3 = vor.u32 %v4552_v56, %v4180_v1  ;;  %v4146_v19 = vld [vmem:[%s6273_s7 + $0x198] sm:$0xf]  ;;  %2537 = vmatpush.bf16.msra.mxu0 %v4139_v23  ;;  %v1826_v1 = vunpack.c.l.bf16 %v5333_v50  ;;  %v4044_v38 = vld [vmem:[%s6273_s7 + $0xf0] sm:$0xf0] }
 0x307   : > { %v1699_v41 = vpop.f32.mrf.mxu3 }
 0x308   : > { %4806 = vst [vmem:[%s5134_s25 + $0xc8] sm:$0xff] %v4750_v22   ;;  %v1951_v58 = vunpack.c.l.bf16 %v1886_v36  ;;  %v1754_v26 = vmul.f32 %v5464_v34, %v1699_v41  ;;  %v1825_v36 = vunpack.c.l.bf16 %v5330_v45  ;;  %2575 = vmatpush.bf16.msra.mxu3 %v4183_v3  ;;  %v4143_v22 = vor.u32 %v4543_v13, %v4140_v44  ;;  %v4548_v41 = vld [vmem:[%s6273_s7 + $0x1b4] sm:$0xf0]  ;;  %v4523_v3 = vld [vmem:[%s6273_s7 + $0xec] sm:$0xf0] }
 0x309   : > { %v4050_v13 = vld [vmem:[%s6273_s7 + $0xd8] sm:$0xf]  ;;  %v4047_v44 = vor.u32 %v4519_v7, %v4044_v38 }
 0x30a   : > { %v2079_v24 = vadd.f32 %v2078_v18, %v1951_v58  ;;  %v1791_v29 = vadd.f32 %v5471_v46, %v1754_v26  ;;  %v4544_v58 = vld [vmem:[%s6273_s7 + $0x19c] sm:$0xf]  ;;  %2550 = vmatpush.bf16.msra.mxu1 %v4143_v22  ;;  %2538 = vmatpush.bf16.msra.mxu0 %v4107_v40 }
 0x30b   : > { %v4148_v26 = vld [vmem:[%s6273_s7 + $0x1b8] sm:$0xf0] }
 0x30c   : > { %v1855_v10 = vadd.f32 %v1823_v9, %v1791_v29  ;;  %v4147_v9 = vor.u32 %v4548_v41, %v4146_v19  ;;  %v4151_v45 = vor.u32 %v4544_v58, %v4148_v26  ;;  %v4052_v22 = vld [vmem:[%s6273_s7 + $0xf8] sm:$0xf0] }
 0x30e   : > { %v1887_v61 = vpack.c.bf16 %v1855_v10, %v1855_v10  ;;  %2563 = vmatpush.bf16.msra.mxu2 %v4147_v9  ;;  %2576 = vmatpush.bf16.msra.mxu3 %v4151_v45  ;;  %v4010_v9 = vld [vmem:[%s6273_s7 + $0x90] sm:$0xf] }
 0x30f   : > { %v1701_v33 = vpop.f32.mrf.mxu3  ;;  %2539 = vmatpush.bf16.msra.mxu0 %v4075_v48  ;;  %v4515_v45 = vld [vmem:[%s6273_s7 + $0xac] sm:$0xf0] }
 0x310   : > { %v1952_v35 = vunpack.c.l.bf16 %v1887_v61  ;;  %v1755_v39 = vmul.f32 %v5464_v34, %v1701_v33  ;;  %v4540_v61 = vld [vmem:[%s6273_s7 + $0x174] sm:$0xf0]  ;;  %v4011_v16 = vor.u32 %v4515_v45, %v4010_v9 }
 0x312   : > { %v2080_v20 = vadd.f32 %v2079_v24, %v1952_v35  ;;  %v1792_v62 = vadd.f32 %v5471_v46, %v1755_v39  ;;  %v4115_v35 = vor.u32 %v4540_v61, %v4114_v32  ;;  %v4536_v39 = vld [vmem:[%s6273_s7 + $0x15c] sm:$0xf]  ;;  %v1827_v32 = vunpack.c.l.bf16 %v5346_v28  ;;  %v3978_v28 = vld [vmem:[%s6273_s7 + $0x50] sm:$0xf] }
 0x314   : > { %v1856_v21 = vadd.f32 %v1824_v42, %v1792_v62  ;;  %2564 = vmatpush.bf16.msra.mxu2 %v4115_v35  ;;  %v4512_v35 = vld [vmem:[%s6273_s7 + $0x9c] sm:$0xf] }
 0x316   : > { %v1888_v57 = vpack.c.bf16 %v1856_v21, %v1856_v21  ;;  %v4755_v59 = vpack.c.bf16 %v1856_v21, %v1855_v10  ;;  %v4108_v10 = vld [vmem:[%s6273_s7 + $0x170] sm:$0xf0] }
 0x317   : > { %v1704_v60 = vpop.f32.mrf.mxu3  ;;  %v4111_v33 = vor.u32 %v4535_v63, %v4108_v10  ;;  %v4076_v21 = vld [vmem:[%s6273_s7 + $0x130] sm:$0xf0] }
 0x318   : > { %4807 = vst [vmem:[%s5134_s25 + $0xd0] sm:$0xff] %v4755_v59   ;;  %v1953_v17 = vunpack.c.l.bf16 %v1888_v57  ;;  %v1756_v18 = vmul.f32 %v5464_v34, %v1704_v60  ;;  %v4079_v37 = vor.u32 %v4527_v49, %v4076_v21  ;;  %v4087_v57 = vor.u32 %v4528_v5, %v4084_v55  ;;  %2565 = vmatpush.bf16.msra.mxu2 %v4083_v54  ;;  %v4042_v60 = vld [vmem:[%s6273_s7 + $0xd0] sm:$0xf]  ;;  %v4012_v63 = vld [vmem:[%s6273_s7 + $0xb0] sm:$0xf0] }
 0x319   : > { %2551 = vmatpush.bf16.msra.mxu1 %v4111_v33  ;;  %v1964_v59 = vlaneseq  ;;  %v4043_v50 = vor.u32 %v4523_v3, %v4042_v60  ;;  %v4015_v61 = vor.u32 %v4511_v30, %v4012_v63  ;;  %v4516_v33 = vld [vmem:[%s6273_s7 + $0xb4] sm:$0xf0]  ;;  %v3980_v49 = vld [vmem:[%s6273_s7 + $0x70] sm:$0xf0] }
 0x31a   : > { %v2081_v24 = vadd.f32 %v2080_v20, %v1953_v17  ;;  %v1793_v29 = vadd.f32 %v5471_v46, %v1756_v18  ;;  %v4116_v20 = vld [vmem:[%s6273_s7 + $0x178] sm:$0xf0]  ;;  %v4524_v17 = vld [vmem:[%s6273_s7 + $0xf4] sm:$0xf0]  ;;  %v3983_v21 = vor.u32 %v4503_v43, %v3980_v49  ;;  %v4579_v43 = vld [vmem:[%s6276_s10 + $0xb0] sm:$0xff] }
 0x31b   : > { %v4119_v42 = vor.u32 %v4536_v39, %v4116_v20  ;;  %v4051_v19 = vor.u32 %v4524_v17, %v4050_v13  ;;  %v1965_v58 = vshrl.u32 %v1964_v59, 7  ;;  %2540 = vmatpush.bf16.msra.mxu0 %v4043_v50  ;;  %v4020_v39 = vld [vmem:[%s6273_s7 + $0xb8] sm:$0xf0]  ;;  %v1828_v59 = vunpack.c.l.bf16 %v5349_v25  ;;  %v3954_v60 = vld [vmem:[%s6273_s7 + $0x18] sm:$0xf] }
 0x31c   : > { %v1857_v31 = vadd.f32 %v1825_v36, %v1793_v29  ;;  %v4520_v36 = vld [vmem:[%s6273_s7 + $0xdc] sm:$0xf]  ;;  %v4500_v3 = vld [vmem:[%s6273_s7 + $0x34] sm:$0xf0]  ;;  %v5922_v25 = vld [vmem:[%s6272_s6 + $0x1] ss:$0 sm:$0xff] }
 0x31d   : > { %2577 = vmatpush.bf16.msra.mxu3 %v4119_v42  ;;  %2552 = vmatpush.bf16.msra.mxu1 %v4079_v37  ;;  %v4055_v26 = vor.u32 %v4520_v36, %v4052_v22  ;;  %v1989_v20 = vadd.s32 192, %v1965_v58  ;;  %v4023_v42 = vor.u32 %v4512_v35, %v4020_v39  ;;  %v3988_v37 = vld [vmem:[%s6273_s7 + $0x78] sm:$0xf0]  ;;  %v3955_v13 = vor.u32 %v4500_v3, %v3954_v60 }
 0x31e   : > { %v1889_v62 = vpack.c.bf16 %v1857_v31, %v1857_v31  ;;  %2566 = vmatpush.bf16.msra.mxu2 %v4051_v19  ;;  %v3991_v5 = vor.u32 %v4504_v52, %v3988_v37  ;;  %v4496_v17 = vld [vmem:[%s6273_s7 + $0x1c] sm:$0xf] }
 0x31f   : > { %v1706_v12 = vpop.f32.mrf.mxu3  ;;  %2541 = vmatpush.bf16.msra.mxu0 %v4011_v16  ;;  %vm2021_vm0 = vcmp.lt.s32.totalorder %v1989_v20, 196  ;;  %v4568_v60 = vld [vmem:[%s6276_s10 + $0x58] sm:$0xff] }
 0x320   : > { %v1954_v51 = vunpack.c.l.bf16 %v1889_v62  ;;  %v1757_v4 = vmul.f32 %v5464_v34, %v1706_v12  ;;  %v4507_v12 = vld [vmem:[%s6273_s7 + $0x6c] sm:$0xf0]  ;;  %v4576_v3 = vld [vmem:[%s6276_s10 + $0x98] sm:$0xff] }
 0x321   : > { %2578 = vmatpush.bf16.msra.mxu3 %v4087_v57  ;;  %2553 = vmatpush.bf16.msra.mxu1 %v4047_v44  ;;  %v3979_v47 = vor.u32 %v4507_v12, %v3978_v28  ;;  %v4495_v57 = vld [vmem:[%s6273_s7 + $0x14] sm:$0xf] }
 0x322   : > { %v2082_v14 = vadd.f32 %v2081_v24, %v1954_v51  ;;  %v1794_v56 = vadd.f32 %v5471_v46, %v1757_v4  ;;  %v3986_v51 = vld [vmem:[%s6273_s7 + $0x58] sm:$0xf]  ;;  %v4563_v28 = vld [vmem:[%s6276_s10 + $0x30] sm:$0xff] }
 0x323   : > { %v4508_v4 = vld [vmem:[%s6273_s7 + $0x74] sm:$0xf0]  ;;  %2542 = vmatpush.bf16.msra.mxu0 %v3979_v47  ;;  %v4571_v12 = vld [vmem:[%s6276_s10 + $0x70] sm:$0xff] }
 0x324   : > { %v1858_v8 = vadd.f32 %v1826_v1, %v1794_v56  ;;  %v3987_v27 = vor.u32 %v4508_v4, %v3986_v51  ;;  %v3946_v56 = vld [vmem:[%s6273_s7 + $0x10] sm:$0xf]  ;;  %v4562_v51 = vld [vmem:[%s6276_s10 + $0x28] sm:$0xff] }
 0x325   : > { %2579 = vmatpush.bf16.msra.mxu3 %v4055_v26  ;;  %2554 = vmatpush.bf16.msra.mxu1 %v4015_v61  ;;  %v4499_v1 = vld [vmem:[%s6273_s7 + $0x2c] sm:$0xf0]  ;;  %v1830_v61 = vunpack.c.l.bf16 %v5365_v11  ;;  %v4580_v11 = vld [vmem:[%s6276_s10 + $0xb8] sm:$0xff]  ;;  %v4570_v4 = vld [vmem:[%s6276_s10 + $0x68] sm:$0xff] }
 0x326   : > { %v1890_v18 = vpack.c.bf16 %v1858_v8, %v1858_v8  ;;  %v4760_v23 = vpack.c.bf16 %v1858_v8, %v1857_v31  ;;  %v4018_v31 = vld [vmem:[%s6273_s7 + $0x98] sm:$0xf]  ;;  %v3947_v8 = vor.u32 %v4499_v1, %v3946_v56  ;;  %v4587_v47 = vld [vmem:[%s6276_s10 + $0xf0] sm:$0xff]  ;;  %v4569_v56 = vld [vmem:[%s6276_s10 + $0x60] sm:$0xff] }
 0x327   : > { %v1709_v41 = vpop.f32.mrf.mxu3  ;;  %v4019_v62 = vor.u32 %v4516_v33, %v4018_v31 }
 0x328   : > { %4808 = vst [vmem:[%s5134_s25 + $0xd8] sm:$0xff] %v4760_v23   ;;  %v1955_v24 = vunpack.c.l.bf16 %v1890_v18  ;;  %v1758_v29 = vmul.f32 %v5464_v34, %v1709_v41  ;;  %v3956_v18 = vld [vmem:[%s6273_s7 + $0x38] sm:$0xf0]  ;;  %2543 = vmatpush.bf16.msra.mxu0 %v3947_v8 }
 0x329   : > { %2567 = vmatpush.bf16.msra.mxu2 %v4019_v62  ;;  %2580 = vmatpush.bf16.msra.mxu3 %v4023_v42  ;;  %v3959_v44 = vor.u32 %v4496_v17, %v3956_v18  ;;  %v4564_v42 = vld [vmem:[%s6276_s10 + $0x38] sm:$0xff]  ;;  %v4575_v17 = vld [vmem:[%s6276_s10 + $0x90] sm:$0xff] }
 0x32a   : > { %v2083_v40 = vadd.f32 %v2082_v14, %v1955_v24  ;;  %v1795_v10 = vadd.f32 %v5471_v46, %v1758_v29  ;;  %2555 = vmatpush.bf16.msra.mxu1 %v3983_v21  ;;  %v5935_v29 = vld [vmem:[%s6271_s5 + $0x1] ss:$0 sm:$0xff]  ;;  %v4578_v21 = vld [vmem:[%s6276_s10 + $0xa8] sm:$0xff]  ;;  %v4583_v18 = vld [vmem:[%s6276_s10 + $0xd0] sm:$0xff] }
 0x32c   : > { %v1859_v46 = vadd.f32 %v1827_v32, %v1795_v10  ;;  %v1829_v10 = vunpack.c.l.bf16 %v5361_v2  ;;  %v4572_v2 = vld [vmem:[%s6276_s10 + $0x78] sm:$0xff] }
 0x32d   : > { %2568 = vmatpush.bf16.msra.mxu2 %v3987_v27  ;;  %2581 = vmatpush.bf16.msra.mxu3 %v3991_v5  ;;  %v4586_v27 = vld [vmem:[%s6276_s10 + $0xe8] sm:$0xff] }
 0x32e   : > { %v1891_v48 = vpack.c.bf16 %v1859_v46, %v1859_v46 }
 0x32f   : > { %v1711_v54 = vpop.f32.mrf.mxu3 }
 0x330   : > { %v1956_v55 = vunpack.c.l.bf16 %v1891_v48  ;;  %v1759_v14 = vmul.f32 %v5464_v34, %v1711_v54  ;;  %v3948_v34 = vld [vmem:[%s6273_s7 + $0x30] sm:$0xf0]  ;;  %v1831_v54 = vunpack.c.l.bf16 %v5377_v53  ;;  %v4577_v53 = vld [vmem:[%s6276_s10 + $0xa0] sm:$0xff] }
 0x331   : > { %v3951_v38 = vor.u32 %v4495_v57, %v3948_v34  ;;  %2569 = vmatpush.bf16.msra.mxu2 %v3955_v13  ;;  %2582 = vmatpush.bf16.msra.mxu3 %v3959_v44  ;;  %v4560_v34 = vld [vmem:[%s6276_s10 + $0x18] sm:$0xff]  ;;  %v4558_v44 = vld [vmem:[%s6276_s10 + $0x8] sm:$0xff] }
 0x332   : > { %v2053_v7 = vsel %vm2021_vm0, %v1956_v55, 0.0  ;;  %v1796_v50 = vadd.f32 %v5922_v25, %v1759_v14  ;;  %v1832_v55 = vunpack.c.l.bf16 %v5393_v6  ;;  %v4561_v14 = vld [vmem:[%s6276_s10 + $0x20] sm:$0xff] }
 0x333   : > { %v2084_v23 = vadd.f32 %v2083_v40, %v2053_v7  ;;  %2556 = vmatpush.bf16.msra.mxu1 %v3951_v38  ;;  %v4585_v6 = vld [vmem:[%s6276_s10 + $0xe0] sm:$0xff]  ;;  %v4584_v7 = vld [vmem:[%s6276_s10 + $0xd8] sm:$0xff]  ;;  %v4567_v38 = vld [vmem:[%s6276_s10 + $0x50] sm:$0xff] }
 0x334   : > { %v1860_v19 = vadd.f32 %v1828_v59, %v1796_v50  ;;  %v4559_v50 = vld [vmem:[%s6276_s10 + $0x10] sm:$0xff] }
 0x335   : > { %v2092_v36 = vrot.slane %v2084_v23, 4 }
 0x336   : > { %v4765_v22 = vpack.c.bf16 %v1860_v19, %v1859_v46  ;;  %v4588_v46 = vld [vmem:[%s6276_s10 + $0xf8] sm:$0xff]  ;;  %v4566_v19 = vld [vmem:[%s6276_s10 + $0x48] sm:$0xff] }
 0x337   : > { %v2093_v41 = vadd.f32 %v2092_v36, %v2084_v23  ;;  %v1714_v58 = vpop.f32.mrf.mxu3 }
 0x338   : > { %4809 = vst [vmem:[%s5134_s25 + $0xe0] sm:$0xff] %v4765_v22   ;;  %v1760_v9 = vmul.f32 %v5935_v29, %v1714_v58  ;;  %v4582_v58 = vld [vmem:[%s6276_s10 + $0xc8] sm:$0xff] }
 0x339   : > { %v2094_v26 = vrot.slane %v2093_v41, 2 }
 0x33a   : > { %v1797_v63 = vadd.f32 %v5922_v25, %v1760_v9  ;;  %v1834_v9 = vunpack.c.l.bf16 %v5421_v15  ;;  %v4604_v15 = vld [vmem:[%s6276_s10 + $0x178] sm:$0xff] }
 0x33b   : > { %v2095_v24 = vadd.f32 %v2094_v26, %v2093_v41  ;;  %v4574_v41 = vld [vmem:[%s6276_s10 + $0x88] sm:$0xff]  ;;  %v1833_v26 = vunpack.c.l.bf16 %v5417_v0  ;;  %v4596_v0 = vld [vmem:[%s6276_s10 + $0x138] sm:$0xff] }
 0x33c   : > { %v1861_v35 = vadd.f32 %v1829_v10, %v1797_v63  ;;  %v4581_v63 = vld [vmem:[%s6276_s10 + $0xc0] sm:$0xff]  ;;  %v4603_v10 = vld [vmem:[%s6276_s10 + $0x170] sm:$0xff] }
 0x33d   : > { %v2096_v45 = vrot.slane %v2095_v24, 1 }
 0x33f   : > { %v2097_v16 = vadd.f32 %v2096_v45, %v2095_v24  ;;  %v1716_v30 = vpop.f32.mrf.mxu3  ;;  %v4565_v45 = vld [vmem:[%s6276_s10 + $0x40] sm:$0xff] }
 0x340   : > { %v1761_v31 = vmul.f32 %v5935_v29, %v1716_v30 }
 0x341   : > { %v2098_v40 = vmul.f32 0.0051020407, %v2097_v16 }
 0x342   : > { %v1798_v32 = vadd.f32 %v5922_v25, %v1761_v31 }
 0x343   : > { %v2099_v33 = vpack.c.bf16 %v2098_v40, %v2098_v40  ;;  %v4595_v40 = vld [vmem:[%s6276_s10 + $0x130] sm:$0xff] }
 0x344   : > { %v1862_v39 = vadd.f32 %v1830_v61, %v1798_v32  ;;  %v4612_v32 = vld [vmem:[%s6276_s10 + $0x1b8] sm:$0xff] }
 0x345   : > { %2492 = vmatmul.bf16.vlgmr.msrb.gmra.mxu0 %v2099_v33  ;;  %2505 = vmatmul.bf16.vlgmr.msrb.gmra.mxu1 %v2099_v33  ;;  %v4620_v61 = vld [vmem:[%s6276_s10 + $0x1f8] sm:$0xff] }
 0x346   : > { %v4770_v20 = vpack.c.bf16 %v1862_v39, %v1861_v35  ;;  %2518 = vmatmul.bf16.vlgmr.msrb.gmra.mxu2 %v2099_v33  ;;  %2531 = vmatmul.bf16.vlgmr.msrb.gmra.mxu3 %v2099_v33  ;;  %v4602_v35 = vld [vmem:[%s6276_s10 + $0x168] sm:$0xff]  ;;  %v4611_v39 = vld [vmem:[%s6276_s10 + $0x1b0] sm:$0xff] }
 0x347   : > { %v1719_v62 = vpop.f32.mrf.mxu3  ;;  %3169 = vmatpush.bf16.msrb.mxu0 %v4564_v42  ;;  %3182 = vmatpush.bf16.msrb.mxu1 %v4572_v2  ;;  %v4601_v42 = vld [vmem:[%s6276_s10 + $0x160] sm:$0xff]  ;;  %v4610_v2 = vld [vmem:[%s6276_s10 + $0x1a8] sm:$0xff] }
 0x348   : > { %4810 = vst [vmem:[%s5134_s25 + $0xe8] sm:$0xff] %v4770_v20   ;;  %3195 = vmatpush.bf16.msrb.mxu2 %v4580_v11  ;;  %3208 = vmatpush.bf16.msrb.mxu3 %v4588_v46  ;;  %v1762_v49 = vmul.f32 %v5935_v29, %v1719_v62  ;;  %v4619_v20 = vld [vmem:[%s6276_s10 + $0x1f0] sm:$0xff]  ;;  %v4593_v62 = vld [vmem:[%s6276_s10 + $0x120] sm:$0xff]  ;;  %v4618_v11 = vld [vmem:[%s6276_s10 + $0x1e8] sm:$0xff] }
 0x349   : > { %v4592_v46 = vld [vmem:[%s6276_s10 + $0x118] sm:$0xff] }
 0x34a   : > { %v1799_v52 = vadd.f32 %v5922_v25, %v1762_v49  ;;  %v4599_v49 = vld [vmem:[%s6276_s10 + $0x150] sm:$0xff] }
 0x34b   : > { %3170 = vmatpush.bf16.msrb.mxu0 %v4563_v28  ;;  %3183 = vmatpush.bf16.msrb.mxu1 %v4571_v12  ;;  %v4600_v28 = vld [vmem:[%s6276_s10 + $0x158] sm:$0xff]  ;;  %v4609_v12 = vld [vmem:[%s6276_s10 + $0x1a0] sm:$0xff] }
 0x34c   : > { %3196 = vmatpush.bf16.msrb.mxu2 %v4579_v43  ;;  %3209 = vmatpush.bf16.msrb.mxu3 %v4587_v47  ;;  %v1863_v1 = vadd.f32 %v1831_v54, %v1799_v52  ;;  %v4617_v43 = vld [vmem:[%s6276_s10 + $0x1e0] sm:$0xff]  ;;  %v4591_v47 = vld [vmem:[%s6276_s10 + $0x110] sm:$0xff] }
 0x34d   : > { %v4615_v52 = vld [vmem:[%s6276_s10 + $0x1d0] sm:$0xff]  ;;  %v4597_v54 = vld [vmem:[%s6276_s10 + $0x140] sm:$0xff] }
 0x34f   : > { %v1721_v48 = vpop.f32.mrf.mxu3  ;;  %3171 = vmatpush.bf16.msrb.mxu0 %v4562_v51  ;;  %3184 = vmatpush.bf16.msrb.mxu1 %v4570_v4  ;;  %v4608_v51 = vld [vmem:[%s6276_s10 + $0x198] sm:$0xff] }
 0x350   : > { %v1763_v37 = vmul.f32 %v5935_v29, %v1721_v48  ;;  %3197 = vmatpush.bf16.msrb.mxu2 %v4578_v21  ;;  %3210 = vmatpush.bf16.msrb.mxu3 %v4586_v27  ;;  %v4616_v4 = vld [vmem:[%s6276_s10 + $0x1d8] sm:$0xff]  ;;  %v4590_v48 = vld [vmem:[%s6276_s10 + $0x108] sm:$0xff]  ;;  %v4607_v27 = vld [vmem:[%s6276_s10 + $0x190] sm:$0xff] }
 0x351   : > { %v4598_v21 = vld [vmem:[%s6276_s10 + $0x148] sm:$0xff] }
 0x352   : > { %v1800_v5 = vadd.f32 %v5922_v25, %v1763_v37  ;;  %v4589_v37 = vld [vmem:[%s6276_s10 + $0x100] sm:$0xff] }
 0x353   : > { %3172 = vmatpush.bf16.msrb.mxu0 %v4561_v14  ;;  %3185 = vmatpush.bf16.msrb.mxu1 %v4569_v56  ;;  %v6147_v14 = vld [vmem:[%s6274_s8] sm:$0xff] }
 0x354   : > { %v1864_v57 = vadd.f32 %v1832_v55, %v1800_v5  ;;  %3198 = vmatpush.bf16.msrb.mxu2 %v4577_v53  ;;  %3211 = vmatpush.bf16.msrb.mxu3 %v4585_v6  ;;  %v4606_v5 = vld [vmem:[%s6276_s10 + $0x188] sm:$0xff]  ;;  %v4605_v56 = vld [vmem:[%s6276_s10 + $0x180] sm:$0xff]  ;;  %v2590_v53 = vperm.slane %v6147_v14, 0  ;;  %v2591_v6 = vperm.slane %v6147_v14, 1 }
 0x355   : > { %2544 = vmatmul.bf16.vlgmr.msra.gmra.mxu0 %v2099_v33  ;;  %2557 = vmatmul.bf16.vlgmr.msra.gmra.mxu1 %v2099_v33  ;;  %v4614_v55 = vld [vmem:[%s6276_s10 + $0x1c8] sm:$0xff] }
 0x356   : > { %v4775_v59 = vpack.c.bf16 %v1864_v57, %v1863_v1  ;;  %2570 = vmatmul.bf16.vlgmr.msra.gmra.mxu2 %v2099_v33  ;;  %2583 = vmatmul.bf16.vlgmr.msra.gmra.mxu3 %v2099_v33  ;;  %v4594_v33 = vld [vmem:[%s6276_s10 + $0x128] sm:$0xff]  ;;  %v4613_v1 = vld [vmem:[%s6276_s10 + $0x1c0] sm:$0xff] }
 0x357   : > { %v1724_v8 = vpop.f32.mrf.mxu3  ;;  %3173 = vmatpush.bf16.msrb.mxu0 %v4560_v34  ;;  %3186 = vmatpush.bf16.msrb.mxu1 %v4568_v60  ;;  %v6158_v57 = vld [vmem:[%s6275_s9] sm:$0xff] }
 0x358   : > { %4811 = vst [vmem:[%s5134_s25 + $0xf0] sm:$0xff] %v4775_v59   ;;  %v1764_v13 = vmul.f32 %v5935_v29, %v1724_v8  ;;  %3199 = vmatpush.bf16.msrb.mxu2 %v4576_v3  ;;  %3212 = vmatpush.bf16.msrb.mxu3 %v4584_v7  ;;  %v2616_v59 = vperm.slane %v6158_v57, 0  ;;  %v2617_v8 = vperm.slane %v6158_v57, 1 }
 0x35a   : > { %v1801_v36 = vadd.f32 %v5922_v25, %v1764_v13  ;;  %v2592_v13 = vperm.slane %v6147_v14, 2 }
 0x35b   : > { %3174 = vmatpush.bf16.msrb.mxu0 %v4559_v50  ;;  %3187 = vmatpush.bf16.msrb.mxu1 %v4567_v38 }
 0x35c   : > { %3200 = vmatpush.bf16.msrb.mxu2 %v4575_v17  ;;  %3213 = vmatpush.bf16.msrb.mxu3 %v4583_v18  ;;  %v1865_v16 = vadd.f32 %v1833_v26, %v1801_v36  ;;  %v2593_v17 = vperm.slane %v6147_v14, 3 }
 0x35f   : > { %v1726_v23 = vpop.f32.mrf.mxu3  ;;  %3175 = vmatpush.bf16.msrb.mxu0 %v4558_v44  ;;  %3188 = vmatpush.bf16.msrb.mxu1 %v4566_v19  ;;  %v2618_v44 = vperm.slane %v6158_v57, 2  ;;  %v2619_v19 = vperm.slane %v6158_v57, 3 }
 0x360   : > { %v1765_v22 = vmul.f32 %v5935_v29, %v1726_v23  ;;  %v4557_v29 = vld [vmem:[%s6276_s10] sm:$0xff]  ;;  %3201 = vmatpush.bf16.msrb.mxu2 %v4574_v41  ;;  %3214 = vmatpush.bf16.msrb.mxu3 %v4582_v58 }
 0x362   : > { %v1802_v24 = vadd.f32 %v5922_v25, %v1765_v22  ;;  %v4573_v25 = vld [vmem:[%s6276_s10 + $0x80] sm:$0xff] }
 0x363   : > { %3176 = vmatpush.bf16.msrb.mxu0 %v4557_v29  ;;  %3189 = vmatpush.bf16.msrb.mxu1 %v4565_v45 }
 0x364   : > { %v1866_v30 = vadd.f32 %v1834_v9, %v1802_v24  ;;  %3202 = vmatpush.bf16.msrb.mxu2 %v4573_v25  ;;  %3215 = vmatpush.bf16.msrb.mxu3 %v4581_v63  ;;  %v2595_v25 = vperm.slane %v6147_v14, 5 }
 0x366   : > { %v4780_v31 = vpack.c.bf16 %v1866_v30, %v1865_v16 }
 0x367   : > { %3221 = vmatpush.bf16.msra.mxu0 %v4596_v0  ;;  %3234 = vmatpush.bf16.msra.mxu1 %v4604_v15  ;;  %v2594_v15 = vperm.slane %v6147_v14, 4 }
 0x368   : > { %4812 = vst [vmem:[%s5134_s25 + $0xf8] sm:$0xff] %v4780_v31   ;;  %3247 = vmatpush.bf16.msra.mxu2 %v4612_v32  ;;  %3260 = vmatpush.bf16.msra.mxu3 %v4620_v61  ;;  %v2620_v32 = vperm.slane %v6158_v57, 4  ;;  %v2621_v61 = vperm.slane %v6158_v57, 5 }
 0x36b   : > { %3222 = vmatpush.bf16.msra.mxu0 %v4595_v40  ;;  %3235 = vmatpush.bf16.msra.mxu1 %v4603_v10 }
 0x36c   : > { %3248 = vmatpush.bf16.msra.mxu2 %v4611_v39  ;;  %3261 = vmatpush.bf16.msra.mxu3 %v4619_v20 }
 0x36f   : > { %3223 = vmatpush.bf16.msra.mxu0 %v4594_v33  ;;  %3236 = vmatpush.bf16.msra.mxu1 %v4602_v35 }
 0x370   : > { %3249 = vmatpush.bf16.msra.mxu2 %v4610_v2  ;;  %3262 = vmatpush.bf16.msra.mxu3 %v4618_v11  ;;  %v2596_v2 = vperm.slane %v6147_v14, 6  ;;  %v2597_v11 = vperm.slane %v6147_v14, 7 }
 0x373   : > { %3224 = vmatpush.bf16.msra.mxu0 %v4593_v62  ;;  %3237 = vmatpush.bf16.msra.mxu1 %v4601_v42 }
 0x374   : > { %3250 = vmatpush.bf16.msra.mxu2 %v4609_v12  ;;  %3263 = vmatpush.bf16.msra.mxu3 %v4617_v43  ;;  %v2622_v12 = vperm.slane %v6158_v57, 6  ;;  %v2623_v43 = vperm.slane %v6158_v57, 7 }
 0x377   : > { %3225 = vmatpush.bf16.msra.mxu0 %v4592_v46  ;;  %3238 = vmatpush.bf16.msra.mxu1 %v4600_v28 }
 0x378   : > { %3251 = vmatpush.bf16.msra.mxu2 %v4608_v51  ;;  %3264 = vmatpush.bf16.msra.mxu3 %v4616_v4 }
 0x37b   : > { %3226 = vmatpush.bf16.msra.mxu0 %v4591_v47  ;;  %3239 = vmatpush.bf16.msra.mxu1 %v4599_v49 }
 0x37c   : > { %3252 = vmatpush.bf16.msra.mxu2 %v4607_v27  ;;  %3265 = vmatpush.bf16.msra.mxu3 %v4615_v52 }
 0x37f   : > { %3227 = vmatpush.bf16.msra.mxu0 %v4590_v48  ;;  %3240 = vmatpush.bf16.msra.mxu1 %v4598_v21 }
 0x380   : > { %3253 = vmatpush.bf16.msra.mxu2 %v4606_v5  ;;  %3266 = vmatpush.bf16.msra.mxu3 %v4614_v55 }
 0x383   : > { %3228 = vmatpush.bf16.msra.mxu0 %v4589_v37  ;;  %3241 = vmatpush.bf16.msra.mxu1 %v4597_v54 }
 0x384   : > { %3254 = vmatpush.bf16.msra.mxu2 %v4605_v56  ;;  %3267 = vmatpush.bf16.msra.mxu3 %v4613_v1 }
 0x3c2   : > { %v2493_v34 = vpop.f32.mrf.mxu0  ;;  %v2506_v60 = vpop.f32.mrf.mxu1 }
 0x3c3   : > { %v2606_v3 = vmul.f32 %v2590_v53, %v2493_v34  ;;  %v2607_v7 = vmul.f32 %v2591_v6, %v2506_v60 }
 0x3c5   : > { %v2632_v50 = vadd.f32 %v2616_v59, %v2606_v3  ;;  %v2633_v38 = vadd.f32 %v2617_v8, %v2607_v7  ;;  %v2784_v59 = vld [vmem:[%s6277_s11] sm:$0x1] }
 0x3c7   : > { %v2640_v18 = vmax.f32 %v2632_v50, 0.0  ;;  %v2641_v23 = vmax.f32 %v2633_v38, 0.0 }
 0x3c9   : > { %v2648_v36 = vpack.c.bf16 %v2640_v18, %v2640_v18  ;;  %v2649_v22 = vpack.c.bf16 %v2641_v23, %v2641_v23  ;;  %v2519_v41 = vpop.f32.mrf.mxu2  ;;  %v2532_v58 = vpop.f32.mrf.mxu3 }
 0x3ca   : > { %v2608_v26 = vmul.f32 %v2592_v13, %v2519_v41  ;;  %v2609_v24 = vmul.f32 %v2593_v17, %v2532_v58  ;;  %v2495_v9 = vpop.f32.mrf.mxu0  ;;  %v2508_v29 = vpop.f32.mrf.mxu1 }
 0x3cb   : > { %3177 = vmatmul.bf16.vlgmr.msrb.gmra.mxu0 %v2648_v36  ;;  %3190 = vmatmul.bf16.vlgmr.msrb.gmra.mxu1 %v2649_v22 }
 0x3cc   : > { %v2634_v45 = vadd.f32 %v2618_v44, %v2608_v26  ;;  %v2635_v16 = vadd.f32 %v2619_v19, %v2609_v24 }
 0x3ce   : > { %v2642_v30 = vmax.f32 %v2634_v45, 0.0  ;;  %v2643_v0 = vmax.f32 %v2635_v16, 0.0 }
 0x3d0   : > { %v2650_v63 = vpack.c.bf16 %v2642_v30, %v2642_v30  ;;  %v2651_v31 = vpack.c.bf16 %v2643_v0, %v2643_v0  ;;  %v3305_v30 = vld [vmem:[%s5134_s25] sm:$0xff] (%p4966_p4)   ;;  %v3309_v0 = vld [vmem:[%s5134_s25 + $0x8] sm:$0xff] (%p4966_p4)  }
 0x3d1   : > { %v2521_v40 = vpop.f32.mrf.mxu2  ;;  %v2534_v10 = vpop.f32.mrf.mxu3  ;;  %3306 = vst [vmem:[%s6192_s17] sm:$0xff] (%p4966_p4), %v3305_v30  }
 0x3d2   : > { %3203 = vmatmul.bf16.vlgmr.msrb.gmra.mxu2 %v2650_v63  ;;  %3216 = vmatmul.bf16.vlgmr.msrb.gmra.mxu3 %v2651_v31  ;;  %v2545_v33 = vpop.f32.mrf.mxu0  ;;  %v2558_v35 = vpop.f32.mrf.mxu1  ;;  %3310 = vst [vmem:[%s6192_s17 + $0x8] sm:$0xff] (%p4966_p4), %v3309_v0   ;;  %v3321_v63 = vld [vmem:[%s5134_s25 + $0x20] sm:$0xff] (%p4966_p4)   ;;  %v3325_v31 = vld [vmem:[%s5134_s25 + $0x28] sm:$0xff] (%p4966_p4)   ;;  %v3329_v40 = vld [vmem:[%s5134_s25 + $0x30] sm:$0xff] (%p4966_p4)  }
 0x3d3   : > { %v2610_v39 = vmul.f32 %v2594_v15, %v2545_v33  ;;  %v2611_v20 = vmul.f32 %v2595_v25, %v2558_v35  ;;  %v3313_v15 = vld [vmem:[%s5134_s25 + $0x10] sm:$0xff] (%p4966_p4)   ;;  %v3317_v25 = vld [vmem:[%s5134_s25 + $0x18] sm:$0xff] (%p4966_p4)   ;;  %3322 = vst [vmem:[%s6192_s17 + $0x20] sm:$0xff] (%p4966_p4), %v3321_v63  }
 0x3d4   : > { %3314 = vst [vmem:[%s6192_s17 + $0x10] sm:$0xff] (%p4966_p4), %v3313_v15   ;;  %v3333_v10 = vld [vmem:[%s5134_s25 + $0x38] sm:$0xff] (%p4966_p4)   ;;  %v3345_v33 = vld [vmem:[%s5134_s25 + $0x50] sm:$0xff] (%p4966_p4)  }
 0x3d5   : > { %v2636_v62 = vadd.f32 %v2620_v32, %v2610_v39  ;;  %v2637_v42 = vadd.f32 %v2621_v61, %v2611_v20  ;;  %3318 = vst [vmem:[%s6192_s17 + $0x18] sm:$0xff] (%p4966_p4), %v3317_v25   ;;  %v3337_v32 = vld [vmem:[%s5134_s25 + $0x40] sm:$0xff] (%p4966_p4)   ;;  %v3341_v61 = vld [vmem:[%s5134_s25 + $0x48] sm:$0xff] (%p4966_p4)   ;;  %v3349_v35 = vld [vmem:[%s5134_s25 + $0x58] sm:$0xff] (%p4966_p4)  }
 0x3d6   : > { %3326 = vst [vmem:[%s6192_s17 + $0x28] sm:$0xff] (%p4966_p4), %v3325_v31   ;;  %v3353_v39 = vld [vmem:[%s5134_s25 + $0x60] sm:$0xff] (%p4966_p4)   ;;  %v3357_v20 = vld [vmem:[%s5134_s25 + $0x68] sm:$0xff] (%p4966_p4)  }
 0x3d7   : > { %v2644_v46 = vmax.f32 %v2636_v62, 0.0  ;;  %v2645_v28 = vmax.f32 %v2637_v42, 0.0  ;;  %3330 = vst [vmem:[%s6192_s17 + $0x30] sm:$0xff] (%p4966_p4), %v3329_v40   ;;  %v3361_v62 = vld [vmem:[%s5134_s25 + $0x70] sm:$0xff] (%p4966_p4)   ;;  %v3365_v42 = vld [vmem:[%s5134_s25 + $0x78] sm:$0xff] (%p4966_p4)  }
 0x3d8   : > { %3334 = vst [vmem:[%s6192_s17 + $0x38] sm:$0xff] (%p4966_p4), %v3333_v10  }
 0x3d9   : > { %v2652_v47 = vpack.c.bf16 %v2644_v46, %v2644_v46  ;;  %v2653_v49 = vpack.c.bf16 %v2645_v28, %v2645_v28  ;;  %v2571_v51 = vpop.f32.mrf.mxu2  ;;  %v2584_v4 = vpop.f32.mrf.mxu3  ;;  %3338 = vst [vmem:[%s6192_s17 + $0x40] sm:$0xff] (%p4966_p4), %v3337_v32   ;;  %v3377_v46 = vld [vmem:[%s5134_s25 + $0x90] sm:$0xff] (%p4966_p4)   ;;  %v3381_v28 = vld [vmem:[%s5134_s25 + $0x98] sm:$0xff] (%p4966_p4)  }
 0x3da   : > { %v2612_v48 = vmul.f32 %v2596_v2, %v2571_v51  ;;  %v2613_v21 = vmul.f32 %v2597_v11, %v2584_v4  ;;  %v2547_v27 = vpop.f32.mrf.mxu0  ;;  %v2560_v52 = vpop.f32.mrf.mxu1  ;;  %3342 = vst [vmem:[%s6192_s17 + $0x48] sm:$0xff] (%p4966_p4), %v3341_v61   ;;  %v3369_v2 = vld [vmem:[%s5134_s25 + $0x80] sm:$0xff] (%p4966_p4)   ;;  %v3373_v11 = vld [vmem:[%s5134_s25 + $0x88] sm:$0xff] (%p4966_p4)  }
 0x3db   : > { %3229 = vmatmul.bf16.vlgmr.msra.gmra.mxu0 %v2652_v47  ;;  %3242 = vmatmul.bf16.vlgmr.msra.gmra.mxu1 %v2653_v49  ;;  %3346 = vst [vmem:[%s6192_s17 + $0x50] sm:$0xff] (%p4966_p4), %v3345_v33   ;;  %v3393_v47 = vld [vmem:[%s5134_s25 + $0xb0] sm:$0xff] (%p4966_p4)   ;;  %v3397_v49 = vld [vmem:[%s5134_s25 + $0xb8] sm:$0xff] (%p4966_p4)   ;;  %v3401_v51 = vld [vmem:[%s5134_s25 + $0xc0] sm:$0xff] (%p4966_p4)  }
 0x3dc   : > { %v2638_v37 = vadd.f32 %v2622_v12, %v2612_v48  ;;  %v2639_v54 = vadd.f32 %v2623_v43, %v2613_v21  ;;  %3350 = vst [vmem:[%s6192_s17 + $0x58] sm:$0xff] (%p4966_p4), %v3349_v35   ;;  %v3385_v12 = vld [vmem:[%s5134_s25 + $0xa0] sm:$0xff] (%p4966_p4)   ;;  %v3389_v43 = vld [vmem:[%s5134_s25 + $0xa8] sm:$0xff] (%p4966_p4)   ;;  %v3409_v48 = vld [vmem:[%s5134_s25 + $0xd0] sm:$0xff] (%p4966_p4)  }
 0x3dd   : > { %3354 = vst [vmem:[%s6192_s17 + $0x60] sm:$0xff] (%p4966_p4), %v3353_v39   ;;  %v3405_v4 = vld [vmem:[%s5134_s25 + $0xc8] sm:$0xff] (%p4966_p4)   ;;  %v3413_v21 = vld [vmem:[%s5134_s25 + $0xd8] sm:$0xff] (%p4966_p4)   ;;  %v3417_v27 = vld [vmem:[%s5134_s25 + $0xe0] sm:$0xff] (%p4966_p4)  }
 0x3de   : > { %v2646_v5 = vmax.f32 %v2638_v37, 0.0  ;;  %v2647_v55 = vmax.f32 %v2639_v54, 0.0  ;;  %3358 = vst [vmem:[%s6192_s17 + $0x68] sm:$0xff] (%p4966_p4), %v3357_v20   ;;  %v3421_v52 = vld [vmem:[%s5134_s25 + $0xe8] sm:$0xff] (%p4966_p4)   ;;  %v3425_v37 = vld [vmem:[%s5134_s25 + $0xf0] sm:$0xff] (%p4966_p4)   ;;  %v3429_v54 = vld [vmem:[%s5134_s25 + $0xf8] sm:$0xff] (%p4966_p4)  }
 0x3df   : > { %3362 = vst [vmem:[%s6192_s17 + $0x70] sm:$0xff] (%p4966_p4), %v3361_v62  }
 0x3e0   : > { %v2654_v14 = vpack.c.bf16 %v2646_v5, %v2646_v5  ;;  %v2655_v56 = vpack.c.bf16 %v2647_v55, %v2647_v55  ;;  %3366 = vst [vmem:[%s6192_s17 + $0x78] sm:$0xff] (%p4966_p4), %v3365_v42  }
 0x3e1   : > { %v2573_v1 = vpop.f32.mrf.mxu2  ;;  %v2586_v53 = vpop.f32.mrf.mxu3  ;;  %3370 = vst [vmem:[%s6192_s17 + $0x100] sm:$0xff] (%p4966_p4), %v3369_v2  }
 0x3e2   : > { %3255 = vmatmul.bf16.vlgmr.msra.gmra.mxu2 %v2654_v14  ;;  %3268 = vmatmul.bf16.vlgmr.msra.gmra.mxu3 %v2655_v56  ;;  %3374 = vst [vmem:[%s6192_s17 + $0x108] sm:$0xff] (%p4966_p4), %v3373_v11  }
 0x3e3   : > { %3378 = vst [vmem:[%s6192_s17 + $0x110] sm:$0xff] (%p4966_p4), %v3377_v46  }
 0x3e4   : > { %3382 = vst [vmem:[%s6192_s17 + $0x118] sm:$0xff] (%p4966_p4), %v3381_v28  }
 0x3e5   : > { %3386 = vst [vmem:[%s6192_s17 + $0x120] sm:$0xff] (%p4966_p4), %v3385_v12  }
 0x3e6   : > { %3390 = vst [vmem:[%s6192_s17 + $0x128] sm:$0xff] (%p4966_p4), %v3389_v43  }
 0x3e7   : > { %3394 = vst [vmem:[%s6192_s17 + $0x130] sm:$0xff] (%p4966_p4), %v3393_v47  }
 0x3e8   : > { %3398 = vst [vmem:[%s6192_s17 + $0x138] sm:$0xff] (%p4966_p4), %v3397_v49  }
 0x3e9   : > { %3402 = vst [vmem:[%s6192_s17 + $0x140] sm:$0xff] (%p4966_p4), %v3401_v51  }
 0x3ea   : > { %3406 = vst [vmem:[%s6192_s17 + $0x148] sm:$0xff] (%p4966_p4), %v3405_v4  }
 0x3eb   : > { %3410 = vst [vmem:[%s6192_s17 + $0x150] sm:$0xff] (%p4966_p4), %v3409_v48  }
 0x3ec   : > { %3414 = vst [vmem:[%s6192_s17 + $0x158] sm:$0xff] (%p4966_p4), %v3413_v21  }
 0x3ed   : > { %3418 = vst [vmem:[%s6192_s17 + $0x160] sm:$0xff] (%p4966_p4), %v3417_v27  }
 0x3ee   : > { %3422 = vst [vmem:[%s6192_s17 + $0x168] sm:$0xff] (%p4966_p4), %v3421_v52  }
 0x3ef   : > { %3426 = vst [vmem:[%s6192_s17 + $0x170] sm:$0xff] (%p4966_p4), %v3425_v37  }
 0x3f0   : > { %3430 = vst [vmem:[%s6192_s17 + $0x178] sm:$0xff] (%p4966_p4), %v3429_v54  }
 0x448   : > { %v3178_v57 = vpop.f32.mrf.mxu0  ;;  %v3191_v6 = vpop.f32.mrf.mxu1 }
 0x449   : > { %v3179_v60 = vadd.f32 %v3178_v57, %v2784_v59 }
 0x44b   : > { %v3192_v50 = vadd.f32 %v3191_v6, %v3179_v60 }
 0x450   : > { %v3180_v8 = vpop.f32.mrf.mxu0  ;;  %v3193_v34 = vpop.f32.mrf.mxu1 }
 0x455   : > { %v3204_v3 = vpop.f32.mrf.mxu2  ;;  %v3217_v7 = vpop.f32.mrf.mxu3 }
 0x456   : > { %v3205_v38 = vadd.f32 %v3204_v3, %v3192_v50 }
 0x458   : > { %v3230_v13 = vpop.f32.mrf.mxu0  ;;  %v3243_v17 = vpop.f32.mrf.mxu1  ;;  %v3218_v18 = vadd.f32 %v3217_v7, %v3205_v38 }
 0x45a   : > { %v3231_v19 = vadd.f32 %v3230_v13, %v3218_v18 }
 0x45c   : > { %v3244_v41 = vadd.f32 %v3243_v17, %v3231_v19 }
 0x45d   : > { %v3206_v23 = vpop.f32.mrf.mxu2  ;;  %v3219_v44 = vpop.f32.mrf.mxu3 }
 0x460   : > { %v3232_v36 = vpop.f32.mrf.mxu0  ;;  %v3245_v22 = vpop.f32.mrf.mxu1 }
 0x465   : > { %v3256_v58 = vpop.f32.mrf.mxu2  ;;  %v3269_v26 = vpop.f32.mrf.mxu3 }
 0x466   : > { %v3257_v24 = vadd.f32 %v3256_v58, %v3244_v41 }
 0x468   : > { %v3270_v9 = vadd.f32 %v3269_v26, %v3257_v24 }
 0x469   : > { %3285 = sbr.rel (!%p4966_p4) target bundleno = 1134 (0x46e), region = 72 }
 0x46a   : > { %v3273_v29 = vperm.slane %v3270_v9, 0 }
 0x46c   : > { %3274 = vst [vmem:[%s448_s24] sm:$0xff] %v3273_v29 }
 0x46d   : > { %v3258_v45 = vpop.f32.mrf.mxu2  ;;  %v3271_v16 = vpop.f32.mrf.mxu3 }
 0x46e PF: > { %p21_p9 = scmp.ge.s32.totalorder %s4956_s29, 4   ;;  %s6281_s25 = smov %s4865_s26 }
 0x46f   : > { %s6282_s26 = smov %s4964_s15  ;;  %s6283_s27 = smov %s4956_s29 }
 0x470   :  { %23 = sbr.rel (!%p21_p9) target bundleno = 2 (0x2), region = 158 }

</bundles_post_ra>
